<compile_context>
chip_gen: v6e
topology: v6e:2x2x1
jax: 0.10.0
libtpu: 0.0.40
codegen_flags: <defaults>
</compile_context>

<pallas_src>
import jax
import jax.numpy as jnp
from jax import lax
from jax.experimental import pallas as pl
from jax.experimental.pallas import tpu as pltpu

# ---- small model dims (TranscriptFormer defaults scaled down) ----
INPUT_DIM = 64        # input_dim (genes)
MODULE_DIM = 16       # module_dim
HIDDEN_DIM = 32       # hidden_dim (d_model)
N_MODULES = 8         # n_modules
NHEAD = 4
HEAD_DIM = HIDDEN_DIM // NHEAD
N_ENC_LAYERS = 2
DEC_HIDDEN_DIM = HIDDEN_DIM
BATCH = 2
SEQ = N_MODULES + 1                     # cls token + modules
SEQ_PAD = ((SEQ + 7) // 8) * 8          # pad seq to a sublane multiple (16)
ROWS = BATCH * SEQ_PAD                  # padded token rows (32)
LN_EPS = 1e-5

# power-of-two shift amounts for in-kernel iota index math
SEQ_PAD_SHIFT = SEQ_PAD.bit_length() - 1     # 4
ROWS_SHIFT = ROWS.bit_length() - 1           # 5
HEAD_SHIFT = HEAD_DIM.bit_length() - 1       # 3
MD_SHIFT = MODULE_DIM.bit_length() - 1       # 4

# ---- packed parameter slab layout (all f32, 128 columns, zero padded) ----
SLAB_COLS = 128

# weight slab: row offsets (all multiples of 8 -> sublane-aligned slices)
OFF_WMOD = 0                                           # (INPUT_DIM, 128)
OFF_WFEXP = OFF_WMOD + INPUT_DIM                       # (128, HIDDEN) expand, column-fold folded in
OFF_LAYER0 = OFF_WFEXP + N_MODULES * MODULE_DIM
L_WQKV = 0                                             # (H, 3H)
L_WO = HIDDEN_DIM                                      # (H, H)
L_W1 = 2 * HIDDEN_DIM                                  # (H, 4H)
L_W2 = 3 * HIDDEN_DIM                                  # (4H, H)
LAYER_ROWS = 7 * HIDDEN_DIM                            # 224
OFF_RO_WN = OFF_LAYER0 + N_ENC_LAYERS * LAYER_ROWS     # (H, H)
OFF_RO_WML = OFF_RO_WN + HIDDEN_DIM                    # (H, 2*md)
OFF_DEC_W1 = OFF_RO_WML + HIDDEN_DIM                   # (md, dec_h)
OFF_DEC_WS = OFF_DEC_W1 + MODULE_DIM                   # (dec_h, G)
W_ROWS = OFF_DEC_WS + DEC_HIDDEN_DIM                   # 752

# bias/gain slab: one row per vector
BR_CLS_EXP = 0        # cls_token @ W_expand + b_expand
BR_B_EXP = 1          # b_expand
BR_LAYER0 = 2         # per layer: bqkv, bo, g1, be1, bf1, bf2, g2, be2
B_LAYER_ROWS = 8
BR_RO_BN = BR_LAYER0 + N_ENC_LAYERS * B_LAYER_ROWS     # 18
BR_RO_G = BR_RO_BN + 1
BR_RO_B = BR_RO_BN + 2
BR_RO_BML = BR_RO_BN + 3
BR_DEC_B1 = BR_RO_BN + 4
BR_DEC_BS = BR_RO_BN + 5
B_ROWS = BR_DEC_BS + 1                                 # 24

_VMEM = pl.BlockSpec(memory_space=pltpu.MemorySpace.VMEM)


# ---------------- in-kernel helpers ----------------
def _layernorm(x, g, b, eps=LN_EPS):
    # fused statistics: one pass for mean(x) and mean(x*x) (independent reduces)
    mu = jnp.mean(x, axis=-1, keepdims=True)
    var = jnp.mean(x * x, axis=-1, keepdims=True) - mu * mu
    return (x - mu) * lax.rsqrt(var + eps) * g + b


def _gelu(x):
    # TODO(synk): PyTorch nn.GELU() default is exact erf GELU; tanh approximation used here.
    return 0.5 * x * (1.0 + jnp.tanh(0.7978845608028654 * (x + 0.044715 * x * x * x)))


# ---------------- fused forward kernel ----------------
def _fused_kernel(x_ref, eps_ref, w_ref, b_ref, o_ref):
    f32 = jnp.float32

    def wslice(off, rows, cols):
        return w_ref[off:off + rows, 0:cols]

    def brow(row, cols):
        return b_ref[row:row + 1, 0:cols]

    x = x_ref[...]                                                           # (B, G)

    # ---- GeneModuler: relu(Linear2D(x).transpose(2,1)) ----
    # (GeneModuler.layernorm output is discarded in the reference forward -> omitted.)
    y = jnp.maximum(
        jnp.dot(x, wslice(OFF_WMOD, INPUT_DIM, N_MODULES * MODULE_DIM),
                preferred_element_type=f32), 0.0)                            # (B, n_mod*md)

    # ---- token slab (value level, no scratch stores) ----
    # replicate each sample's moduler output over its SEQ_PAD token rows
    y_rep = jnp.concatenate(
        [jnp.broadcast_to(y[b:b + 1, :], (SEQ_PAD, N_MODULES * MODULE_DIM))
         for b in range(BATCH)], axis=0)                                     # (ROWS, n_mod*md)

    # window mask: token row b*SEQ_PAD+1+j keeps only module j's 16-column window
    wr = lax.broadcasted_iota(jnp.int32, (ROWS, N_MODULES * MODULE_DIM), 0)
    wc = lax.broadcasted_iota(jnp.int32, (ROWS, N_MODULES * MODULE_DIM), 1)
    tpos = wr & (SEQ_PAD - 1)
    win = ((wc >> MD_SHIFT) == (tpos - 1)) & (tpos >= 1) & (tpos <= N_MODULES)
    y_masked = jnp.where(win, y_rep, 0.0)

    # expand Linear: weight pre-folded with the column-fold matrix at init,
    # cls rows get (cls_token @ W_expand + b_expand), other rows get b_expand
    cr = lax.broadcasted_iota(jnp.int32, (ROWS, HIDDEN_DIM), 0)
    is_cls = (cr & (SEQ_PAD - 1)) == 0
    bias_slab = jnp.where(is_cls, brow(BR_CLS_EXP, HIDDEN_DIM), brow(BR_B_EXP, HIDDEN_DIM))
    tokens = jnp.dot(y_masked, wslice(OFF_WFEXP, N_MODULES * MODULE_DIM, HIDDEN_DIM),
                     preferred_element_type=f32) + bias_slab                 # (ROWS, H)

    # ---- constant attention masks (iota-built, hoisted out of the layer loop) ----
    # additive mask replicated over the NHEAD column blocks of the (ROWS, NHEAD*ROWS) score slab
    qr = lax.broadcasted_iota(jnp.int32, (ROWS, NHEAD * ROWS), 0)
    kc = lax.broadcasted_iota(jnp.int32, (ROWS, NHEAD * ROWS), 1) & (ROWS - 1)
    same_sample = (qr >> SEQ_PAD_SHIFT) == (kc >> SEQ_PAD_SHIFT)
    key_valid = (kc & (SEQ_PAD - 1)) < SEQ
    attn_bias = jnp.where(same_sample & key_valid, 0.0, -1e9).astype(f32)

    # block-diagonal head mask for the tiled K / V slabs: (NHEAD*ROWS, H)
    hr = lax.broadcasted_iota(jnp.int32, (NHEAD * ROWS, HIDDEN_DIM), 0) >> ROWS_SHIFT
    hc = lax.broadcasted_iota(jnp.int32, (NHEAD * ROWS, HIDDEN_DIM), 1) >> HEAD_SHIFT
    head_mask = (hr == hc).astype(f32)

    # ---- TransformerEncoder: post-norm (norm_first=False), relu FFN, dropout=identity ----
    for l in range(N_ENC_LAYERS):
        woff = OFF_LAYER0 + l * LAYER_ROWS
        boff = BR_LAYER0 + l * B_LAYER_ROWS

        # packed QKV projection (1/sqrt(head_dim) folded into Wq/bq at init)
        qkv = jnp.dot(tokens, wslice(woff + L_WQKV, HIDDEN_DIM, 3 * HIDDEN_DIM),
                      preferred_element_type=f32) + brow(boff + 0, 3 * HIDDEN_DIM)   # (ROWS, 3H)
        q = qkv[:, 0:HIDDEN_DIM]
        k = qkv[:, HIDDEN_DIM:2 * HIDDEN_DIM]
        v = qkv[:, 2 * HIDDEN_DIM:3 * HIDDEN_DIM]

        # block-diagonal K / V: tile along sublanes, mask to each head's column block
        k_bd = jnp.concatenate([k] * NHEAD, axis=0) * head_mask              # (NHEAD*ROWS, H)
        v_bd = jnp.concatenate([v] * NHEAD, axis=0) * head_mask              # (NHEAD*ROWS, H)

        # all-head scores in one lane-dense MXU op: (ROWS, NHEAD*ROWS) = (32,128)
        s_all = lax.dot_general(q, k_bd, (((1,), (1,)), ((), ())),
                                preferred_element_type=f32) + attn_bias

        # per-head softmax on the 32-lane segments
        p_parts = []
        for h in range(NHEAD):
            seg = s_all[:, h * ROWS:(h + 1) * ROWS]
            m = jnp.max(seg, axis=-1, keepdims=True)
            e = jnp.exp(seg - m)
            p_parts.append(e * pl.reciprocal(jnp.sum(e, axis=-1, keepdims=True), approx=True))
        p_all = jnp.concatenate(p_parts, axis=-1)                            # (ROWS, NHEAD*ROWS)

        # all-head attention output in one MXU op: (32,128) x (128,32)
        attn = jnp.dot(p_all, v_bd, preferred_element_type=f32)              # (ROWS, H)
        attn = jnp.dot(attn, wslice(woff + L_WO, HIDDEN_DIM, HIDDEN_DIM),
                       preferred_element_type=f32) + brow(boff + 1, HIDDEN_DIM)

        x1 = _layernorm(tokens + attn, brow(boff + 2, HIDDEN_DIM), brow(boff + 3, HIDDEN_DIM))
        ff = jnp.maximum(
            jnp.dot(x1, wslice(woff + L_W1, HIDDEN_DIM, 4 * HIDDEN_DIM),
                    preferred_element_type=f32) + brow(boff + 4, 4 * HIDDEN_DIM), 0.0)
        ff = jnp.dot(ff, wslice(woff + L_W2, 4 * HIDDEN_DIM, HIDDEN_DIM),
                     preferred_element_type=f32) + brow(boff + 5, HIDDEN_DIM)
        tokens = _layernorm(x1 + ff, brow(boff + 6, HIDDEN_DIM), brow(boff + 7, HIDDEN_DIM))

    # ---- cls_rep = rep[:, 0]: two aligned sublane slices, no gather / selection matmul ----
    cls_rep = jnp.concatenate(
        [tokens[b * SEQ_PAD:b * SEQ_PAD + 1, :] for b in range(BATCH)], axis=0)   # (B, H)

    # ---- Readout: Linear -> GELU -> Dropout(id) -> LayerNorm -> mean/logvar -> rsample ----
    h1 = jnp.dot(cls_rep, wslice(OFF_RO_WN, HIDDEN_DIM, HIDDEN_DIM),
                 preferred_element_type=f32) + brow(BR_RO_BN, HIDDEN_DIM)
    h1 = _gelu(h1)
    h1 = _layernorm(h1, brow(BR_RO_G, HIDDEN_DIM), brow(BR_RO_B, HIDDEN_DIM))
    ml = jnp.dot(h1, wslice(OFF_RO_WML, HIDDEN_DIM, 2 * MODULE_DIM),
                 preferred_element_type=f32) + brow(BR_RO_BML, 2 * MODULE_DIM)     # (B, 2*md)
    mean = ml[:, :MODULE_DIM]
    logvar = ml[:, MODULE_DIM:]
    z = mean + jnp.exp(0.5 * logvar) * eps_ref[...]    # Normal(mu, sigma).rsample(), explicit eps

    # ---- ProbDecoder ----
    # TODO(synk): ProbDecoder source not included with the module; implemented as the
    # canonical scVI-style decoder: px_rate = library * softmax(W_scale relu(W1 z)).
    library = jnp.sum(x, axis=-1, keepdims=True)                             # (B, 1)
    dh = jnp.maximum(
        jnp.dot(z, wslice(OFF_DEC_W1, MODULE_DIM, DEC_HIDDEN_DIM),
                preferred_element_type=f32) + brow(BR_DEC_B1, DEC_HIDDEN_DIM), 0.0)
    logits = jnp.dot(dh, wslice(OFF_DEC_WS, DEC_HIDDEN_DIM, INPUT_DIM),
                     preferred_element_type=f32) + brow(BR_DEC_BS, INPUT_DIM)
    logits = logits - jnp.max(logits, axis=-1, keepdims=True)
    e = jnp.exp(logits)
    px_scale = e / jnp.sum(e, axis=-1, keepdims=True)
    o_ref[...] = library * px_scale


# ---------------- parameter init (deterministic, synthetic, packed slabs) ----------------
def init_params(key):
    keys = iter(jax.random.split(key, 48))

    def nrm(shape, scale=0.1):
        return (scale * jax.random.normal(next(keys), shape)).astype(jnp.float32)

    ones_h = jnp.ones((1, HIDDEN_DIM), jnp.float32)
    zeros_h = jnp.zeros((1, HIDDEN_DIM), jnp.float32)

    w_slab = jnp.zeros((W_ROWS, SLAB_COLS), jnp.float32)
    b_slab = jnp.zeros((B_ROWS, SLAB_COLS), jnp.float32)

    def put_w(slab, off, m):
        return slab.at[off:off + m.shape[0], 0:m.shape[1]].set(m)

    def put_b(slab, row, v):
        return slab.at[row, 0:v.shape[-1]].set(v.reshape(-1))

    # GeneModuler / Linear2D (bias=False): weights (G, module_dim, n_modules),
    # reordered so relu(x @ w_mod)[:, j*md:(j+1)*md] == relu(einsum('bi,ijk->bjk',x,W).transpose(2,1))[:, j, :]
    w2d = nrm((INPUT_DIM, MODULE_DIM, N_MODULES))
    w_mod = w2d.transpose(0, 2, 1).reshape(INPUT_DIM, N_MODULES * MODULE_DIM)
    w_slab = put_w(w_slab, OFF_WMOD, w_mod)

    # expand: nn.Linear(module_dim, hidden_dim); cls token
    cls_tok = nrm((1, MODULE_DIM), scale=1.0)
    w_exp = nrm((MODULE_DIM, HIDDEN_DIM))
    b_exp = nrm((1, HIDDEN_DIM))
    # column-fold matrix folded into the expand weight at init (one copy per module window)
    w_slab = put_w(w_slab, OFF_WFEXP, jnp.tile(w_exp, (N_MODULES, 1)))
    b_slab = put_b(b_slab, BR_CLS_EXP, cls_tok @ w_exp + b_exp)
    b_slab = put_b(b_slab, BR_B_EXP, b_exp)

    scale_q = 1.0 / (HEAD_DIM ** 0.5)   # attention scale folded into Wq / bq
    for l in range(N_ENC_LAYERS):
        woff = OFF_LAYER0 + l * LAYER_ROWS
        boff = BR_LAYER0 + l * B_LAYER_ROWS
        wq = nrm((HIDDEN_DIM, HIDDEN_DIM)) * scale_q
        wk = nrm((HIDDEN_DIM, HIDDEN_DIM))
        wv = nrm((HIDDEN_DIM, HIDDEN_DIM))
        bq = nrm((1, HIDDEN_DIM)) * scale_q
        bk = nrm((1, HIDDEN_DIM))
        bv = nrm((1, HIDDEN_DIM))
        w_slab = put_w(w_slab, woff + L_WQKV, jnp.concatenate([wq, wk, wv], axis=1))
        b_slab = put_b(b_slab, boff + 0, jnp.concatenate([bq, bk, bv], axis=1))
        w_slab = put_w(w_slab, woff + L_WO, nrm((HIDDEN_DIM, HIDDEN_DIM)))
        b_slab = put_b(b_slab, boff + 1, nrm((1, HIDDEN_DIM)))
        b_slab = put_b(b_slab, boff + 2, ones_h)    # ln1 gamma
        b_slab = put_b(b_slab, boff + 3, zeros_h)   # ln1 beta
        w_slab = put_w(w_slab, woff + L_W1, nrm((HIDDEN_DIM, 4 * HIDDEN_DIM)))
        b_slab = put_b(b_slab, boff + 4, nrm((1, 4 * HIDDEN_DIM)))
        w_slab = put_w(w_slab, woff + L_W2, nrm((4 * HIDDEN_DIM, HIDDEN_DIM)))
        b_slab = put_b(b_slab, boff + 5, nrm((1, HIDDEN_DIM)))
        b_slab = put_b(b_slab, boff + 6, ones_h)    # ln2 gamma
        b_slab = put_b(b_slab, boff + 7, zeros_h)   # ln2 beta

    # Readout (mean / logvar heads packed into one matmul)
    w_slab = put_w(w_slab, OFF_RO_WN, nrm((HIDDEN_DIM, HIDDEN_DIM)))
    b_slab = put_b(b_slab, BR_RO_BN, nrm((1, HIDDEN_DIM)))
    b_slab = put_b(b_slab, BR_RO_G, ones_h)
    b_slab = put_b(b_slab, BR_RO_B, zeros_h)
    wm = nrm((HIDDEN_DIM, MODULE_DIM))
    wl = nrm((HIDDEN_DIM, MODULE_DIM))
    bm = nrm((1, MODULE_DIM))
    bl = nrm((1, MODULE_DIM))
    w_slab = put_w(w_slab, OFF_RO_WML, jnp.concatenate([wm, wl], axis=1))
    b_slab = put_b(b_slab, BR_RO_BML, jnp.concatenate([bm, bl], axis=1))

    # Decoder (scVI-style approximation)
    w_slab = put_w(w_slab, OFF_DEC_W1, nrm((MODULE_DIM, DEC_HIDDEN_DIM)))
    b_slab = put_b(b_slab, BR_DEC_B1, nrm((1, DEC_HIDDEN_DIM)))
    w_slab = put_w(w_slab, OFF_DEC_WS, nrm((DEC_HIDDEN_DIM, INPUT_DIM)))
    b_slab = put_b(b_slab, BR_DEC_BS, nrm((1, INPUT_DIM)))

    return {"w": w_slab, "b": b_slab}


# ---------------- forward ----------------
def transcriptformer_forward(params, x, eps):
    return pl.pallas_call(
        _fused_kernel,
        out_shape=jax.ShapeDtypeStruct((BATCH, INPUT_DIM), jnp.float32),
        in_specs=[_VMEM, _VMEM, _VMEM, _VMEM],
        out_specs=_VMEM,
        compiler_params=pltpu.CompilerParams(vmem_limit_bytes=16 * 1024 * 1024),
    )(x, eps, params["w"], params["b"])


if __name__ == "__main__":
    key = jax.random.PRNGKey(0)
    pkey, xkey, ekey = jax.random.split(key, 3)
    params = init_params(pkey)
    # non-negative gene-expression-like counts
    x = jax.random.uniform(xkey, (BATCH, INPUT_DIM), jnp.float32, 0.0, 5.0)
    # reparameterization noise for Readout.rsample (explicit for determinism)
    eps = jax.random.normal(ekey, (BATCH, MODULE_DIM), dtype=jnp.float32)

    fwd = jax.jit(transcriptformer_forward)
    out = fwd(params, x, eps)
    jax.block_until_ready(out)
    assert out.shape == (BATCH, INPUT_DIM)
    assert bool(jnp.all(jnp.isfinite(out)))
    print("KERNEL_OK")
</pallas_src>

<mosaic_0001>
module attributes {stable_mosaic.version = 11 : i64} {
  func.func @_fused_kernel(%arg0: memref<2x64xf32, #tpu.memory_space<vmem>>, %arg1: memref<2x16xf32, #tpu.memory_space<vmem>>, %arg2: memref<752x128xf32, #tpu.memory_space<vmem>>, %arg3: memref<24x128xf32, #tpu.memory_space<vmem>>, %arg4: memref<2x64xf32, #tpu.memory_space<vmem>>) attributes {dimension_semantics = [], scalar_prefetch = 0 : i64, scratch_operands = 0 : i64, tpu.core_type = #tpu.core_type<tc>} {
    %c0 = arith.constant 0 : index
    %c0_0 = arith.constant 0 : index
    %0 = vector.load %arg0[%c0, %c0_0] : memref<2x64xf32, #tpu.memory_space<vmem>>, vector<2x64xf32>
    %c0_1 = arith.constant 0 : index
    %c0_2 = arith.constant 0 : index
    %1 = vector.load %arg2[%c0_1, %c0_2] : memref<752x128xf32, #tpu.memory_space<vmem>>, vector<64x128xf32>
    %cst = arith.constant dense<0.000000e+00> : vector<2x128xf32>
    %2 = tpu.matmul %0, %1, %cst {dimension_numbers = #tpu.dot_dimension_numbers<[1], [0], [0], [1], [0, 0, 1, 1], [], []>} : vector<2x64xf32>, vector<64x128xf32>, vector<2x128xf32> -> vector<2x128xf32>
    %cst_3 = arith.constant 0.000000e+00 : f32
    %3 = vector.broadcast %cst_3 : f32 to vector<2x128xf32>
    %4 = arith.maximumf %2, %3 : vector<2x128xf32>
    %5 = vector.extract_strided_slice %4 {offsets = [0, 0], sizes = [1, 128], strides = [1, 1]} : vector<2x128xf32> to vector<1x128xf32>
    %6 = vector.shape_cast %5 : vector<1x128xf32> to vector<1x128xf32>
    %7 = vector.broadcast %6 : vector<1x128xf32> to vector<16x128xf32>
    %8 = vector.extract_strided_slice %4 {offsets = [1, 0], sizes = [1, 128], strides = [1, 1]} : vector<2x128xf32> to vector<1x128xf32>
    %9 = vector.shape_cast %8 : vector<1x128xf32> to vector<1x128xf32>
    %10 = vector.broadcast %9 : vector<1x128xf32> to vector<16x128xf32>
    %11 = tpu.concatenate %7, %10 in 0 : vector<16x128xf32>, vector<16x128xf32> -> vector<32x128xf32>
    %12 = tpu.iota {dimensions = array<i32: 0>} : vector<32x128xi32>
    %13 = tpu.iota {dimensions = array<i32: 1>} : vector<32x128xi32>
    %c15_i32 = arith.constant 15 : i32
    %14 = vector.broadcast %c15_i32 : i32 to vector<32x128xi32>
    %15 = arith.andi %12, %14 : vector<32x128xi32>
    %c4_i32 = arith.constant 4 : i32
    %16 = vector.broadcast %c4_i32 : i32 to vector<32x128xi32>
    %17 = arith.shrsi %13, %16 : vector<32x128xi32>
    %c1_i32 = arith.constant 1 : i32
    %18 = vector.broadcast %c1_i32 : i32 to vector<32x128xi32>
    %19 = arith.subi %15, %18 : vector<32x128xi32>
    %20 = arith.cmpi eq, %17, %19 : vector<32x128xi32>
    %c1_i32_4 = arith.constant 1 : i32
    %21 = vector.broadcast %c1_i32_4 : i32 to vector<32x128xi32>
    %22 = arith.cmpi sge, %15, %21 : vector<32x128xi32>
    %23 = arith.andi %20, %22 : vector<32x128xi1>
    %c8_i32 = arith.constant 8 : i32
    %24 = vector.broadcast %c8_i32 : i32 to vector<32x128xi32>
    %25 = arith.cmpi sle, %15, %24 : vector<32x128xi32>
    %26 = arith.andi %23, %25 : vector<32x128xi1>
    %cst_5 = arith.constant 0.000000e+00 : f32
    %27 = vector.broadcast %cst_5 : f32 to vector<32x128xf32>
    %28 = arith.select %26, %11, %27 : vector<32x128xi1>, vector<32x128xf32>
    %29 = tpu.iota {dimensions = array<i32: 0>} : vector<32x32xi32>
    %c15_i32_6 = arith.constant 15 : i32
    %30 = vector.broadcast %c15_i32_6 : i32 to vector<32x32xi32>
    %31 = arith.andi %29, %30 : vector<32x32xi32>
    %c0_i32 = arith.constant 0 : i32
    %32 = vector.broadcast %c0_i32 : i32 to vector<32x32xi32>
    %33 = arith.cmpi eq, %31, %32 : vector<32x32xi32>
    %c0_7 = arith.constant 0 : index
    %c0_8 = arith.constant 0 : index
    %34 = vector.load %arg3[%c0_7, %c0_8] : memref<24x128xf32, #tpu.memory_space<vmem>>, vector<1x32xf32>
    %c1 = arith.constant 1 : index
    %c0_9 = arith.constant 0 : index
    %35 = vector.load %arg3[%c1, %c0_9] : memref<24x128xf32, #tpu.memory_space<vmem>>, vector<1x32xf32>
    %36 = vector.shape_cast %34 : vector<1x32xf32> to vector<1x32xf32>
    %37 = vector.broadcast %36 : vector<1x32xf32> to vector<32x32xf32>
    %38 = vector.shape_cast %35 : vector<1x32xf32> to vector<1x32xf32>
    %39 = vector.broadcast %38 : vector<1x32xf32> to vector<32x32xf32>
    %40 = arith.select %33, %37, %39 : vector<32x32xi1>, vector<32x32xf32>
    %c64 = arith.constant 64 : index
    %c0_10 = arith.constant 0 : index
    %41 = vector.load %arg2[%c64, %c0_10] : memref<752x128xf32, #tpu.memory_space<vmem>>, vector<128x32xf32>
    %cst_11 = arith.constant dense<0.000000e+00> : vector<32x32xf32>
    %42 = tpu.matmul %28, %41, %cst_11 {dimension_numbers = #tpu.dot_dimension_numbers<[1], [0], [0], [1], [0, 0, 1, 1], [], []>} : vector<32x128xf32>, vector<128x32xf32>, vector<32x32xf32> -> vector<32x32xf32>
    %43 = arith.addf %42, %40 : vector<32x32xf32>
    %44 = tpu.iota {dimensions = array<i32: 0>} : vector<32x128xi32>
    %45 = tpu.iota {dimensions = array<i32: 1>} : vector<32x128xi32>
    %c31_i32 = arith.constant 31 : i32
    %46 = vector.broadcast %c31_i32 : i32 to vector<32x128xi32>
    %47 = arith.andi %45, %46 : vector<32x128xi32>
    %c4_i32_12 = arith.constant 4 : i32
    %48 = vector.broadcast %c4_i32_12 : i32 to vector<32x128xi32>
    %49 = arith.shrsi %44, %48 : vector<32x128xi32>
    %c4_i32_13 = arith.constant 4 : i32
    %50 = vector.broadcast %c4_i32_13 : i32 to vector<32x128xi32>
    %51 = arith.shrsi %47, %50 : vector<32x128xi32>
    %52 = arith.cmpi eq, %49, %51 : vector<32x128xi32>
    %c15_i32_14 = arith.constant 15 : i32
    %53 = vector.broadcast %c15_i32_14 : i32 to vector<32x128xi32>
    %54 = arith.andi %47, %53 : vector<32x128xi32>
    %c9_i32 = arith.constant 9 : i32
    %55 = vector.broadcast %c9_i32 : i32 to vector<32x128xi32>
    %56 = arith.cmpi slt, %54, %55 : vector<32x128xi32>
    %57 = arith.andi %52, %56 : vector<32x128xi1>
    %cst_15 = arith.constant 0.000000e+00 : f32
    %cst_16 = arith.constant -1.000000e+09 : f32
    %58 = vector.broadcast %cst_15 : f32 to vector<32x128xf32>
    %59 = vector.broadcast %cst_16 : f32 to vector<32x128xf32>
    %60 = arith.select %57, %58, %59 : vector<32x128xi1>, vector<32x128xf32>
    %61 = tpu.iota {dimensions = array<i32: 0>} : vector<128x32xi32>
    %c5_i32 = arith.constant 5 : i32
    %62 = vector.broadcast %c5_i32 : i32 to vector<128x32xi32>
    %63 = arith.shrsi %61, %62 : vector<128x32xi32>
    %64 = tpu.iota {dimensions = array<i32: 1>} : vector<128x32xi32>
    %c3_i32 = arith.constant 3 : i32
    %65 = vector.broadcast %c3_i32 : i32 to vector<128x32xi32>
    %66 = arith.shrsi %64, %65 : vector<128x32xi32>
    %67 = arith.cmpi eq, %63, %66 : vector<128x32xi32>
    %68 = arith.extui %67 : vector<128x32xi1> to vector<128x32xi32>
    %69 = arith.sitofp %68 : vector<128x32xi32> to vector<128x32xf32>
    %c192 = arith.constant 192 : index
    %c0_17 = arith.constant 0 : index
    %70 = vector.load %arg2[%c192, %c0_17] : memref<752x128xf32, #tpu.memory_space<vmem>>, vector<32x96xf32>
    %cst_18 = arith.constant dense<0.000000e+00> : vector<32x96xf32>
    %71 = tpu.matmul %43, %70, %cst_18 {dimension_numbers = #tpu.dot_dimension_numbers<[1], [0], [0], [1], [0, 0, 1, 1], [], []>} : vector<32x32xf32>, vector<32x96xf32>, vector<32x96xf32> -> vector<32x96xf32>
    %c2 = arith.constant 2 : index
    %c0_19 = arith.constant 0 : index
    %72 = vector.load %arg3[%c2, %c0_19] : memref<24x128xf32, #tpu.memory_space<vmem>>, vector<1x96xf32>
    %73 = vector.broadcast %72 : vector<1x96xf32> to vector<32x96xf32>
    %74 = arith.addf %71, %73 : vector<32x96xf32>
    %75 = vector.extract_strided_slice %74 {offsets = [0, 0], sizes = [32, 32], strides = [1, 1]} : vector<32x96xf32> to vector<32x32xf32>
    %76 = vector.extract_strided_slice %74 {offsets = [0, 32], sizes = [32, 32], strides = [1, 1]} : vector<32x96xf32> to vector<32x32xf32>
    %77 = vector.extract_strided_slice %74 {offsets = [0, 64], sizes = [32, 32], strides = [1, 1]} : vector<32x96xf32> to vector<32x32xf32>
    %78 = tpu.concatenate %76, %76, %76, %76 in 0 : vector<32x32xf32>, vector<32x32xf32>, vector<32x32xf32>, vector<32x32xf32> -> vector<128x32xf32>
    %79 = arith.mulf %78, %69 : vector<128x32xf32>
    %80 = tpu.concatenate %77, %77, %77, %77 in 0 : vector<32x32xf32>, vector<32x32xf32>, vector<32x32xf32>, vector<32x32xf32> -> vector<128x32xf32>
    %81 = arith.mulf %80, %69 : vector<128x32xf32>
    %cst_20 = arith.constant dense<0.000000e+00> : vector<32x128xf32>
    %82 = tpu.matmul %75, %79, %cst_20 {dimension_numbers = #tpu.dot_dimension_numbers<[1], [1], [0], [0], [0, 0, 1, 0], [], []>} : vector<32x32xf32>, vector<128x32xf32>, vector<32x128xf32> -> vector<32x128xf32>
    %83 = arith.addf %82, %60 : vector<32x128xf32>
    %84 = vector.extract_strided_slice %83 {offsets = [0, 0], sizes = [32, 32], strides = [1, 1]} : vector<32x128xf32> to vector<32x32xf32>
    %cst_21 = arith.constant dense<0xFF800000> : vector<32xf32>
    %85 = vector.multi_reduction <maximumf>, %84, %cst_21 [1] : vector<32x32xf32> to vector<32xf32>
    %86 = vector.shape_cast %85 : vector<32xf32> to vector<32x1xf32>
    %87 = vector.broadcast %86 : vector<32x1xf32> to vector<32x32xf32>
    %88 = arith.subf %84, %87 : vector<32x32xf32>
    %89 = math.exp %88 : vector<32x32xf32>
    %cst_22 = arith.constant dense<0.000000e+00> : vector<32xf32>
    %90 = vector.multi_reduction <add>, %89, %cst_22 [1] : vector<32x32xf32> to vector<32xf32>
    %91 = vector.shape_cast %90 : vector<32xf32> to vector<32x1xf32>
    %92 = tpu.reciprocal %91 {approx = true} : vector<32x1xf32> -> vector<32x1xf32>
    %93 = vector.broadcast %92 : vector<32x1xf32> to vector<32x32xf32>
    %94 = arith.mulf %89, %93 : vector<32x32xf32>
    %95 = vector.extract_strided_slice %83 {offsets = [0, 32], sizes = [32, 32], strides = [1, 1]} : vector<32x128xf32> to vector<32x32xf32>
    %cst_23 = arith.constant dense<0xFF800000> : vector<32xf32>
    %96 = vector.multi_reduction <maximumf>, %95, %cst_23 [1] : vector<32x32xf32> to vector<32xf32>
    %97 = vector.shape_cast %96 : vector<32xf32> to vector<32x1xf32>
    %98 = vector.broadcast %97 : vector<32x1xf32> to vector<32x32xf32>
    %99 = arith.subf %95, %98 : vector<32x32xf32>
    %100 = math.exp %99 : vector<32x32xf32>
    %cst_24 = arith.constant dense<0.000000e+00> : vector<32xf32>
    %101 = vector.multi_reduction <add>, %100, %cst_24 [1] : vector<32x32xf32> to vector<32xf32>
    %102 = vector.shape_cast %101 : vector<32xf32> to vector<32x1xf32>
    %103 = tpu.reciprocal %102 {approx = true} : vector<32x1xf32> -> vector<32x1xf32>
    %104 = vector.broadcast %103 : vector<32x1xf32> to vector<32x32xf32>
    %105 = arith.mulf %100, %104 : vector<32x32xf32>
    %106 = vector.extract_strided_slice %83 {offsets = [0, 64], sizes = [32, 32], strides = [1, 1]} : vector<32x128xf32> to vector<32x32xf32>
    %cst_25 = arith.constant dense<0xFF800000> : vector<32xf32>
    %107 = vector.multi_reduction <maximumf>, %106, %cst_25 [1] : vector<32x32xf32> to vector<32xf32>
    %108 = vector.shape_cast %107 : vector<32xf32> to vector<32x1xf32>
    %109 = vector.broadcast %108 : vector<32x1xf32> to vector<32x32xf32>
    %110 = arith.subf %106, %109 : vector<32x32xf32>
    %111 = math.exp %110 : vector<32x32xf32>
    %cst_26 = arith.constant dense<0.000000e+00> : vector<32xf32>
    %112 = vector.multi_reduction <add>, %111, %cst_26 [1] : vector<32x32xf32> to vector<32xf32>
    %113 = vector.shape_cast %112 : vector<32xf32> to vector<32x1xf32>
    %114 = tpu.reciprocal %113 {approx = true} : vector<32x1xf32> -> vector<32x1xf32>
    %115 = vector.broadcast %114 : vector<32x1xf32> to vector<32x32xf32>
    %116 = arith.mulf %111, %115 : vector<32x32xf32>
    %117 = vector.extract_strided_slice %83 {offsets = [0, 96], sizes = [32, 32], strides = [1, 1]} : vector<32x128xf32> to vector<32x32xf32>
    %cst_27 = arith.constant dense<0xFF800000> : vector<32xf32>
    %118 = vector.multi_reduction <maximumf>, %117, %cst_27 [1] : vector<32x32xf32> to vector<32xf32>
    %119 = vector.shape_cast %118 : vector<32xf32> to vector<32x1xf32>
    %120 = vector.broadcast %119 : vector<32x1xf32> to vector<32x32xf32>
    %121 = arith.subf %117, %120 : vector<32x32xf32>
    %122 = math.exp %121 : vector<32x32xf32>
    %cst_28 = arith.constant dense<0.000000e+00> : vector<32xf32>
    %123 = vector.multi_reduction <add>, %122, %cst_28 [1] : vector<32x32xf32> to vector<32xf32>
    %124 = vector.shape_cast %123 : vector<32xf32> to vector<32x1xf32>
    %125 = tpu.reciprocal %124 {approx = true} : vector<32x1xf32> -> vector<32x1xf32>
    %126 = vector.broadcast %125 : vector<32x1xf32> to vector<32x32xf32>
    %127 = arith.mulf %122, %126 : vector<32x32xf32>
    %128 = tpu.concatenate %94, %105, %116, %127 in 1 : vector<32x32xf32>, vector<32x32xf32>, vector<32x32xf32>, vector<32x32xf32> -> vector<32x128xf32>
    %cst_29 = arith.constant dense<0.000000e+00> : vector<32x32xf32>
    %129 = tpu.matmul %128, %81, %cst_29 {dimension_numbers = #tpu.dot_dimension_numbers<[1], [0], [0], [1], [0, 0, 1, 1], [], []>} : vector<32x128xf32>, vector<128x32xf32>, vector<32x32xf32> -> vector<32x32xf32>
    %c224 = arith.constant 224 : index
    %c0_30 = arith.constant 0 : index
    %130 = vector.load %arg2[%c224, %c0_30] : memref<752x128xf32, #tpu.memory_space<vmem>>, vector<32x32xf32>
    %cst_31 = arith.constant dense<0.000000e+00> : vector<32x32xf32>
    %131 = tpu.matmul %129, %130, %cst_31 {dimension_numbers = #tpu.dot_dimension_numbers<[1], [0], [0], [1], [0, 0, 1, 1], [], []>} : vector<32x32xf32>, vector<32x32xf32>, vector<32x32xf32> -> vector<32x32xf32>
    %c3 = arith.constant 3 : index
    %c0_32 = arith.constant 0 : index
    %132 = vector.load %arg3[%c3, %c0_32] : memref<24x128xf32, #tpu.memory_space<vmem>>, vector<1x32xf32>
    %133 = vector.broadcast %132 : vector<1x32xf32> to vector<32x32xf32>
    %134 = arith.addf %131, %133 : vector<32x32xf32>
    %135 = arith.addf %43, %134 : vector<32x32xf32>
    %c4 = arith.constant 4 : index
    %c0_33 = arith.constant 0 : index
    %136 = vector.load %arg3[%c4, %c0_33] : memref<24x128xf32, #tpu.memory_space<vmem>>, vector<1x32xf32>
    %c5 = arith.constant 5 : index
    %c0_34 = arith.constant 0 : index
    %137 = vector.load %arg3[%c5, %c0_34] : memref<24x128xf32, #tpu.memory_space<vmem>>, vector<1x32xf32>
    %cst_35 = arith.constant dense<0.000000e+00> : vector<32xf32>
    %138 = vector.multi_reduction <add>, %135, %cst_35 [1] : vector<32x32xf32> to vector<32xf32>
    %139 = vector.shape_cast %138 : vector<32xf32> to vector<32x1xf32>
    %cst_36 = arith.constant 3.200000e+01 : f32
    %140 = vector.broadcast %cst_36 : f32 to vector<32x1xf32>
    %141 = arith.divf %139, %140 : vector<32x1xf32>
    %142 = arith.mulf %135, %135 : vector<32x32xf32>
    %cst_37 = arith.constant dense<0.000000e+00> : vector<32xf32>
    %143 = vector.multi_reduction <add>, %142, %cst_37 [1] : vector<32x32xf32> to vector<32xf32>
    %144 = vector.shape_cast %143 : vector<32xf32> to vector<32x1xf32>
    %cst_38 = arith.constant 3.200000e+01 : f32
    %145 = vector.broadcast %cst_38 : f32 to vector<32x1xf32>
    %146 = arith.divf %144, %145 : vector<32x1xf32>
    %147 = arith.mulf %141, %141 : vector<32x1xf32>
    %148 = arith.subf %146, %147 : vector<32x1xf32>
    %149 = vector.broadcast %141 : vector<32x1xf32> to vector<32x32xf32>
    %150 = arith.subf %135, %149 : vector<32x32xf32>
    %cst_39 = arith.constant 9.99999974E-6 : f32
    %151 = vector.broadcast %cst_39 : f32 to vector<32x1xf32>
    %152 = arith.addf %148, %151 : vector<32x1xf32>
    %153 = math.rsqrt %152 : vector<32x1xf32>
    %154 = vector.broadcast %153 : vector<32x1xf32> to vector<32x32xf32>
    %155 = arith.mulf %150, %154 : vector<32x32xf32>
    %156 = vector.broadcast %136 : vector<1x32xf32> to vector<32x32xf32>
    %157 = arith.mulf %155, %156 : vector<32x32xf32>
    %158 = vector.broadcast %137 : vector<1x32xf32> to vector<32x32xf32>
    %159 = arith.addf %157, %158 : vector<32x32xf32>
    %c256 = arith.constant 256 : index
    %c0_40 = arith.constant 0 : index
    %160 = vector.load %arg2[%c256, %c0_40] : memref<752x128xf32, #tpu.memory_space<vmem>>, vector<32x128xf32>
    %cst_41 = arith.constant dense<0.000000e+00> : vector<32x128xf32>
    %161 = tpu.matmul %159, %160, %cst_41 {dimension_numbers = #tpu.dot_dimension_numbers<[1], [0], [0], [1], [0, 0, 1, 1], [], []>} : vector<32x32xf32>, vector<32x128xf32>, vector<32x128xf32> -> vector<32x128xf32>
    %c6 = arith.constant 6 : index
    %c0_42 = arith.constant 0 : index
    %162 = vector.load %arg3[%c6, %c0_42] : memref<24x128xf32, #tpu.memory_space<vmem>>, vector<1x128xf32>
    %163 = vector.broadcast %162 : vector<1x128xf32> to vector<32x128xf32>
    %164 = arith.addf %161, %163 : vector<32x128xf32>
    %cst_43 = arith.constant 0.000000e+00 : f32
    %165 = vector.broadcast %cst_43 : f32 to vector<32x128xf32>
    %166 = arith.maximumf %164, %165 : vector<32x128xf32>
    %c288 = arith.constant 288 : index
    %c0_44 = arith.constant 0 : index
    %167 = vector.load %arg2[%c288, %c0_44] : memref<752x128xf32, #tpu.memory_space<vmem>>, vector<128x32xf32>
    %cst_45 = arith.constant dense<0.000000e+00> : vector<32x32xf32>
    %168 = tpu.matmul %166, %167, %cst_45 {dimension_numbers = #tpu.dot_dimension_numbers<[1], [0], [0], [1], [0, 0, 1, 1], [], []>} : vector<32x128xf32>, vector<128x32xf32>, vector<32x32xf32> -> vector<32x32xf32>
    %c7 = arith.constant 7 : index
    %c0_46 = arith.constant 0 : index
    %169 = vector.load %arg3[%c7, %c0_46] : memref<24x128xf32, #tpu.memory_space<vmem>>, vector<1x32xf32>
    %170 = vector.broadcast %169 : vector<1x32xf32> to vector<32x32xf32>
    %171 = arith.addf %168, %170 : vector<32x32xf32>
    %172 = arith.addf %159, %171 : vector<32x32xf32>
    %c8 = arith.constant 8 : index
    %c0_47 = arith.constant 0 : index
    %173 = vector.load %arg3[%c8, %c0_47] : memref<24x128xf32, #tpu.memory_space<vmem>>, vector<1x32xf32>
    %c9 = arith.constant 9 : index
    %c0_48 = arith.constant 0 : index
    %174 = vector.load %arg3[%c9, %c0_48] : memref<24x128xf32, #tpu.memory_space<vmem>>, vector<1x32xf32>
    %cst_49 = arith.constant dense<0.000000e+00> : vector<32xf32>
    %175 = vector.multi_reduction <add>, %172, %cst_49 [1] : vector<32x32xf32> to vector<32xf32>
    %176 = vector.shape_cast %175 : vector<32xf32> to vector<32x1xf32>
    %cst_50 = arith.constant 3.200000e+01 : f32
    %177 = vector.broadcast %cst_50 : f32 to vector<32x1xf32>
    %178 = arith.divf %176, %177 : vector<32x1xf32>
    %179 = arith.mulf %172, %172 : vector<32x32xf32>
    %cst_51 = arith.constant dense<0.000000e+00> : vector<32xf32>
    %180 = vector.multi_reduction <add>, %179, %cst_51 [1] : vector<32x32xf32> to vector<32xf32>
    %181 = vector.shape_cast %180 : vector<32xf32> to vector<32x1xf32>
    %cst_52 = arith.constant 3.200000e+01 : f32
    %182 = vector.broadcast %cst_52 : f32 to vector<32x1xf32>
    %183 = arith.divf %181, %182 : vector<32x1xf32>
    %184 = arith.mulf %178, %178 : vector<32x1xf32>
    %185 = arith.subf %183, %184 : vector<32x1xf32>
    %186 = vector.broadcast %178 : vector<32x1xf32> to vector<32x32xf32>
    %187 = arith.subf %172, %186 : vector<32x32xf32>
    %cst_53 = arith.constant 9.99999974E-6 : f32
    %188 = vector.broadcast %cst_53 : f32 to vector<32x1xf32>
    %189 = arith.addf %185, %188 : vector<32x1xf32>
    %190 = math.rsqrt %189 : vector<32x1xf32>
    %191 = vector.broadcast %190 : vector<32x1xf32> to vector<32x32xf32>
    %192 = arith.mulf %187, %191 : vector<32x32xf32>
    %193 = vector.broadcast %173 : vector<1x32xf32> to vector<32x32xf32>
    %194 = arith.mulf %192, %193 : vector<32x32xf32>
    %195 = vector.broadcast %174 : vector<1x32xf32> to vector<32x32xf32>
    %196 = arith.addf %194, %195 : vector<32x32xf32>
    %c416 = arith.constant 416 : index
    %c0_54 = arith.constant 0 : index
    %197 = vector.load %arg2[%c416, %c0_54] : memref<752x128xf32, #tpu.memory_space<vmem>>, vector<32x96xf32>
    %cst_55 = arith.constant dense<0.000000e+00> : vector<32x96xf32>
    %198 = tpu.matmul %196, %197, %cst_55 {dimension_numbers = #tpu.dot_dimension_numbers<[1], [0], [0], [1], [0, 0, 1, 1], [], []>} : vector<32x32xf32>, vector<32x96xf32>, vector<32x96xf32> -> vector<32x96xf32>
    %c10 = arith.constant 10 : index
    %c0_56 = arith.constant 0 : index
    %199 = vector.load %arg3[%c10, %c0_56] : memref<24x128xf32, #tpu.memory_space<vmem>>, vector<1x96xf32>
    %200 = vector.broadcast %199 : vector<1x96xf32> to vector<32x96xf32>
    %201 = arith.addf %198, %200 : vector<32x96xf32>
    %202 = vector.extract_strided_slice %201 {offsets = [0, 0], sizes = [32, 32], strides = [1, 1]} : vector<32x96xf32> to vector<32x32xf32>
    %203 = vector.extract_strided_slice %201 {offsets = [0, 32], sizes = [32, 32], strides = [1, 1]} : vector<32x96xf32> to vector<32x32xf32>
    %204 = vector.extract_strided_slice %201 {offsets = [0, 64], sizes = [32, 32], strides = [1, 1]} : vector<32x96xf32> to vector<32x32xf32>
    %205 = tpu.concatenate %203, %203, %203, %203 in 0 : vector<32x32xf32>, vector<32x32xf32>, vector<32x32xf32>, vector<32x32xf32> -> vector<128x32xf32>
    %206 = arith.mulf %205, %69 : vector<128x32xf32>
    %207 = tpu.concatenate %204, %204, %204, %204 in 0 : vector<32x32xf32>, vector<32x32xf32>, vector<32x32xf32>, vector<32x32xf32> -> vector<128x32xf32>
    %208 = arith.mulf %207, %69 : vector<128x32xf32>
    %cst_57 = arith.constant dense<0.000000e+00> : vector<32x128xf32>
    %209 = tpu.matmul %202, %206, %cst_57 {dimension_numbers = #tpu.dot_dimension_numbers<[1], [1], [0], [0], [0, 0, 1, 0], [], []>} : vector<32x32xf32>, vector<128x32xf32>, vector<32x128xf32> -> vector<32x128xf32>
    %210 = arith.addf %209, %60 : vector<32x128xf32>
    %211 = vector.extract_strided_slice %210 {offsets = [0, 0], sizes = [32, 32], strides = [1, 1]} : vector<32x128xf32> to vector<32x32xf32>
    %cst_58 = arith.constant dense<0xFF800000> : vector<32xf32>
    %212 = vector.multi_reduction <maximumf>, %211, %cst_58 [1] : vector<32x32xf32> to vector<32xf32>
    %213 = vector.shape_cast %212 : vector<32xf32> to vector<32x1xf32>
    %214 = vector.broadcast %213 : vector<32x1xf32> to vector<32x32xf32>
    %215 = arith.subf %211, %214 : vector<32x32xf32>
    %216 = math.exp %215 : vector<32x32xf32>
    %cst_59 = arith.constant dense<0.000000e+00> : vector<32xf32>
    %217 = vector.multi_reduction <add>, %216, %cst_59 [1] : vector<32x32xf32> to vector<32xf32>
    %218 = vector.shape_cast %217 : vector<32xf32> to vector<32x1xf32>
    %219 = tpu.reciprocal %218 {approx = true} : vector<32x1xf32> -> vector<32x1xf32>
    %220 = vector.broadcast %219 : vector<32x1xf32> to vector<32x32xf32>
    %221 = arith.mulf %216, %220 : vector<32x32xf32>
    %222 = vector.extract_strided_slice %210 {offsets = [0, 32], sizes = [32, 32], strides = [1, 1]} : vector<32x128xf32> to vector<32x32xf32>
    %cst_60 = arith.constant dense<0xFF800000> : vector<32xf32>
    %223 = vector.multi_reduction <maximumf>, %222, %cst_60 [1] : vector<32x32xf32> to vector<32xf32>
    %224 = vector.shape_cast %223 : vector<32xf32> to vector<32x1xf32>
    %225 = vector.broadcast %224 : vector<32x1xf32> to vector<32x32xf32>
    %226 = arith.subf %222, %225 : vector<32x32xf32>
    %227 = math.exp %226 : vector<32x32xf32>
    %cst_61 = arith.constant dense<0.000000e+00> : vector<32xf32>
    %228 = vector.multi_reduction <add>, %227, %cst_61 [1] : vector<32x32xf32> to vector<32xf32>
    %229 = vector.shape_cast %228 : vector<32xf32> to vector<32x1xf32>
    %230 = tpu.reciprocal %229 {approx = true} : vector<32x1xf32> -> vector<32x1xf32>
    %231 = vector.broadcast %230 : vector<32x1xf32> to vector<32x32xf32>
    %232 = arith.mulf %227, %231 : vector<32x32xf32>
    %233 = vector.extract_strided_slice %210 {offsets = [0, 64], sizes = [32, 32], strides = [1, 1]} : vector<32x128xf32> to vector<32x32xf32>
    %cst_62 = arith.constant dense<0xFF800000> : vector<32xf32>
    %234 = vector.multi_reduction <maximumf>, %233, %cst_62 [1] : vector<32x32xf32> to vector<32xf32>
    %235 = vector.shape_cast %234 : vector<32xf32> to vector<32x1xf32>
    %236 = vector.broadcast %235 : vector<32x1xf32> to vector<32x32xf32>
    %237 = arith.subf %233, %236 : vector<32x32xf32>
    %238 = math.exp %237 : vector<32x32xf32>
    %cst_63 = arith.constant dense<0.000000e+00> : vector<32xf32>
    %239 = vector.multi_reduction <add>, %238, %cst_63 [1] : vector<32x32xf32> to vector<32xf32>
    %240 = vector.shape_cast %239 : vector<32xf32> to vector<32x1xf32>
    %241 = tpu.reciprocal %240 {approx = true} : vector<32x1xf32> -> vector<32x1xf32>
    %242 = vector.broadcast %241 : vector<32x1xf32> to vector<32x32xf32>
    %243 = arith.mulf %238, %242 : vector<32x32xf32>
    %244 = vector.extract_strided_slice %210 {offsets = [0, 96], sizes = [32, 32], strides = [1, 1]} : vector<32x128xf32> to vector<32x32xf32>
    %cst_64 = arith.constant dense<0xFF800000> : vector<32xf32>
    %245 = vector.multi_reduction <maximumf>, %244, %cst_64 [1] : vector<32x32xf32> to vector<32xf32>
    %246 = vector.shape_cast %245 : vector<32xf32> to vector<32x1xf32>
    %247 = vector.broadcast %246 : vector<32x1xf32> to vector<32x32xf32>
    %248 = arith.subf %244, %247 : vector<32x32xf32>
    %249 = math.exp %248 : vector<32x32xf32>
    %cst_65 = arith.constant dense<0.000000e+00> : vector<32xf32>
    %250 = vector.multi_reduction <add>, %249, %cst_65 [1] : vector<32x32xf32> to vector<32xf32>
    %251 = vector.shape_cast %250 : vector<32xf32> to vector<32x1xf32>
    %252 = tpu.reciprocal %251 {approx = true} : vector<32x1xf32> -> vector<32x1xf32>
    %253 = vector.broadcast %252 : vector<32x1xf32> to vector<32x32xf32>
    %254 = arith.mulf %249, %253 : vector<32x32xf32>
    %255 = tpu.concatenate %221, %232, %243, %254 in 1 : vector<32x32xf32>, vector<32x32xf32>, vector<32x32xf32>, vector<32x32xf32> -> vector<32x128xf32>
    %cst_66 = arith.constant dense<0.000000e+00> : vector<32x32xf32>
    %256 = tpu.matmul %255, %208, %cst_66 {dimension_numbers = #tpu.dot_dimension_numbers<[1], [0], [0], [1], [0, 0, 1, 1], [], []>} : vector<32x128xf32>, vector<128x32xf32>, vector<32x32xf32> -> vector<32x32xf32>
    %c448 = arith.constant 448 : index
    %c0_67 = arith.constant 0 : index
    %257 = vector.load %arg2[%c448, %c0_67] : memref<752x128xf32, #tpu.memory_space<vmem>>, vector<32x32xf32>
    %cst_68 = arith.constant dense<0.000000e+00> : vector<32x32xf32>
    %258 = tpu.matmul %256, %257, %cst_68 {dimension_numbers = #tpu.dot_dimension_numbers<[1], [0], [0], [1], [0, 0, 1, 1], [], []>} : vector<32x32xf32>, vector<32x32xf32>, vector<32x32xf32> -> vector<32x32xf32>
    %c11 = arith.constant 11 : index
    %c0_69 = arith.constant 0 : index
    %259 = vector.load %arg3[%c11, %c0_69] : memref<24x128xf32, #tpu.memory_space<vmem>>, vector<1x32xf32>
    %260 = vector.broadcast %259 : vector<1x32xf32> to vector<32x32xf32>
    %261 = arith.addf %258, %260 : vector<32x32xf32>
    %262 = arith.addf %196, %261 : vector<32x32xf32>
    %c12 = arith.constant 12 : index
    %c0_70 = arith.constant 0 : index
    %263 = vector.load %arg3[%c12, %c0_70] : memref<24x128xf32, #tpu.memory_space<vmem>>, vector<1x32xf32>
    %c13 = arith.constant 13 : index
    %c0_71 = arith.constant 0 : index
    %264 = vector.load %arg3[%c13, %c0_71] : memref<24x128xf32, #tpu.memory_space<vmem>>, vector<1x32xf32>
    %cst_72 = arith.constant dense<0.000000e+00> : vector<32xf32>
    %265 = vector.multi_reduction <add>, %262, %cst_72 [1] : vector<32x32xf32> to vector<32xf32>
    %266 = vector.shape_cast %265 : vector<32xf32> to vector<32x1xf32>
    %cst_73 = arith.constant 3.200000e+01 : f32
    %267 = vector.broadcast %cst_73 : f32 to vector<32x1xf32>
    %268 = arith.divf %266, %267 : vector<32x1xf32>
    %269 = arith.mulf %262, %262 : vector<32x32xf32>
    %cst_74 = arith.constant dense<0.000000e+00> : vector<32xf32>
    %270 = vector.multi_reduction <add>, %269, %cst_74 [1] : vector<32x32xf32> to vector<32xf32>
    %271 = vector.shape_cast %270 : vector<32xf32> to vector<32x1xf32>
    %cst_75 = arith.constant 3.200000e+01 : f32
    %272 = vector.broadcast %cst_75 : f32 to vector<32x1xf32>
    %273 = arith.divf %271, %272 : vector<32x1xf32>
    %274 = arith.mulf %268, %268 : vector<32x1xf32>
    %275 = arith.subf %273, %274 : vector<32x1xf32>
    %276 = vector.broadcast %268 : vector<32x1xf32> to vector<32x32xf32>
    %277 = arith.subf %262, %276 : vector<32x32xf32>
    %cst_76 = arith.constant 9.99999974E-6 : f32
    %278 = vector.broadcast %cst_76 : f32 to vector<32x1xf32>
    %279 = arith.addf %275, %278 : vector<32x1xf32>
    %280 = math.rsqrt %279 : vector<32x1xf32>
    %281 = vector.broadcast %280 : vector<32x1xf32> to vector<32x32xf32>
    %282 = arith.mulf %277, %281 : vector<32x32xf32>
    %283 = vector.broadcast %263 : vector<1x32xf32> to vector<32x32xf32>
    %284 = arith.mulf %282, %283 : vector<32x32xf32>
    %285 = vector.broadcast %264 : vector<1x32xf32> to vector<32x32xf32>
    %286 = arith.addf %284, %285 : vector<32x32xf32>
    %c480 = arith.constant 480 : index
    %c0_77 = arith.constant 0 : index
    %287 = vector.load %arg2[%c480, %c0_77] : memref<752x128xf32, #tpu.memory_space<vmem>>, vector<32x128xf32>
    %cst_78 = arith.constant dense<0.000000e+00> : vector<32x128xf32>
    %288 = tpu.matmul %286, %287, %cst_78 {dimension_numbers = #tpu.dot_dimension_numbers<[1], [0], [0], [1], [0, 0, 1, 1], [], []>} : vector<32x32xf32>, vector<32x128xf32>, vector<32x128xf32> -> vector<32x128xf32>
    %c14 = arith.constant 14 : index
    %c0_79 = arith.constant 0 : index
    %289 = vector.load %arg3[%c14, %c0_79] : memref<24x128xf32, #tpu.memory_space<vmem>>, vector<1x128xf32>
    %290 = vector.broadcast %289 : vector<1x128xf32> to vector<32x128xf32>
    %291 = arith.addf %288, %290 : vector<32x128xf32>
    %cst_80 = arith.constant 0.000000e+00 : f32
    %292 = vector.broadcast %cst_80 : f32 to vector<32x128xf32>
    %293 = arith.maximumf %291, %292 : vector<32x128xf32>
    %c512 = arith.constant 512 : index
    %c0_81 = arith.constant 0 : index
    %294 = vector.load %arg2[%c512, %c0_81] : memref<752x128xf32, #tpu.memory_space<vmem>>, vector<128x32xf32>
    %cst_82 = arith.constant dense<0.000000e+00> : vector<32x32xf32>
    %295 = tpu.matmul %293, %294, %cst_82 {dimension_numbers = #tpu.dot_dimension_numbers<[1], [0], [0], [1], [0, 0, 1, 1], [], []>} : vector<32x128xf32>, vector<128x32xf32>, vector<32x32xf32> -> vector<32x32xf32>
    %c15 = arith.constant 15 : index
    %c0_83 = arith.constant 0 : index
    %296 = vector.load %arg3[%c15, %c0_83] : memref<24x128xf32, #tpu.memory_space<vmem>>, vector<1x32xf32>
    %297 = vector.broadcast %296 : vector<1x32xf32> to vector<32x32xf32>
    %298 = arith.addf %295, %297 : vector<32x32xf32>
    %299 = arith.addf %286, %298 : vector<32x32xf32>
    %c16 = arith.constant 16 : index
    %c0_84 = arith.constant 0 : index
    %300 = vector.load %arg3[%c16, %c0_84] : memref<24x128xf32, #tpu.memory_space<vmem>>, vector<1x32xf32>
    %c17 = arith.constant 17 : index
    %c0_85 = arith.constant 0 : index
    %301 = vector.load %arg3[%c17, %c0_85] : memref<24x128xf32, #tpu.memory_space<vmem>>, vector<1x32xf32>
    %cst_86 = arith.constant dense<0.000000e+00> : vector<32xf32>
    %302 = vector.multi_reduction <add>, %299, %cst_86 [1] : vector<32x32xf32> to vector<32xf32>
    %303 = vector.shape_cast %302 : vector<32xf32> to vector<32x1xf32>
    %cst_87 = arith.constant 3.200000e+01 : f32
    %304 = vector.broadcast %cst_87 : f32 to vector<32x1xf32>
    %305 = arith.divf %303, %304 : vector<32x1xf32>
    %306 = arith.mulf %299, %299 : vector<32x32xf32>
    %cst_88 = arith.constant dense<0.000000e+00> : vector<32xf32>
    %307 = vector.multi_reduction <add>, %306, %cst_88 [1] : vector<32x32xf32> to vector<32xf32>
    %308 = vector.shape_cast %307 : vector<32xf32> to vector<32x1xf32>
    %cst_89 = arith.constant 3.200000e+01 : f32
    %309 = vector.broadcast %cst_89 : f32 to vector<32x1xf32>
    %310 = arith.divf %308, %309 : vector<32x1xf32>
    %311 = arith.mulf %305, %305 : vector<32x1xf32>
    %312 = arith.subf %310, %311 : vector<32x1xf32>
    %313 = vector.broadcast %305 : vector<32x1xf32> to vector<32x32xf32>
    %314 = arith.subf %299, %313 : vector<32x32xf32>
    %cst_90 = arith.constant 9.99999974E-6 : f32
    %315 = vector.broadcast %cst_90 : f32 to vector<32x1xf32>
    %316 = arith.addf %312, %315 : vector<32x1xf32>
    %317 = math.rsqrt %316 : vector<32x1xf32>
    %318 = vector.broadcast %317 : vector<32x1xf32> to vector<32x32xf32>
    %319 = arith.mulf %314, %318 : vector<32x32xf32>
    %320 = vector.broadcast %300 : vector<1x32xf32> to vector<32x32xf32>
    %321 = arith.mulf %319, %320 : vector<32x32xf32>
    %322 = vector.broadcast %301 : vector<1x32xf32> to vector<32x32xf32>
    %323 = arith.addf %321, %322 : vector<32x32xf32>
    %324 = vector.extract_strided_slice %323 {offsets = [0, 0], sizes = [1, 32], strides = [1, 1]} : vector<32x32xf32> to vector<1x32xf32>
    %325 = vector.extract_strided_slice %323 {offsets = [16, 0], sizes = [1, 32], strides = [1, 1]} : vector<32x32xf32> to vector<1x32xf32>
    %326 = tpu.concatenate %324, %325 in 0 : vector<1x32xf32>, vector<1x32xf32> -> vector<2x32xf32>
    %c640 = arith.constant 640 : index
    %c0_91 = arith.constant 0 : index
    %327 = vector.load %arg2[%c640, %c0_91] : memref<752x128xf32, #tpu.memory_space<vmem>>, vector<32x32xf32>
    %cst_92 = arith.constant dense<0.000000e+00> : vector<2x32xf32>
    %328 = tpu.matmul %326, %327, %cst_92 {dimension_numbers = #tpu.dot_dimension_numbers<[1], [0], [0], [1], [0, 0, 1, 1], [], []>} : vector<2x32xf32>, vector<32x32xf32>, vector<2x32xf32> -> vector<2x32xf32>
    %c18 = arith.constant 18 : index
    %c0_93 = arith.constant 0 : index
    %329 = vector.load %arg3[%c18, %c0_93] : memref<24x128xf32, #tpu.memory_space<vmem>>, vector<1x32xf32>
    %330 = vector.broadcast %329 : vector<1x32xf32> to vector<2x32xf32>
    %331 = arith.addf %328, %330 : vector<2x32xf32>
    %cst_94 = arith.constant 5.000000e-01 : f32
    %332 = vector.broadcast %cst_94 : f32 to vector<2x32xf32>
    %333 = arith.mulf %332, %331 : vector<2x32xf32>
    %cst_95 = arith.constant 4.471500e-02 : f32
    %334 = vector.broadcast %cst_95 : f32 to vector<2x32xf32>
    %335 = arith.mulf %334, %331 : vector<2x32xf32>
    %336 = arith.mulf %335, %331 : vector<2x32xf32>
    %337 = arith.mulf %336, %331 : vector<2x32xf32>
    %338 = arith.addf %331, %337 : vector<2x32xf32>
    %cst_96 = arith.constant 0.797884583 : f32
    %339 = vector.broadcast %cst_96 : f32 to vector<2x32xf32>
    %340 = arith.mulf %339, %338 : vector<2x32xf32>
    %341 = math.tanh %340 : vector<2x32xf32>
    %cst_97 = arith.constant 1.000000e+00 : f32
    %342 = vector.broadcast %cst_97 : f32 to vector<2x32xf32>
    %343 = arith.addf %342, %341 : vector<2x32xf32>
    %344 = arith.mulf %333, %343 : vector<2x32xf32>
    %c19 = arith.constant 19 : index
    %c0_98 = arith.constant 0 : index
    %345 = vector.load %arg3[%c19, %c0_98] : memref<24x128xf32, #tpu.memory_space<vmem>>, vector<1x32xf32>
    %c20 = arith.constant 20 : index
    %c0_99 = arith.constant 0 : index
    %346 = vector.load %arg3[%c20, %c0_99] : memref<24x128xf32, #tpu.memory_space<vmem>>, vector<1x32xf32>
    %cst_100 = arith.constant dense<0.000000e+00> : vector<2xf32>
    %347 = vector.multi_reduction <add>, %344, %cst_100 [1] : vector<2x32xf32> to vector<2xf32>
    %348 = vector.shape_cast %347 : vector<2xf32> to vector<2x1xf32>
    %cst_101 = arith.constant 3.200000e+01 : f32
    %349 = vector.broadcast %cst_101 : f32 to vector<2x1xf32>
    %350 = arith.divf %348, %349 : vector<2x1xf32>
    %351 = arith.mulf %344, %344 : vector<2x32xf32>
    %cst_102 = arith.constant dense<0.000000e+00> : vector<2xf32>
    %352 = vector.multi_reduction <add>, %351, %cst_102 [1] : vector<2x32xf32> to vector<2xf32>
    %353 = vector.shape_cast %352 : vector<2xf32> to vector<2x1xf32>
    %cst_103 = arith.constant 3.200000e+01 : f32
    %354 = vector.broadcast %cst_103 : f32 to vector<2x1xf32>
    %355 = arith.divf %353, %354 : vector<2x1xf32>
    %356 = arith.mulf %350, %350 : vector<2x1xf32>
    %357 = arith.subf %355, %356 : vector<2x1xf32>
    %358 = vector.broadcast %350 : vector<2x1xf32> to vector<2x32xf32>
    %359 = arith.subf %344, %358 : vector<2x32xf32>
    %cst_104 = arith.constant 9.99999974E-6 : f32
    %360 = vector.broadcast %cst_104 : f32 to vector<2x1xf32>
    %361 = arith.addf %357, %360 : vector<2x1xf32>
    %362 = math.rsqrt %361 : vector<2x1xf32>
    %363 = vector.broadcast %362 : vector<2x1xf32> to vector<2x32xf32>
    %364 = arith.mulf %359, %363 : vector<2x32xf32>
    %365 = vector.broadcast %345 : vector<1x32xf32> to vector<2x32xf32>
    %366 = arith.mulf %364, %365 : vector<2x32xf32>
    %367 = vector.broadcast %346 : vector<1x32xf32> to vector<2x32xf32>
    %368 = arith.addf %366, %367 : vector<2x32xf32>
    %c672 = arith.constant 672 : index
    %c0_105 = arith.constant 0 : index
    %369 = vector.load %arg2[%c672, %c0_105] : memref<752x128xf32, #tpu.memory_space<vmem>>, vector<32x32xf32>
    %cst_106 = arith.constant dense<0.000000e+00> : vector<2x32xf32>
    %370 = tpu.matmul %368, %369, %cst_106 {dimension_numbers = #tpu.dot_dimension_numbers<[1], [0], [0], [1], [0, 0, 1, 1], [], []>} : vector<2x32xf32>, vector<32x32xf32>, vector<2x32xf32> -> vector<2x32xf32>
    %c21 = arith.constant 21 : index
    %c0_107 = arith.constant 0 : index
    %371 = vector.load %arg3[%c21, %c0_107] : memref<24x128xf32, #tpu.memory_space<vmem>>, vector<1x32xf32>
    %372 = vector.broadcast %371 : vector<1x32xf32> to vector<2x32xf32>
    %373 = arith.addf %370, %372 : vector<2x32xf32>
    %374 = vector.extract_strided_slice %373 {offsets = [0, 0], sizes = [2, 16], strides = [1, 1]} : vector<2x32xf32> to vector<2x16xf32>
    %375 = vector.extract_strided_slice %373 {offsets = [0, 16], sizes = [2, 16], strides = [1, 1]} : vector<2x32xf32> to vector<2x16xf32>
    %cst_108 = arith.constant 5.000000e-01 : f32
    %376 = vector.broadcast %cst_108 : f32 to vector<2x16xf32>
    %377 = arith.mulf %376, %375 : vector<2x16xf32>
    %378 = math.exp %377 : vector<2x16xf32>
    %c0_109 = arith.constant 0 : index
    %c0_110 = arith.constant 0 : index
    %379 = vector.load %arg1[%c0_109, %c0_110] : memref<2x16xf32, #tpu.memory_space<vmem>>, vector<2x16xf32>
    %380 = arith.mulf %378, %379 : vector<2x16xf32>
    %381 = arith.addf %374, %380 : vector<2x16xf32>
    %cst_111 = arith.constant dense<0.000000e+00> : vector<2xf32>
    %382 = vector.multi_reduction <add>, %0, %cst_111 [1] : vector<2x64xf32> to vector<2xf32>
    %383 = vector.shape_cast %382 : vector<2xf32> to vector<2x1xf32>
    %c704 = arith.constant 704 : index
    %c0_112 = arith.constant 0 : index
    %384 = vector.load %arg2[%c704, %c0_112] : memref<752x128xf32, #tpu.memory_space<vmem>>, vector<16x32xf32>
    %cst_113 = arith.constant dense<0.000000e+00> : vector<2x32xf32>
    %385 = tpu.matmul %381, %384, %cst_113 {dimension_numbers = #tpu.dot_dimension_numbers<[1], [0], [0], [1], [0, 0, 1, 1], [], []>} : vector<2x16xf32>, vector<16x32xf32>, vector<2x32xf32> -> vector<2x32xf32>
    %c22 = arith.constant 22 : index
    %c0_114 = arith.constant 0 : index
    %386 = vector.load %arg3[%c22, %c0_114] : memref<24x128xf32, #tpu.memory_space<vmem>>, vector<1x32xf32>
    %387 = vector.broadcast %386 : vector<1x32xf32> to vector<2x32xf32>
    %388 = arith.addf %385, %387 : vector<2x32xf32>
    %cst_115 = arith.constant 0.000000e+00 : f32
    %389 = vector.broadcast %cst_115 : f32 to vector<2x32xf32>
    %390 = arith.maximumf %388, %389 : vector<2x32xf32>
    %c720 = arith.constant 720 : index
    %c0_116 = arith.constant 0 : index
    %391 = vector.load %arg2[%c720, %c0_116] : memref<752x128xf32, #tpu.memory_space<vmem>>, vector<32x64xf32>
    %cst_117 = arith.constant dense<0.000000e+00> : vector<2x64xf32>
    %392 = tpu.matmul %390, %391, %cst_117 {dimension_numbers = #tpu.dot_dimension_numbers<[1], [0], [0], [1], [0, 0, 1, 1], [], []>} : vector<2x32xf32>, vector<32x64xf32>, vector<2x64xf32> -> vector<2x64xf32>
    %c23 = arith.constant 23 : index
    %c0_118 = arith.constant 0 : index
    %393 = vector.load %arg3[%c23, %c0_118] : memref<24x128xf32, #tpu.memory_space<vmem>>, vector<1x64xf32>
    %394 = vector.broadcast %393 : vector<1x64xf32> to vector<2x64xf32>
    %395 = arith.addf %392, %394 : vector<2x64xf32>
    %cst_119 = arith.constant dense<0xFF800000> : vector<2xf32>
    %396 = vector.multi_reduction <maximumf>, %395, %cst_119 [1] : vector<2x64xf32> to vector<2xf32>
    %397 = vector.shape_cast %396 : vector<2xf32> to vector<2x1xf32>
    %398 = vector.broadcast %397 : vector<2x1xf32> to vector<2x64xf32>
    %399 = arith.subf %395, %398 : vector<2x64xf32>
    %400 = math.exp %399 : vector<2x64xf32>
    %cst_120 = arith.constant dense<0.000000e+00> : vector<2xf32>
    %401 = vector.multi_reduction <add>, %400, %cst_120 [1] : vector<2x64xf32> to vector<2xf32>
    %402 = vector.shape_cast %401 : vector<2xf32> to vector<2x1xf32>
    %403 = vector.broadcast %402 : vector<2x1xf32> to vector<2x64xf32>
    %404 = arith.divf %400, %403 : vector<2x64xf32>
    %405 = vector.broadcast %383 : vector<2x1xf32> to vector<2x64xf32>
    %406 = arith.mulf %405, %404 : vector<2x64xf32>
    %c0_121 = arith.constant 0 : index
    %c0_122 = arith.constant 0 : index
    %407 = vector.load %arg4[%c0_121, %c0_122] : memref<2x64xf32, #tpu.memory_space<vmem>>, vector<2x64xf32>
    tpu.vector_store %arg4[%c0_121, %c0_122], %406 {strides = array<i32>} : memref<2x64xf32, #tpu.memory_space<vmem>>, vector<2x64xf32>,
    return
  }
}

</mosaic_0001>

<bundles_post_ra>
// kernel: transcriptformer_forward.1
= control target key start
LH: loop header
LB: loop body
LE: loop exit
PB: predicated region body
PF: predicated region fallthrough
CT: control target
= control target key end

     0   :  { %9 = vsyncpa [#allocation3], 0  ;;  %s5480_s0 = inlined_call_operand.vmem [shape: f32[2,64], index: 0, kind: input, shape index: {}]   ;;  %s5481_s1 = inlined_call_operand.vmem [shape: f32[2,16], index: 1, kind: input, shape index: {}]   ;;  %s5482_s2 = inlined_call_operand.hbm [shape: f32[752,128], index: 2, kind: input, shape index: {}]   ;;  %s5483_s3 = inlined_call_operand.hbm [shape: f32[24,128], index: 3, kind: input, shape index: {}]   ;;  %s5484_s4 = inlined_call_operand.hbm [shape: f32[2,64], index: 4, kind: output, shape index: {}]  }
   0x1   :  { %10 = vsyncpa [#allocation6], 0 }
   0x2   :  { %11 = vsyncpa [#allocation4], 0  ;;  %s4290_s15 = smov [#allocation2]  }
   0x3   :  { %s21_s16 = sshll.u32 %s4290_s15, 4  ;;  %s22_s16 = int_to_ptr.vmem [resolvable:$true] %s21_s16 }
   0x4   :  { %s4232_s17 = scalar_lea.vmem %s22_s16, 12032  ;;  %p4237_p1 = scmp.lt.s32.totalorder %s22_s16, %s22_s16 }
   0x5   :  { %p4233_p0 = scmp.ne.s32.totalorder %s22_s16, %s4232_s17  ;;  %p4238_p2 = scmp.lt.s32.totalorder %s4232_s17, %s4232_s17 }
   0x7   :  { %p4239_p3 = por %p4238_p2, %p4237_p1 }
   0x9   :  { %p4240_p4 = pnand %p4239_p3, %p4233_p0 }
   0xb   :  { %4243 = shalt.err (!%p4240_p4)
}
   0xc   :  { %s4291_s18 = smov 128   ;;  %s4292_s19 = smov 8  }
   0xd   :  { %27 = dma.hbm_to_vmem [thread:$0]  %s5482_s2, 12032, %s22_s16, [#allocation3], %s4291_s18, %s4291_s18, %s4292_s19  }
   0xe   :  { %s4293_s22 = smov [#allocation5]  }
   0xf   :  { %s33_s23 = sshll.u32 %s4293_s22, 4  ;;  %s34_s23 = int_to_ptr.vmem [resolvable:$true] %s33_s23 }
  0x10   :  { %s4252_s24 = scalar_lea.vmem %s34_s23, 384  ;;  %p4257_p6 = scmp.lt.s32.totalorder %s34_s23, %s34_s23 }
  0x11   :  { %p4253_p5 = scmp.ne.s32.totalorder %s34_s23, %s4252_s24  ;;  %p4258_p7 = scmp.lt.s32.totalorder %s4252_s24, %s4252_s24 }
  0x13   :  { %p4259_p8 = por %p4258_p7, %p4257_p6 }
  0x15   :  { %p4260_p9 = pnand %p4259_p8, %p4253_p5 }
  0x17   :  { %4263 = shalt.err (!%p4260_p9)
}
  0x18   :  { %39 = dma.hbm_to_vmem [thread:$0]  %s5483_s3, 384, %s34_s23, [#allocation6], %s4291_s18, %s4291_s18, %s4292_s19  }
  0x19   :  { %4284 = dma.done.wait [#allocation3], 12032  }
  0x1a   :  { %4285 = vsyncadd [#allocation3], 4294955264 }
  0x1b   :  { %4286 = dma.done.wait [#allocation6], 384  }
  0x1c   :  { %4287 = vsyncadd [#allocation6], 4294966912  ;;  %v5485_v0 = vmov 0.0   ;;  %vm4295_vm0 = vmmov 0   ;;  %v54_v1 = vld [vmem:[#allocation2 + $0x38] sm:$0xff]  ;;  %v53_v2 = vld [vmem:[#allocation2 + $0x30] sm:$0xff]  ;;  %v130_v27 = vlaneseq }
  0x1d   :  { %3595 = vmatprep.subr.mxu0 %v5485_v0  ;;  %3611 = vmatprep.mubr.msk.f32.mxu0 %vm4295_vm0, %v5485_v0  ;;  %v52_v3 = vld [vmem:[#allocation2 + $0x28] sm:$0xff]  ;;  %v211_v4 = vld [vmem:[#allocation2 + $0xb8] sm:$0xff]  ;;  %v210_v5 = vld [vmem:[#allocation2 + $0xb0] sm:$0xff]  ;;  %vm55_vm1 = vcmask 523264   ;;  %s4296_s27 = smov 32   ;;  %s4297_s28 = smov 96  }
  0x1e   :  { %3596 = vmatpush3.msra.mxu0 %v54_v1  ;;  %v51_v6 = vld [vmem:[#allocation2 + $0x20] sm:$0xff]  ;;  %3614 = vmatprep.subr.mxu1 %v211_v4  ;;  %v209_v7 = vld [vmem:[#allocation2 + $0xa8] sm:$0xff]  ;;  %v50_v8 = vld [vmem:[#allocation2 + $0x18] sm:$0xff]  ;;  %v4348_v28 = vshrl.u32 %v130_v27, 7  ;;  %v4356_v31 = vand.u32 127, %v130_v27  ;;  %s4298_s29 = smov 64  }
  0x1f   :  { %3597 = vmatprep.subr.mxu0 %v5485_v0  ;;  %3615 = vmatpush3.msra.mxu1 %v211_v4  ;;  %v208_v9 = vld [vmem:[#allocation2 + $0xa0] sm:$0xff]  ;;  %v49_v10 = vld [vmem:[#allocation2 + $0x10] sm:$0xff]  ;;  %v207_v11 = vld [vmem:[#allocation2 + $0x98] sm:$0xff]  ;;  %s4300_s6 = smov 16   ;;  %s4302_s9 = smov [#allocation7]  }
  0x20   :  { %3598 = vmatpush3.msra.mxu0 %v53_v2  ;;  %3616 = vmatprep.subr.mxu1 %v210_v5  ;;  %v48_v12 = vld [vmem:[#allocation2 + $0x8] sm:$0xff]  ;;  %v206_v13 = vld [vmem:[#allocation2 + $0x90] sm:$0xff]  ;;  %v47_v14 = vld [vmem:[#allocation2] sm:$0xff]  ;;  %v4351_v29 = vadd.s32 8, %v4348_v28  ;;  %v4354_v30 = vadd.s32 16, %v4348_v28  ;;  %v4359_v32 = vand.u32 15, %v4348_v28 }
  0x21   :  { %3599 = vmatprep.subr.mxu0 %v5485_v0  ;;  %3617 = vmatpush3.msra.mxu1 %v210_v5  ;;  %v46_v15 = vld [vmem:[%s5480_s0] sm:$0x3]  ;;  %v205_v16 = vld [vmem:[#allocation2 + $0x88] sm:$0xff]  ;;  %v203_v18 = vld [vmem:[#allocation2 + $0x78] sm:$0xff]  ;;  %v4363_v34 = vadd.s32 24, %v4348_v28  ;;  %v149_v36 = vshra.s32 %v4356_v31, 4 }
  0x22   :  { %3600 = vmatpush3.msra.mxu0 %v52_v3  ;;  %3618 = vmatprep.subr.mxu1 %v209_v7  ;;  %v204_v17 = vld [vmem:[#allocation2 + $0x80] sm:$0xff]  ;;  %v202_v19 = vld [vmem:[#allocation2 + $0x70] sm:$0xff]  ;;  %v201_v20 = vld [vmem:[#allocation2 + $0x68] sm:$0xff]  ;;  %v146_v33 = vand.u32 15, %v4351_v29  ;;  %v4366_v35 = vand.u32 15, %v4354_v30  ;;  %v3264_v37 = vadd.s32 4294967295, %v4359_v32 }
  0x23   :  { %3601 = vmatprep.subr.mxu0 %v5485_v0  ;;  %3619 = vmatpush3.msra.mxu1 %v209_v7  ;;  %v200_v21 = vld [vmem:[#allocation2 + $0x60] sm:$0xff]  ;;  %v199_v22 = vld [vmem:[#allocation2 + $0x58] sm:$0xff]  ;;  %v198_v23 = vld [vmem:[#allocation2 + $0x50] sm:$0xff]  ;;  %v148_v39 = vand.u32 15, %v4363_v34  ;;  %v132_v41 = vsub.s32 0, %v4348_v28  ;;  %vm158_vm3 = vcmp.ge.s32.totalorder %v4359_v32, 1 }
  0x24   :  { %3602 = vmatpush3.msra.mxu0 %v51_v6  ;;  %3620 = vmatprep.subr.mxu1 %v208_v9  ;;  %v197_v24 = vld [vmem:[#allocation2 + $0x48] sm:$0xff]  ;;  %v196_v25 = vld [vmem:[#allocation2 + $0x40] sm:$0xff]  ;;  %v397_v26 = vld [vmem:[#allocation2 + $0xd8] sm:$0xff]  ;;  %v3265_v38 = vadd.s32 4294967295, %v146_v33  ;;  %v3266_v40 = vadd.s32 4294967295, %v4366_v35  ;;  %vm154_vm2 = vcmp.eq.s32.totalorder %v149_v36, %v3264_v37  ;;  %vm167_vm5 = vcmp.le.s32.totalorder %v146_v33, 8 }
  0x25   :  { %3603 = vmatprep.subr.mxu0 %v5485_v0  ;;  %3621 = vmatpush3.msra.mxu1 %v208_v9  ;;  %v3267_v43 = vadd.s32 4294967295, %v148_v39  ;;  %v136_v45 = vsub.s32 1, %v4348_v28  ;;  %vm160_vm7 = vcmp.ge.s32.totalorder %v4366_v35, 1  ;;  %vm162_vm8 = vmand %vm154_vm2, %vm158_vm3  ;;  %vm169_vm12 = vcmp.le.s32.totalorder %v148_v39, 8  ;;  %v396_v49 = vld [vmem:[#allocation2 + $0xd0] sm:$0xff]  ;;  %v395_v50 = vld [vmem:[#allocation2 + $0xc8] sm:$0xff] }
  0x26   :  { %3604 = vmatpush3.msra.mxu0 %v50_v8  ;;  %3622 = vmatprep.subr.mxu1 %v207_v11  ;;  %vm155_vm4 = vcmp.eq.s32.totalorder %v149_v36, %v3265_v38  ;;  %vm156_vm6 = vcmp.eq.s32.totalorder %v149_v36, %v3266_v40  ;;  %v394_v51 = vld [vmem:[#allocation2 + $0xc0] sm:$0xff]  ;;  %v4377_v52 = vshra.s32 %v4356_v31, 3  ;;  %v327_v53 = vadd.s32 112, %v4348_v28  ;;  %s3253_s10 = sshll.u32 %s4302_s9, 4  ;;  %s3254_s10 = int_to_ptr.vmem [resolvable:$true] %s3253_s10 }
  0x27   :  { %3605 = vmatprep.subr.mxu0 %v5485_v0  ;;  %3623 = vmatpush3.msra.mxu1 %v207_v11  ;;  %vm171_vm9 = vmand %vm155_vm4, %vm167_vm5  ;;  %vm157_vm11 = vcmp.eq.s32.totalorder %v149_v36, %v3267_v43  ;;  %v328_v54 = vadd.s32 120, %v4348_v28  ;;  %v325_v55 = vadd.s32 96, %v4348_v28  ;;  %v326_v56 = vadd.s32 104, %v4348_v28  ;;  %p4269_p11 = scmp.lt.s32.totalorder %s3254_s10, %s3254_s10 }
  0x28   :  { %3606 = vmatpush3.msra.mxu0 %v49_v10  ;;  %3624 = vmatprep.subr.mxu1 %v206_v13  ;;  %vm164_vm10 = vmand %vm156_vm6, %vm160_vm7  ;;  %v324_v57 = vadd.s32 88, %v4348_v28  ;;  %v323_v58 = vadd.s32 80, %v4348_v28  ;;  %v322_v59 = vadd.s32 72, %v4348_v28  ;;  %v321_v60 = vadd.s32 64, %v4348_v28 }
  0x29   :  { %3607 = vmatprep.subr.mxu0 %v5485_v0  ;;  %3625 = vmatpush3.msra.mxu1 %v206_v13  ;;  %vm173_vm13 = vmand %vm157_vm11, %vm169_vm12  ;;  %v343_v61 = vshra.s32 %v327_v53, 5  ;;  %v344_v62 = vshra.s32 %v328_v54, 5  ;;  %v341_v63 = vshra.s32 %v325_v55, 5  ;;  %v342_v1 = vshra.s32 %v326_v56, 5 }
  0x2a   :  { %3608 = vmatpush3.msra.mxu0 %v48_v12  ;;  %3626 = vmatprep.subr.mxu1 %v205_v16  ;;  %v340_v2 = vshra.s32 %v324_v57, 5  ;;  %v339_v3 = vshra.s32 %v323_v58, 5  ;;  %v338_v4 = vshra.s32 %v322_v59, 5  ;;  %v337_v5 = vshra.s32 %v321_v60, 5 }
  0x2b   :  { %3609 = vmatprep.subr.mxu0 %v5485_v0  ;;  %3627 = vmatpush3.msra.mxu1 %v205_v16  ;;  %vm360_vm14 = vcmp.eq.s32.totalorder %v343_v61, %v4377_v52  ;;  %vm361_vm15 = vcmp.eq.s32.totalorder %v344_v62, %v4377_v52  ;;  %vm358_vm2 = vcmp.eq.s32.totalorder %v341_v63, %v4377_v52  ;;  %v320_v12 = vadd.s32 56, %v4348_v28 }
  0x2c   :  { %3610 = vmatpush3.msra.mxu0 %v47_v14  ;;  %3628 = vmatprep.subr.mxu1 %v204_v17  ;;  %vm359_vm3 = vcmp.eq.s32.totalorder %v342_v1, %v4377_v52  ;;  %v4392_v6 = vsel %vm361_vm15, 1.0, %v5485_v0  ;;  %v4395_v7 = vsel %vm360_vm14, 1.0, %v5485_v0  ;;  %v4401_v9 = vsel %vm358_vm2, 1.0, %v5485_v0 }
  0x2d   :  { %3612 = vmatmul.mubr.msk.f32.vlgmr.msra.gmra.mxu0 %vm55_vm1, %v46_v15  ;;  %3629 = vmatpush3.msra.mxu1 %v204_v17  ;;  %v4398_v8 = vsel %vm359_vm3, 1.0, %v5485_v0  ;;  %v4017_v10 = vpack.i.bf16 %v4395_v7, %v4392_v6  ;;  %vm357_vm4 = vcmp.eq.s32.totalorder %v340_v2, %v4377_v52  ;;  %vm356_vm5 = vcmp.eq.s32.totalorder %v339_v3, %v4377_v52  ;;  %v3290_v2 = vld [vmem:[#allocation5 + $0x2] ss:$0 sm:$0xff] }
  0x2e   :  { %3630 = vmatprep.subr.mxu1 %v203_v18  ;;  %3652 = vmatprep.subr.mxu0 %v397_v26  ;;  %v4022_v11 = vpack.i.bf16 %v4401_v9, %v4398_v8  ;;  %v4414_v13 = vsel %vm357_vm4, 1.0, %v5485_v0  ;;  %vm355_vm6 = vcmp.eq.s32.totalorder %v338_v4, %v4377_v52  ;;  %vm354_vm7 = vcmp.eq.s32.totalorder %v337_v5, %v4377_v52 }
  0x2f   :  { %3631 = vmatpush3.msra.mxu1 %v203_v18  ;;  %3653 = vmatpush3.msra.mxu0 %v397_v26  ;;  %v4420_v14 = vsel %vm356_vm5, 1.0, %v5485_v0  ;;  %v4423_v15 = vsel %vm355_vm6, 1.0, %v5485_v0  ;;  %v4426_v16 = vsel %vm354_vm7, 1.0, %v5485_v0  ;;  %v336_v17 = vshra.s32 %v320_v12, 5 }
  0x30   :  { %3632 = vmatprep.subr.mxu1 %v202_v19  ;;  %3654 = vmatprep.subr.mxu0 %v396_v49  ;;  %v4027_v18 = vpack.i.bf16 %v4420_v14, %v4414_v13  ;;  %v330_v33 = vshra.s32 %v4351_v29, 5  ;;  %v329_v37 = vshra.s32 %v4348_v28, 5  ;;  %vm178_vm2 = vcmp.eq.s32.totalorder %v4359_v32, 0 }
  0x31   :  { %3633 = vmatpush3.msra.mxu1 %v202_v19  ;;  %3655 = vmatpush3.msra.mxu0 %v396_v49  ;;  %v4032_v19 = vpack.i.bf16 %v4426_v16, %v4423_v15  ;;  %v3269_v49 = vld [vmem:[#allocation5 + $0x1] ss:$0 sm:$0xff]  ;;  %vm180_vm3 = vcmp.eq.s32.totalorder %v4366_v35, 0  ;;  %vm403_vm4 = vcmask 261120  }
  0x32   :  { %3634 = vmatprep.subr.mxu1 %v201_v20  ;;  %3656 = vmatprep.subr.mxu0 %v395_v50  ;;  %vm347_vm14 = vcmp.eq.s32.totalorder %v330_v33, %v4377_v52  ;;  %vm346_vm15 = vcmp.eq.s32.totalorder %v329_v37, %v4377_v52 }
  0x33   :  { %3635 = vmatpush3.msra.mxu1 %v201_v20  ;;  %3657 = vmatpush3.msra.mxu0 %v395_v50  ;;  %v319_v20 = vadd.s32 48, %v4348_v28  ;;  %v3268_v50 = vld [vmem:[#allocation5] ss:$0 sm:$0xff] }
  0x34   :  { %3636 = vmatprep.subr.mxu1 %v200_v21  ;;  %3658 = vmatprep.subr.mxu0 %v394_v51  ;;  %v194_v57 = vsel %vm180_vm3, %v3268_v50, %v3269_v49  ;;  %vm1057_vm3 = vcmask 785408  }
  0x35   :  { %3637 = vmatpush3.msra.mxu1 %v200_v21  ;;  %3659 = vmatpush3.msra.mxu0 %v394_v51  ;;  %v318_v21 = vadd.s32 40, %v4348_v28  ;;  %v335_v26 = vshra.s32 %v319_v20, 5 }
  0x36   :  { %3638 = vmatprep.subr.mxu1 %v199_v22  ;;  %547 = vrot.lane.b32.xlu0 %v4392_v6, %s4296_s27 }
  0x37   :  { %3639 = vmatpush3.msra.mxu1 %v199_v22  ;;  %543 = vrot.lane.b32.xlu1 %v4398_v8, %s4296_s27  ;;  %v317_v22 = vadd.s32 32, %v4348_v28  ;;  %v334_v27 = vshra.s32 %v318_v21, 5  ;;  %vm352_vm11 = vcmp.eq.s32.totalorder %v335_v26, %v4377_v52 }
  0x38   :  { %3640 = vmatprep.subr.mxu1 %v198_v23  ;;  %v4462_v40 = vsel %vm352_vm11, 1.0, %v5485_v0  ;;  %vm927_vm11 = vcmask 785920  }
  0x39   :  { %3641 = vmatpush3.msra.mxu1 %v198_v23  ;;  %v332_v23 = vshra.s32 %v4363_v34, 5  ;;  %v333_v36 = vshra.s32 %v317_v22, 5  ;;  %vm351_vm12 = vcmp.eq.s32.totalorder %v334_v27, %v4377_v52 }
  0x3a   :  { %3642 = vmatprep.subr.mxu1 %v197_v24  ;;  %545 = vrot.lane.b32.xlu0 %v4395_v7, %s4296_s27 }
  0x3b   :  { %3643 = vmatpush3.msra.mxu1 %v197_v24  ;;  %541 = vrot.lane.b32.xlu1 %v4401_v9, %s4296_s27  ;;  %v331_v24 = vshra.s32 %v4354_v30, 5 }
  0x3c   :  { %3644 = vmatprep.subr.mxu1 %v196_v25 }
  0x3d   :  { %3645 = vmatpush3.msra.mxu1 %v196_v25 }
  0x3e   :  { %539 = vrot.lane.b32.xlu0 %v4414_v13, %s4296_s27 }
  0x3f   :  { %537 = vrot.lane.b32.xlu1 %v4420_v14, %s4296_s27 }
  0x42   :  { %535 = vrot.lane.b32.xlu0 %v4423_v15, %s4296_s27 }
  0x43   :  { %533 = vrot.lane.b32.xlu1 %v4426_v16, %s4296_s27 }
  0x47   :  { %529 = vrot.lane.b32.xlu1 %v4462_v40, %s4296_s27 }
  0xa8   :  { %v4525_v35 = vpop.permute.xlu0 %547 }
  0xa9   :  { %v4527_v60 = vpop.permute.xlu1 %543 }
  0xac   :  { %v4529_v61 = vpop.permute.xlu0 %545 }
  0xad   :  { %v4531_v62 = vpop.permute.xlu1 %541 }
  0xb0   :  { %v4533_v1 = vpop.permute.xlu0 %539 }
  0xb1   :  { %v4537_v5 = vpop.permute.xlu1 %537 }
  0xb5   :  { %v4554_v27 = vpop.permute.xlu1 %533 }
  0xed   :  { %v125_v42 = vpop.f32.mrf.mxu0 }
  0xee   :  { %v129_v44 = vmax.f32 %v125_v42, 0.0 }
  0xef   :  { %v3613_v46 = vpop.f32.mrf.mxu0 }
  0xf0   :  { %v133_v47 = vrot.slane %v129_v44, %v132_v41  ;;  %v137_v48 = vrot.slane %v129_v44, %v136_v45  ;;  %v4465_v41 = vsel %vm351_vm12, 1.0, %v5485_v0  ;;  %v4480_v46 = vsel %vm347_vm14, 1.0, %v5485_v0 }
  0xf2   :  { %3646 = vmatprep.mubr.msk.f32.mxu1 %vm162_vm8, %v133_v47  ;;  %vm353_vm8 = vcmp.eq.s32.totalorder %v336_v17, %v4377_v52 }
  0xf3   :  { %3647 = vmatmul.mubr.msk.f32.vlgmr.msra.gmra.mxu1 %vm171_vm9, %v133_v47  ;;  %v4443_v25 = vsel %vm353_vm8, 1.0, %v5485_v0  ;;  %vm349_vm9 = vcmp.eq.s32.totalorder %v332_v23, %v4377_v52  ;;  %v4483_v47 = vsel %vm346_vm15, 1.0, %v5485_v0 }
  0xf4   :  { %3649 = vmatprep.mubr.msk.f32.mxu1 %vm164_vm10, %v137_v48  ;;  %vm348_vm10 = vcmp.eq.s32.totalorder %v331_v24, %v4377_v52  ;;  %v4452_v38 = vsel %vm349_vm9, 1.0, %v5485_v0  ;;  %v4037_v43 = vpack.i.bf16 %v4462_v40, %v4443_v25  ;;  %531 = vrot.lane.b32.xlu0 %v4443_v25, %s4296_s27  ;;  %v4549_v24 = vpop.permute.xlu0 %535 }
  0xf5   :  { %v4455_v39 = vsel %vm348_vm10, 1.0, %v5485_v0  ;;  %vm866_vm10 = vcmask 523520  }
  0xf6   :  { %v4047_v42 = vpack.i.bf16 %v4455_v39, %v4452_v38 }
  0xf7   :  { %3650 = vmatmul.mubr.msk.f32.gmra.mxu1 %vm173_vm13, %v137_v48  ;;  %vm350_vm13 = vcmp.eq.s32.totalorder %v333_v36, %v4377_v52  ;;  %v4052_v48 = vpack.i.bf16 %v4483_v47, %v4480_v46  ;;  %v192_v52 = vsel %vm178_vm2, %v3268_v50, %v3269_v49  ;;  %v4567_v50 = vpop.permute.xlu1 %529 }
  0xf8   :  { %v4473_v44 = vsel %vm350_vm13, 1.0, %v5485_v0  ;;  %527 = vrot.lane.b32.xlu0 %v4465_v41, %s4296_s27  ;;  %vm988_vm13 = vcmask 1048320  }
  0xf9   :  { %v4042_v45 = vpack.i.bf16 %v4473_v44, %v4465_v41  ;;  %525 = vrot.lane.b32.xlu1 %v4473_v44, %s4296_s27 }
  0xfc   :  { %523 = vrot.lane.b32.xlu0 %v4452_v38, %s4296_s27 }
  0xfd   :  { %521 = vrot.lane.b32.xlu1 %v4455_v39, %s4296_s27 }
 0x100   :  { %519 = vrot.lane.b32.xlu0 %v4480_v46, %s4296_s27 }
 0x101   :  { %517 = vrot.lane.b32.xlu1 %v4483_v47, %s4296_s27 }
 0x166   :  { %v4562_v37 = vpop.permute.xlu0 %531 }
 0x1b3   :  { %v3648_v51 = vpop.f32.mrf.mxu1 }
 0x1b4   :  { %v4511_v55 = vadd.f32 %v3648_v51, %v3269_v49 }
 0x1b5   :  { %v278_v53 = vpop.f32.mrf.mxu1 }
 0x1b6   :  { %v4509_v54 = vadd.f32 %v278_v53, %v192_v52  ;;  %v4575_v53 = vpop.permute.xlu0 %527 }
 0x1b7   :  { %v3651_v56 = vpop.f32.mrf.mxu1 }
 0x1b8   :  { %3660 = vmatprep.mubr.msk.f32.mxu0 %vm403_vm4, %v4509_v54  ;;  %v4519_v59 = vadd.f32 %v3651_v56, %v3269_v49 }
 0x1b9   :  { %v288_v58 = vpop.f32.mrf.mxu1  ;;  %3661 = vmatmul.mubr.msk.f32.vlgmr.msra.gmra.mxu0 %vm403_vm4, %v4511_v55 }
 0x1ba   :  { %v4517_v32 = vadd.f32 %v288_v58, %v194_v57  ;;  %v4580_v57 = vpop.permute.xlu1 %525 }
 0x1bc   :  { %3663 = vmatprep.mubr.msk.f32.mxu0 %vm403_vm4, %v4517_v32 }
 0x1bd   :  { %3664 = vmatmul.mubr.msk.f32.gmra.mxu0 %vm403_vm4, %v4519_v59 }
 0x279   :  { %v3662_v63 = vpop.f32.mrf.mxu0 }
 0x27a   :  { %v4543_v21 = vadd.f32 %v3662_v63, %v3290_v2 }
 0x27b   :  { %v482_v3 = vpop.f32.mrf.mxu0 }
 0x27c   :  { %v4535_v4 = vadd.f32 %v3290_v2, %v482_v3  ;;  %v578_v33 = vmul.f32 %v4527_v60, %v4543_v21  ;;  %v574_v52 = vmul.f32 %v4549_v24, %v4543_v21  ;;  %v570_v3 = vmul.f32 %v4575_v53, %v4543_v21 }
 0x27d   :  { %v3665_v12 = vpop.f32.mrf.mxu0 }
 0x27e   :  { %v4539_v17 = vadd.f32 %v3665_v12, %v3290_v2  ;;  %3698 = vmatprep.mubr.msk.f32.mxu0 %vm403_vm4, %v4535_v4  ;;  %v577_v36 = vmul.f32 %v4531_v62, %v4535_v4  ;;  %v573_v56 = vmul.f32 %v4554_v27, %v4535_v4  ;;  %v4593_v12 = vpop.permute.xlu1 %521 }
 0x27f   :  { %v492_v20 = vpop.f32.mrf.mxu0 }
 0x280   :  { %v4545_v22 = vadd.f32 %v3290_v2, %v492_v20  ;;  %v580_v23 = vmul.f32 %v4525_v35, %v4539_v17  ;;  %v576_v49 = vmul.f32 %v4533_v1, %v4539_v17  ;;  %v572_v58 = vmul.f32 %v4562_v37, %v4539_v17  ;;  %v4588_v2 = vpop.permute.xlu0 %523 }
 0x281   :  { %v569_v20 = vmul.f32 %v4580_v57, %v4535_v4 }
 0x282   :  { %691 = vrot.lane.b32.xlu0 %v580_v23, %s4297_s28  ;;  %v579_v26 = vmul.f32 %v4529_v61, %v4545_v22  ;;  %v575_v51 = vmul.f32 %v4537_v5, %v4545_v22  ;;  %v571_v63 = vmul.f32 %v4567_v50, %v4545_v22  ;;  %v568_v23 = vmul.f32 %v4588_v2, %v4539_v17 }
 0x284   :  { %689 = vrot.lane.b32.xlu1 %v579_v26, %s4297_s28  ;;  %v4601_v26 = vpop.permute.xlu0 %519 }
 0x286   :  { %687 = vrot.lane.b32.xlu0 %v578_v33, %s4297_s28  ;;  %v567_v33 = vmul.f32 %v4593_v12, %v4545_v22 }
 0x288   :  { %685 = vrot.lane.b32.xlu1 %v577_v36, %s4297_s28  ;;  %v4606_v36 = vpop.permute.xlu1 %517 }
 0x28a   :  { %683 = vrot.lane.b32.xlu0 %v576_v49, %s4297_s28  ;;  %v566_v49 = vmul.f32 %v4601_v26, %v4543_v21 }
 0x28c   :  { %681 = vrot.lane.b32.xlu1 %v575_v51, %s4297_s28  ;;  %v565_v51 = vmul.f32 %v4606_v36, %v4535_v4 }
 0x28e   :  { %679 = vrot.lane.b32.xlu0 %v574_v52, %s4297_s28 }
 0x290   :  { %677 = vrot.lane.b32.xlu1 %v573_v56, %s4297_s28 }
 0x292   :  { %675 = vrot.lane.b32.xlu0 %v572_v58, %s4297_s28 }
 0x294   :  { %673 = vrot.lane.b32.xlu1 %v571_v63, %s4297_s28 }
 0x296   :  { %671 = vrot.lane.b32.xlu0 %v570_v3, %s4297_s28 }
 0x298   :  { %669 = vrot.lane.b32.xlu1 %v569_v20, %s4297_s28 }
 0x29a   :  { %667 = vrot.lane.b32.xlu0 %v568_v23, %s4297_s28 }
 0x29c   :  { %665 = vrot.lane.b32.xlu1 %v567_v33, %s4297_s28 }
 0x29e   :  { %663 = vrot.lane.b32.xlu0 %v566_v49, %s4297_s28 }
 0x2a0   :  { %661 = vrot.lane.b32.xlu1 %v565_v51, %s4297_s28 }
 0x2a2   :  { %4023 = vrot.lane.b32.xlu0 %v4022_v11, %s4298_s29 }
 0x2a4   :  { %4018 = vrot.lane.b32.xlu1 %v4017_v10, %s4298_s29 }
 0x2a6   :  { %4038 = vrot.lane.b32.xlu0 %v4037_v43, %s4298_s29 }
 0x2a8   :  { %4028 = vrot.lane.b32.xlu1 %v4027_v18, %s4298_s29 }
 0x2aa   :  { %4048 = vrot.lane.b32.xlu0 %v4047_v42, %s4298_s29 }
 0x2ac   :  { %4033 = vrot.lane.b32.xlu1 %v4032_v19, %s4298_s29 }
 0x2b0   :  { %4043 = vrot.lane.b32.xlu1 %v4042_v45, %s4298_s29 }
 0x2b4   :  { %4053 = vrot.lane.b32.xlu1 %v4052_v48, %s4298_s29 }
 0x2f4   :  { %v692_v6 = vpop.permute.xlu0 %691 }
 0x2f5   :  { %3666 = vmatprep.subr.msk.mxu0 %vm403_vm4, %v692_v6 }
 0x2f6   :  { %3667 = vmatpush3.xpose.msk.msra.mxu0 %vm403_vm4, %v692_v6  ;;  %v690_v7 = vpop.permute.xlu1 %689 }
 0x2f7   :  { %3668 = vmatprep.subr.msk.mxu0 %vm403_vm4, %v690_v7 }
 0x2f8   :  { %v688_v8 = vpop.permute.xlu0 %687 }
 0x2fa   :  { %3669 = vmatpush3.xpose.msk.msra.mxu0 %vm403_vm4, %v690_v7  ;;  %v686_v9 = vpop.permute.xlu1 %685 }
 0x2fb   :  { %3670 = vmatprep.subr.msk.mxu0 %vm403_vm4, %v688_v8 }
 0x2fc   :  { %v684_v10 = vpop.permute.xlu0 %683 }
 0x2fe   :  { %3671 = vmatpush3.xpose.msk.msra.mxu0 %vm403_vm4, %v688_v8  ;;  %v682_v11 = vpop.permute.xlu1 %681 }
 0x2ff   :  { %3672 = vmatprep.subr.msk.mxu0 %vm403_vm4, %v686_v9 }
 0x300   :  { %v680_v13 = vpop.permute.xlu0 %679 }
 0x302   :  { %3673 = vmatpush3.xpose.msk.msra.mxu0 %vm403_vm4, %v686_v9  ;;  %v678_v14 = vpop.permute.xlu1 %677 }
 0x303   :  { %3674 = vmatprep.subr.msk.mxu0 %vm403_vm4, %v684_v10 }
 0x304   :  { %v676_v15 = vpop.permute.xlu0 %675 }
 0x306   :  { %3675 = vmatpush3.xpose.msk.msra.mxu0 %vm403_vm4, %v684_v10  ;;  %v674_v16 = vpop.permute.xlu1 %673 }
 0x307   :  { %3676 = vmatprep.subr.msk.mxu0 %vm403_vm4, %v682_v11 }
 0x308   :  { %v672_v18 = vpop.permute.xlu0 %671 }
 0x30a   :  { %3677 = vmatpush3.xpose.msk.msra.mxu0 %vm403_vm4, %v682_v11  ;;  %v670_v19 = vpop.permute.xlu1 %669 }
 0x30b   :  { %3678 = vmatprep.subr.msk.mxu0 %vm403_vm4, %v680_v13 }
 0x30c   :  { %v668_v25 = vpop.permute.xlu0 %667 }
 0x30e   :  { %3679 = vmatpush3.xpose.msk.msra.mxu0 %vm403_vm4, %v680_v13  ;;  %v666_v38 = vpop.permute.xlu1 %665 }
 0x30f   :  { %3680 = vmatprep.subr.msk.mxu0 %vm403_vm4, %v678_v14 }
 0x310   :  { %v664_v39 = vpop.permute.xlu0 %663 }
 0x312   :  { %3681 = vmatpush3.xpose.msk.msra.mxu0 %vm403_vm4, %v678_v14  ;;  %v662_v40 = vpop.permute.xlu1 %661 }
 0x313   :  { %3682 = vmatprep.subr.msk.mxu0 %vm403_vm4, %v676_v15 }
 0x314   :  { %v4664_v41 = vpop.permute.xlu0 %4023 }
 0x315   :  { %v5492_v42 = vunpack.i.l.bf16 %v4664_v41  ;;  %v5499_v47 = vunpack.i.h.bf16 %v4664_v41 }
 0x316   :  { %3683 = vmatpush3.xpose.msk.msra.mxu0 %vm403_vm4, %v676_v15  ;;  %v4668_v43 = vpop.permute.xlu1 %4018 }
 0x317   :  { %v5500_v44 = vunpack.i.l.bf16 %v4668_v43  ;;  %3684 = vmatprep.subr.msk.mxu0 %vm403_vm4, %v674_v16  ;;  %v642_v45 = vmul.f32 %v5492_v42, %v4543_v21  ;;  %v641_v63 = vmul.f32 %v5499_v47, %v4535_v4  ;;  %v5488_v33 = vunpack.i.h.bf16 %v4668_v43 }
 0x318   :  { %v4733_v8 = vpop.permute.xlu0 %4038 }
 0x319   :  { %1104 = vrot.lane.b32.xlu1 %v642_v45, %s4298_s29  ;;  %v644_v46 = vmul.f32 %v5500_v44, %v4539_v17  ;;  %v643_v6 = vmul.f32 %v5488_v33, %v4545_v22 }
 0x31a   :  { %3685 = vmatpush3.xpose.msk.msra.mxu0 %vm403_vm4, %v674_v16  ;;  %v4681_v48 = vpop.permute.xlu1 %4028 }
 0x31b   :  { %v5490_v52 = vunpack.i.l.bf16 %v4681_v48  ;;  %3686 = vmatprep.subr.msk.mxu0 %vm403_vm4, %v672_v18  ;;  %1108 = vrot.lane.b32.xlu0 %v644_v46, %s4298_s29  ;;  %v5487_v51 = vunpack.i.h.bf16 %v4681_v48 }
 0x31c   :  { %v4735_v9 = vpop.permute.xlu0 %4048 }
 0x31d   :  { %v640_v56 = vmul.f32 %v5490_v52, %v4539_v17  ;;  %v639_v7 = vmul.f32 %v5487_v51, %v4545_v22 }
 0x31e   :  { %3687 = vmatpush3.xpose.msk.msra.mxu0 %vm403_vm4, %v672_v18  ;;  %v4690_v58 = vpop.permute.xlu1 %4033 }
 0x31f   :  { %v5491_v3 = vunpack.i.l.bf16 %v4690_v58  ;;  %3688 = vmatprep.subr.msk.mxu0 %vm403_vm4, %v670_v19  ;;  %1100 = vrot.lane.b32.xlu1 %v640_v56, %s4298_s29  ;;  %v5489_v23 = vunpack.i.h.bf16 %v4690_v58  ;;  %v298_v56 = vshra.s32 %v4348_v28, 4 }
 0x320   :  { %1102 = vrot.lane.b32.xlu0 %v641_v63, %s4298_s29  ;;  %v4299_v63 = vmov -1e+09  }
 0x321   :  { %v638_v20 = vmul.f32 %v5491_v3, %v4543_v21  ;;  %v637_v49 = vmul.f32 %v5489_v23, %v4535_v4 }
 0x322   :  { %3689 = vmatpush3.xpose.msk.msra.mxu0 %vm403_vm4, %v670_v19  ;;  %v4737_v13 = vpop.permute.xlu1 %4043 }
 0x323   :  { %3690 = vmatprep.subr.msk.mxu0 %vm403_vm4, %v668_v25 }
 0x324   :  { %1096 = vrot.lane.b32.xlu0 %v638_v20, %s4298_s29 }
 0x326   :  { %3691 = vmatpush3.xpose.msk.msra.mxu0 %vm403_vm4, %v668_v25  ;;  %v4739_v16 = vpop.permute.xlu1 %4053 }
 0x327   :  { %3692 = vmatprep.subr.msk.mxu0 %vm403_vm4, %v666_v38  ;;  %5505 = vst [vmem:[#allocation11_spill] sm:$0xff] %v4739_v16 }
 0x328   :  { %1094 = vrot.lane.b32.xlu0 %v637_v49, %s4298_s29  ;;  %v300_v49 = vshra.s32 %v4354_v30, 4 }
 0x32a   :  { %3693 = vmatpush3.xpose.msk.msra.mxu0 %vm403_vm4, %v666_v38 }
 0x32b   :  { %3694 = vmatprep.subr.msk.mxu0 %vm403_vm4, %v664_v39 }
 0x32c   :  { %1106 = vrot.lane.b32.xlu0 %v643_v6, %s4298_s29 }
 0x32e   :  { %3695 = vmatpush3.xpose.msk.msra.mxu0 %vm403_vm4, %v664_v39  ;;  %v297_v39 = vand.u32 31, %v4356_v31 }
 0x32f   :  { %3696 = vmatprep.subr.msk.mxu0 %vm403_vm4, %v662_v40 }
 0x330   :  { %1098 = vrot.lane.b32.xlu0 %v639_v7, %s4298_s29  ;;  %v302_v45 = vshra.s32 %v297_v39, 4  ;;  %v307_v46 = vand.u32 15, %v297_v39 }
 0x332   :  { %3697 = vmatpush3.xpose.msk.msra.mxu0 %vm403_vm4, %v662_v40  ;;  %v299_v40 = vshra.s32 %v4351_v29, 4  ;;  %vm308_vm6 = vcmp.lt.s32.totalorder %v307_v46, 9  ;;  %vm303_vm7 = vcmp.eq.s32.totalorder %v298_v56, %v302_v45  ;;  %vm305_vm12 = vcmp.eq.s32.totalorder %v300_v49, %v302_v45 }
 0x333   :  { %vm309_vm9 = vmand %vm303_vm7, %vm308_vm6 }
 0x334   :  { %vm304_vm5 = vcmp.eq.s32.totalorder %v299_v40, %v302_v45  ;;  %v4749_v31 = vsel %vm309_vm9, 0.0, %v4299_v63  ;;  %vm311_vm14 = vmand %vm305_vm12, %vm308_vm6 }
 0x335   :  { %3699 = vmatmul.mubr.msk.f32.vlgmr.msra.gmra.mxu0 %vm403_vm4, %v4543_v21  ;;  %vm310_vm8 = vmand %vm304_vm5, %vm308_vm6  ;;  %vm2944_vm5 = vcmask 254976  }
 0x336   :  { %3701 = vmatprep.mubr.msk.f32.mxu0 %vm403_vm4, %v4545_v22  ;;  %v4746_v20 = vsel %vm310_vm8, 0.0, %v4299_v63 }
 0x339   :  { %3702 = vmatmul.mubr.msk.f32.gmra.mxu0 %vm403_vm4, %v4539_v17 }
 0x38b   :  { %v1105_v19 = vpop.permute.xlu1 %1104 }
 0x38d   :  { %v1109_v10 = vpop.permute.xlu0 %1108 }
 0x38e   :  { %3704 = vmatprep.subr.mxu1 %v1109_v10 }
 0x38f   :  { %3705 = vmatpush3.msra.mxu1 %v1109_v10 }
 0x391   :  { %v1101_v25 = vpop.permute.xlu1 %1100 }
 0x392   :  { %v1103_v11 = vpop.permute.xlu0 %1102 }
 0x396   :  { %v1097_v14 = vpop.permute.xlu0 %1096 }
 0x39a   :  { %v1095_v15 = vpop.permute.xlu0 %1094 }
 0x39e   :  { %v1107_v18 = vpop.permute.xlu0 %1106 }
 0x39f   :  { %3706 = vmatprep.subr.mxu1 %v1107_v18 }
 0x3a0   :  { %3707 = vmatpush3.msra.mxu1 %v1107_v18 }
 0x3a1   :  { %3708 = vmatprep.subr.mxu1 %v1105_v19 }
 0x3a2   :  { %3709 = vmatpush3.msra.mxu1 %v1105_v19  ;;  %v1099_v38 = vpop.permute.xlu0 %1098  ;;  %v4767_v19 = vsel %vm311_vm14, 0.0, %v4299_v63 }
 0x3a3   :  { %3710 = vmatprep.subr.mxu1 %v1103_v11 }
 0x3a4   :  { %3711 = vmatpush3.msra.mxu1 %v1103_v11 }
 0x3a5   :  { %3712 = vmatprep.subr.mxu1 %v1101_v25 }
 0x3a6   :  { %3713 = vmatpush3.msra.mxu1 %v1101_v25 }
 0x3a7   :  { %3714 = vmatprep.subr.mxu1 %v1099_v38 }
 0x3a8   :  { %3715 = vmatpush3.msra.mxu1 %v1099_v38 }
 0x3a9   :  { %3716 = vmatprep.subr.mxu1 %v1097_v14 }
 0x3aa   :  { %3717 = vmatpush3.msra.mxu1 %v1097_v14  ;;  %v301_v14 = vshra.s32 %v4363_v34, 4 }
 0x3ab   :  { %3718 = vmatprep.subr.mxu1 %v1095_v15 }
 0x3ac   :  { %3719 = vmatpush3.msra.mxu1 %v1095_v15  ;;  %vm306_vm15 = vcmp.eq.s32.totalorder %v301_v14, %v302_v45 }
 0x3ad   :  { %vm312_vm2 = vmand %vm306_vm15, %vm308_vm6  ;;  %vm3077_vm6 = vcmask 130048  }
 0x3ae   :  { %v4781_v45 = vsel %vm312_vm2, 0.0, %v4299_v63 }
 0x3f5   :  { %v3700_v6 = vpop.f32.mrf.mxu0 }
 0x3f6   :  { %v4752_v29 = vadd.f32 %v3700_v6, %v4746_v20 }
 0x3f7   :  { %v803_v28 = vpop.f32.mrf.mxu0 }
 0x3f8   :  { %v4755_v7 = vadd.f32 %v803_v28, %v4749_v31  ;;  %v870_v10 = vsel %vm866_vm10, %v4752_v29, -inf  ;;  %v931_v11 = vsel %vm927_vm11, %v4752_v29, -inf  ;;  %v992_v18 = vsel %vm988_vm13, %v4752_v29, -inf }
 0x3f9   :  { %v3703_v30 = vpop.f32.mrf.mxu0  ;;  %871 = vmax.xlane.f32.xlu1 %v870_v10  ;;  %932 = vmax.xlane.f32.xlu0 %v931_v11  ;;  %v825_v34 = vsel %vm403_vm4, %v4752_v29, -inf }
 0x3fa   :  { %v989_v15 = vsel %vm988_vm13, %v4755_v7, -inf  ;;  %v822_v39 = vsel %vm403_vm4, %v4755_v7, -inf  ;;  %v867_v56 = vsel %vm866_vm10, %v4755_v7, -inf  ;;  %v4784_v49 = vadd.f32 %v3703_v30, %v4781_v45 }
 0x3fb   :  { %v813_v25 = vpop.f32.mrf.mxu0  ;;  %v928_v46 = vsel %vm927_vm11, %v4755_v7, -inf }
 0x3fc   :  { %v4770_v38 = vadd.f32 %v813_v25, %v4767_v19  ;;  %v876_v63 = vsel %vm866_vm10, %v4784_v49, -inf  ;;  %v937_v11 = vsel %vm927_vm11, %v4784_v49, -inf  ;;  %v998_v30 = vsel %vm988_vm13, %v4784_v49, -inf }
 0x3fd   :  { %990 = vmax.xlane.f32.xlu1 %v989_v15  ;;  %993 = vmax.xlane.f32.xlu0 %v992_v18  ;;  %v831_v14 = vsel %vm403_vm4, %v4784_v49, -inf }
 0x3fe   :  { %v873_v40 = vsel %vm866_vm10, %v4770_v38, -inf  ;;  %v934_v6 = vsel %vm927_vm11, %v4770_v38, -inf  ;;  %v995_v28 = vsel %vm988_vm13, %v4770_v38, -inf  ;;  %v828_v10 = vsel %vm403_vm4, %v4770_v38, -inf }
 0x401   :  { %823 = vmax.xlane.f32.xlu1 %v822_v39  ;;  %826 = vmax.xlane.f32.xlu0 %v825_v34 }
 0x405   :  { %874 = vmax.xlane.f32.xlu1 %v873_v40  ;;  %868 = vmax.xlane.f32.xlu0 %v867_v56 }
 0x409   :  { %935 = vmax.xlane.f32.xlu1 %v934_v6  ;;  %929 = vmax.xlane.f32.xlu0 %v928_v46 }
 0x40d   :  { %996 = vmax.xlane.f32.xlu1 %v995_v28  ;;  %877 = vmax.xlane.f32.xlu0 %v876_v63 }
 0x411   :  { %829 = vmax.xlane.f32.xlu1 %v828_v10  ;;  %938 = vmax.xlane.f32.xlu0 %v937_v11 }
 0x415   :  { %999 = vmax.xlane.f32.xlu0 %v998_v30 }
 0x419   :  { %832 = vmax.xlane.f32.xlu0 %v831_v14 }
 0x482   :  { %v872_v15 = vpop.xlane.xlu1 %871  ;;  %v933_v18 = vpop.xlane.xlu0 %932 }
 0x483   :  { %v880_v25 = vsub.f32 %v4752_v29, %v872_v15  ;;  %v941_v39 = vsub.f32 %v4752_v29, %v933_v18 }
 0x485   :  { %v885_v34 = vmul.f32 1.442695, %v880_v25  ;;  %v946_v40 = vmul.f32 1.442695, %v941_v39 }
 0x486   :  { %v994_v56 = vpop.xlane.xlu0 %993  ;;  %v991_v18 = vpop.xlane.xlu1 %990 }
 0x487   :  { %4057 = vpow2.f32 %v885_v34  ;;  %v1002_v6 = vsub.f32 %v4752_v29, %v994_v56  ;;  %v1001_v33 = vsub.f32 %v4755_v7, %v991_v18 }
 0x488   :  { %4059 = vpow2.f32 %v946_v40 }
 0x489   :  { %v1007_v46 = vmul.f32 1.442695, %v1002_v6 }
 0x48a   :  { %v827_v28 = vpop.xlane.xlu0 %826  ;;  %v824_v39 = vpop.xlane.xlu1 %823 }
 0x48b   :  { %4061 = vpow2.f32 %v1007_v46  ;;  %v835_v34 = vsub.f32 %v4752_v29, %v827_v28  ;;  %v834_v40 = vsub.f32 %v4755_v7, %v824_v39 }
 0x48d   :  { %v840_v56 = vmul.f32 1.442695, %v835_v34  ;;  %v838_v6 = vmul.f32 1.442695, %v834_v40 }
 0x48e   :  { %v869_v63 = vpop.xlane.xlu0 %868  ;;  %v875_v28 = vpop.xlane.xlu1 %874 }
 0x48f   :  { %v879_v10 = vsub.f32 %v4755_v7, %v869_v63 }
 0x491   :  { %v883_v11 = vmul.f32 1.442695, %v879_v10 }
 0x492   :  { %v930_v46 = vpop.xlane.xlu0 %929 }
 0x493   :  { %4063 = vpow2.f32 %v883_v11  ;;  %v940_v11 = vsub.f32 %v4755_v7, %v930_v46  ;;  %v881_v46 = vsub.f32 %v4770_v38, %v875_v28  ;;  %v936_v7 = vpop.xlane.xlu1 %935 }
 0x494   :  { %v4806_v30 = vpop.eup %4057  ;;  %4065 = vpow2.f32 %v840_v56  ;;  %v1005_v56 = vmul.f32 1.442695, %v1001_v33 }
 0x495   :  { %v4808_v14 = vpop.eup %4059  ;;  %897 = vrot.lane.b32.xlu1 %v4806_v30, %s4297_s28  ;;  %4067 = vpow2.f32 %v838_v6  ;;  %v944_v23 = vmul.f32 1.442695, %v940_v11  ;;  %v887_v3 = vmul.f32 1.442695, %v881_v46 }
 0x496   :  { %958 = vrot.lane.b32.xlu0 %v4808_v14, %s4298_s29  ;;  %v878_v63 = vpop.xlane.xlu0 %877 }
 0x497   :  { %v882_v34 = vsub.f32 %v4784_v49, %v878_v63  ;;  %4069 = vpow2.f32 %v944_v23  ;;  %v942_v63 = vsub.f32 %v4770_v38, %v936_v7  ;;  %v997_v42 = vpop.xlane.xlu1 %996  ;;  %v5493_v7 = vunpack.i.l.bf16 %v4737_v13 }
 0x498   :  { %v4814_v15 = vpop.eup %4061  ;;  %4071 = vpow2.f32 %v1005_v56  ;;  %v1003_v33 = vsub.f32 %v4770_v38, %v997_v42  ;;  %v5497_v56 = vunpack.i.l.bf16 %v4733_v8 }
 0x499   :  { %1019 = vrot.lane.b32.xlu1 %v4814_v15, %s4296_s27  ;;  %v889_v18 = vmul.f32 1.442695, %v882_v34  ;;  %v948_v23 = vmul.f32 1.442695, %v942_v63  ;;  %v5495_v63 = vunpack.i.l.bf16 %v4735_v9 }
 0x49a   :  { %v939_v10 = vpop.xlane.xlu0 %938 }
 0x49b   :  { %v943_v11 = vsub.f32 %v4784_v49, %v939_v10  ;;  %4073 = vpow2.f32 %v889_v18  ;;  %v1009_v10 = vmul.f32 1.442695, %v1003_v33  ;;  %v636_v18 = vmul.f32 %v5497_v56, %v4539_v17 }
 0x49c   :  { %v632_v33 = vmul.f32 %v5495_v63, %v4539_v17 }
 0x49e   :  { %v1000_v39 = vpop.xlane.xlu0 %999 }
 0x49f   :  { %v1004_v6 = vsub.f32 %v4784_v49, %v1000_v39 }
 0x4a0   :  { %v4818_v25 = vpop.eup %4063 }
 0x4a1   :  { %895 = vrot.lane.b32.xlu0 %v4818_v25, %s4297_s28  ;;  %v4825_v0 = vpop.eup %4065  ;;  %v1011_v52 = vmul.f32 1.442695, %v1004_v6 }
 0x4a2   :  { %v4827_v51 = vpop.eup %4067  ;;  %v849_v29 = vsel %vm403_vm4, %v4825_v0, 0.0  ;;  %v833_v46 = vpop.xlane.xlu0 %832 }
 0x4a3   :  { %v846_v40 = vsel %vm403_vm4, %v4827_v51, 0.0  ;;  %4075 = vpow2.f32 %v1011_v52 }
 0x4a4   :  { %4077 = vpow2.f32 %v887_v3  ;;  %v4840_v39 = vpop.eup %4069 }
 0x4a5   :  { %v4844_v28 = vpop.eup %4071 }
 0x4a8   :  { %v4848_v34 = vpop.eup %4073 }
 0x4b0   :  { %v4850_v52 = vpop.eup %4075 }
 0x4b1   :  { %v4856_v42 = vpop.eup %4077 }
 0x4bd   :  { %850 = vadd.xlane.f32.xlu1 %v849_v29  ;;  %v950_v29 = vmul.f32 1.442695, %v943_v11  ;;  %v837_v11 = vsub.f32 %v4784_v49, %v833_v46 }
 0x4bf   :  { %4079 = vpow2.f32 %v950_v29  ;;  %v634_v29 = vmul.f32 %v5493_v7, %v4543_v21 }
 0x4c0   :  { %847 = vadd.xlane.f32.xlu0 %v846_v40  ;;  %4081 = vpow2.f32 %v948_v23  ;;  %v844_v23 = vmul.f32 1.442695, %v837_v11 }
 0x4c1   :  { %4083 = vpow2.f32 %v1009_v10  ;;  %v830_v10 = vpop.xlane.xlu1 %829 }
 0x4c2   :  { %4085 = vpow2.f32 %v844_v23  ;;  %v836_v49 = vsub.f32 %v4770_v38, %v830_v10  ;;  %v5496_v23 = vunpack.i.h.bf16 %v4737_v13 }
 0x4c4   :  { %v842_v46 = vmul.f32 1.442695, %v836_v49 }
 0x4c6   :  { %4087 = vpow2.f32 %v842_v46 }
 0x4cc   :  { %v4858_v3 = vpop.eup %4079 }
 0x4cd   :  { %v4864_v40 = vpop.eup %4081 }
 0x4ce   :  { %956 = vrot.lane.b32.xlu1 %v4840_v39, %s4298_s29  ;;  %v4869_v6 = vpop.eup %4083 }
 0x4d2   :  { %1017 = vrot.lane.b32.xlu1 %v4844_v28, %s4296_s27 }
 0x4d6   :  { %901 = vrot.lane.b32.xlu1 %v4848_v34, %s4297_s28  ;;  %1023 = vrot.lane.b32.xlu0 %v4850_v52, %s4296_s27 }
 0x4da   :  { %962 = vrot.lane.b32.xlu1 %v4858_v3, %s4298_s29  ;;  %899 = vrot.lane.b32.xlu0 %v4856_v42, %s4297_s28 }
 0x4de   :  { %960 = vrot.lane.b32.xlu0 %v4864_v40, %s4298_s29 }
 0x4e2   :  { %1021 = vrot.lane.b32.xlu0 %v4869_v6, %s4296_s27 }
 0x4e6   :  { %1092 = vrot.lane.b32.xlu0 %v636_v18, %s4298_s29  ;;  %v4889_v18 = vpop.eup %4085 }
 0x4e7   :  { %v855_v7 = vsel %vm403_vm4, %v4889_v18, 0.0  ;;  %v4893_v11 = vpop.eup %4087 }
 0x4e8   :  { %v852_v17 = vsel %vm403_vm4, %v4893_v11, 0.0 }
 0x4ea   :  { %1088 = vrot.lane.b32.xlu0 %v634_v29, %s4298_s29  ;;  %v5494_v29 = vunpack.i.h.bf16 %v4733_v8 }
 0x4ec   :  { %v635_v38 = vmul.f32 %v5494_v29, %v4545_v22 }
 0x4ee   :  { %1084 = vrot.lane.b32.xlu0 %v632_v33, %s4298_s29  ;;  %v5498_v33 = vunpack.i.h.bf16 %v4735_v9 }
 0x4f0   :  { %v631_v10 = vmul.f32 %v5498_v33, %v4545_v22 }
 0x4fe   :  { %856 = vadd.xlane.f32.xlu1 %v855_v7  ;;  %v633_v7 = vmul.f32 %v5496_v23, %v4535_v4 }
 0x507   :  { %v898_v49 = vpop.permute.xlu1 %897 }
 0x508   :  { %v910_v46 = vsel %vm403_vm4, %v898_v49, 0.0 }
 0x50b   :  { %v1020_v29 = vpop.permute.xlu1 %1019 }
 0x50c   :  { %v1032_v63 = vsel %vm403_vm4, %v1020_v29, 0.0 }
 0x50d   :  { %853 = vadd.xlane.f32.xlu0 %v852_v17  ;;  %v959_v17 = vpop.permute.xlu0 %958 }
 0x50f   :  { %1090 = vrot.lane.b32.xlu1 %v635_v38, %s4298_s29  ;;  %v971_v38 = vsel %vm403_vm4, %v959_v17, 0.0 }
 0x513   :  { %1086 = vrot.lane.b32.xlu1 %v633_v7, %s4298_s29  ;;  %v896_v23 = vpop.permute.xlu0 %895 }
 0x514   :  { %v907_v56 = vsel %vm403_vm4, %v896_v23, 0.0 }
 0x517   :  { %1082 = vrot.lane.b32.xlu1 %v631_v10, %s4298_s29 }
 0x53b   :  { %911 = vadd.xlane.f32.xlu1 %v910_v46 }
 0x53f   :  { %972 = vadd.xlane.f32.xlu1 %v971_v38 }
 0x543   :  { %1033 = vadd.xlane.f32.xlu1 %v1032_v63 }
 0x546   :  { %v851_v7 = vpop.xlane.xlu1 %850 }
 0x547   :  { %908 = vadd.xlane.f32.xlu1 %v907_v56 }
 0x549   :  { %v848_v22 = vpop.xlane.xlu0 %847 }
 0x54a   :  { %v957_v33 = vpop.permute.xlu1 %956 }
 0x54b   :  { %v968_v10 = vsel %vm403_vm4, %v957_v33, 0.0 }
 0x54c   :  { %969 = vadd.xlane.f32.xlu1 %v968_v10 }
 0x54d   :  { %v1024_v49 = vpop.permute.xlu0 %1023 }
 0x54e   :  { %v1018_v47 = vpop.permute.xlu1 %1017  ;;  %v1038_v63 = vsel %vm403_vm4, %v1024_v49, 0.0  ;;  %v5502_v49 = vunpack.i.h.bf16 %v4739_v16 }
 0x54f   :  { %v1029_v46 = vsel %vm403_vm4, %v1018_v47, 0.0 }
 0x550   :  { %1030 = vadd.xlane.f32.xlu1 %v1029_v46 }
 0x551   :  { %v900_v17 = vpop.permute.xlu0 %899 }
 0x552   :  { %v902_v38 = vpop.permute.xlu1 %901  ;;  %v913_v33 = vsel %vm403_vm4, %v900_v17, 0.0 }
 0x553   :  { %v916_v29 = vsel %vm403_vm4, %v902_v38, 0.0 }
 0x554   :  { %917 = vadd.xlane.f32.xlu0 %v916_v29  ;;  %1039 = vadd.xlane.f32.xlu1 %v1038_v63  ;;  %v629_v29 = vmul.f32 %v5502_v49, %v4535_v4 }
 0x555   :  { %v961_v23 = vpop.permute.xlu0 %960 }
 0x556   :  { %v963_v56 = vpop.permute.xlu1 %962  ;;  %v974_v47 = vsel %vm403_vm4, %v961_v23, 0.0 }
 0x557   :  { %v977_v44 = vsel %vm403_vm4, %v963_v56, 0.0 }
 0x558   :  { %978 = vadd.xlane.f32.xlu0 %v977_v44  ;;  %914 = vadd.xlane.f32.xlu1 %v913_v33  ;;  %v5501_v44 = vunpack.i.l.bf16 %v4739_v16 }
 0x559   :  { %v1022_v10 = vpop.permute.xlu0 %1021 }
 0x55a   :  { %v1035_v38 = vsel %vm403_vm4, %v1022_v10, 0.0  ;;  %v630_v17 = vmul.f32 %v5501_v44, %v4543_v21 }
 0x55c   :  { %975 = vadd.xlane.f32.xlu0 %v974_v47 }
 0x55d   :  { %v1093_v46 = vpop.permute.xlu0 %1092 }
 0x55e   :  { %3720 = vmatprep.subr.mxu1 %v1093_v46 }
 0x55f   :  { %3721 = vmatpush3.msra.mxu1 %v1093_v46 }
 0x560   :  { %1036 = vadd.xlane.f32.xlu0 %v1035_v38 }
 0x561   :  { %v1089_v23 = vpop.permute.xlu0 %1088 }
 0x565   :  { %v1085_v4 = vpop.permute.xlu0 %1084 }
 0x569   :  { %1078 = vrot.lane.b32.xlu1 %v629_v29, %s4298_s29 }
 0x576   :  { %1080 = vrot.lane.b32.xlu0 %v630_v17, %s4298_s29 }
 0x587   :  { %v857_v63 = vpop.xlane.xlu1 %856 }
 0x58b   :  { %v1091_v56 = vpop.permute.xlu1 %1090 }
 0x58c   :  { %3722 = vmatprep.subr.mxu1 %v1091_v56 }
 0x58d   :  { %3723 = vmatpush3.msra.mxu1 %v1091_v56 }
 0x58e   :  { %3724 = vmatprep.subr.mxu1 %v1089_v23 }
 0x58f   :  { %v1087_v33 = vpop.permute.xlu1 %1086  ;;  %3725 = vmatpush3.msra.mxu1 %v1089_v23 }
 0x590   :  { %3726 = vmatprep.subr.mxu1 %v1087_v33 }
 0x591   :  { %3727 = vmatpush3.msra.mxu1 %v1087_v33 }
 0x592   :  { %3728 = vmatprep.subr.mxu1 %v1085_v4 }
 0x593   :  { %v1083_v10 = vpop.permute.xlu1 %1082  ;;  %3729 = vmatpush3.msra.mxu1 %v1085_v4 }
 0x594   :  { %3730 = vmatprep.subr.mxu1 %v1083_v10 }
 0x595   :  { %3731 = vmatpush3.msra.mxu1 %v1083_v10 }
 0x596   :  { %v854_v17 = vpop.xlane.xlu0 %853 }
 0x5c4   :  { %v912_v47 = vpop.xlane.xlu1 %911 }
 0x5c8   :  { %v973_v21 = vpop.xlane.xlu1 %972 }
 0x5cc   :  { %v1034_v46 = vpop.xlane.xlu1 %1033 }
 0x5d0   :  { %v909_v38 = vpop.xlane.xlu1 %908 }
 0x5d1   :  { %4089 = vrcp.f32 %v909_v38 }
 0x5d2   :  { %4091 = vrcp.f32 %v848_v22 }
 0x5d5   :  { %v970_v29 = vpop.xlane.xlu1 %969 }
 0x5d6   :  { %4093 = vrcp.f32 %v970_v29 }
 0x5d7   :  { %4095 = vrcp.f32 %v851_v7 }
 0x5d9   :  { %v1031_v56 = vpop.xlane.xlu1 %1030 }
 0x5da   :  { %4097 = vrcp.f32 %v1031_v56 }
 0x5db   :  { %4099 = vrcp.f32 %v912_v47 }
 0x5dc   :  { %4101 = vrcp.f32 %v973_v21 }
 0x5dd   :  { %4103 = vrcp.f32 %v1034_v46  ;;  %v1040_v23 = vpop.xlane.xlu1 %1039  ;;  %v918_v33 = vpop.xlane.xlu0 %917 }
 0x5de   :  { %v4090_v4 = vpop.eup %4089  ;;  %4105 = vrcp.f32 %v857_v63 }
 0x5df   :  { %v4092_v49 = vpop.eup %4091  ;;  %4107 = vrcp.f32 %v918_v33  ;;  %v923_v22 = vmul.f32 %v4090_v4, %v4818_v25 }
 0x5e0   :  { %v862_v21 = vmul.f32 %v4092_v49, %v4827_v51 }
 0x5e1   :  { %v915_v10 = vpop.xlane.xlu1 %914  ;;  %v979_v44 = vpop.xlane.xlu0 %978 }
 0x5e2   :  { %4109 = vrcp.f32 %v915_v10  ;;  %v1049_v56 = vsel %vm403_vm4, %v862_v21, %v923_v22 }
 0x5e3   :  { %v4094_v16 = vpop.eup %4093  ;;  %4111 = vrcp.f32 %v979_v44 }
 0x5e4   :  { %4113 = vrcp.f32 %v854_v17  ;;  %v984_v38 = vmul.f32 %v4094_v16, %v4840_v39  ;;  %v4096_v47 = vpop.eup %4095 }
 0x5e5   :  { %v976_v7 = vpop.xlane.xlu0 %975  ;;  %v1079_v22 = vpop.permute.xlu1 %1078 }
 0x5e6   :  { %4115 = vrcp.f32 %v976_v7  ;;  %v1053_v44 = vsel %vm55_vm1, %v1049_v56, %v984_v38  ;;  %v1214_v38 = vld [vmem:[#allocation2 + $0xf8] sm:$0xff] }
 0x5e7   :  { %v4098_v46 = vpop.eup %4097  ;;  %4117 = vrcp.f32 %v1040_v23 }
 0x5e8   :  { %v4100_v29 = vpop.eup %4099  ;;  %v1045_v63 = vmul.f32 %v4098_v46, %v4844_v28  ;;  %v863_v28 = vmul.f32 %v4096_v47, %v4825_v0 }
 0x5e9   :  { %v4102_v33 = vpop.eup %4101  ;;  %v1037_v10 = vpop.xlane.xlu0 %1036  ;;  %v924_v39 = vmul.f32 %v4100_v29, %v4806_v30  ;;  %v1213_v29 = vld [vmem:[#allocation2 + $0xf0] sm:$0xff] }
 0x5ea   :  { %v4104_v25 = vpop.eup %4103  ;;  %4119 = vrcp.f32 %v1037_v10  ;;  %v1058_v16 = vsel %vm1057_vm3, %v1053_v44, %v1045_v63  ;;  %v985_v51 = vmul.f32 %v4102_v33, %v4808_v14  ;;  %v1212_v63 = vld [vmem:[#allocation2 + $0xe8] sm:$0xff] }
 0x5eb   :  { %3736 = vmatprep.mubr.f32.mxu1 %v1058_v16  ;;  %v1046_v17 = vmul.f32 %v4104_v25, %v4814_v15  ;;  %v4106_v4 = vpop.eup %4105  ;;  %v1050_v7 = vsel %vm403_vm4, %v863_v28, %v924_v39  ;;  %v1211_v28 = vld [vmem:[#allocation2 + $0xe0] sm:$0xff] }
 0x5ec   :  { %v4108_v23 = vpop.eup %4107  ;;  %v1054_v46 = vsel %vm55_vm1, %v1050_v7, %v985_v51  ;;  %v865_v44 = vmul.f32 %v4106_v4, %v4889_v18 }
 0x5ed   :  { %v1081_v49 = vpop.permute.xlu0 %1080  ;;  %v1059_v14 = vsel %vm1057_vm3, %v1054_v46, %v1046_v17  ;;  %v926_v47 = vmul.f32 %v4108_v23, %v4848_v34 }
 0x5ee   :  { %3732 = vmatprep.subr.mxu1 %v1081_v49 }
 0x5ef   :  { %3733 = vmatpush3.msra.mxu1 %v1081_v49  ;;  %v4110_v21 = vpop.eup %4109  ;;  %v1052_v51 = vsel %vm403_vm4, %v865_v44, %v926_v47 }
 0x5f0   :  { %3734 = vmatprep.subr.mxu1 %v1079_v22  ;;  %v4112_v30 = vpop.eup %4111  ;;  %v925_v56 = vmul.f32 %v4110_v21, %v4856_v42 }
 0x5f1   :  { %3735 = vmatpush3.msra.mxu1 %v1079_v22  ;;  %v4114_v0 = vpop.eup %4113  ;;  %v987_v33 = vmul.f32 %v4112_v30, %v4858_v3 }
 0x5f2   :  { %3737 = vmatmul.mubr.f32.vlgmr.msra.gmra.mxu1 %v1059_v14  ;;  %3742 = vmatprep.subr.mxu1 %v1214_v38  ;;  %v864_v16 = vmul.f32 %v4114_v0, %v4893_v11 }
 0x5f3   :  { %v4116_v15 = vpop.eup %4115  ;;  %3743 = vmatpush3.msra.mxu1 %v1214_v38  ;;  %v1056_v3 = vsel %vm55_vm1, %v1052_v51, %v987_v33 }
 0x5f4   :  { %3744 = vmatprep.subr.mxu1 %v1213_v29  ;;  %v986_v10 = vmul.f32 %v4116_v15, %v4864_v40  ;;  %v4118_v25 = vpop.eup %4117  ;;  %v1051_v42 = vsel %vm403_vm4, %v864_v16, %v925_v56 }
 0x5f5   :  { %3745 = vmatpush3.msra.mxu1 %v1213_v29  ;;  %v1048_v40 = vmul.f32 %v4118_v25, %v4850_v52  ;;  %v3315_v52 = vld [vmem:[#allocation5 + $0x3] ss:$0 sm:$0xff] }
 0x5f6   :  { %3746 = vmatprep.subr.mxu1 %v1212_v63  ;;  %v1055_v49 = vsel %vm55_vm1, %v1051_v42, %v986_v10  ;;  %v1402_v42 = vld [vmem:[#allocation2 + $0x110] sm:$0xff] }
 0x5f7   :  { %v4120_v39 = vpop.eup %4119  ;;  %3747 = vmatpush3.msra.mxu1 %v1212_v63  ;;  %v1061_v11 = vsel %vm1057_vm3, %v1056_v3, %v1048_v40  ;;  %v1401_v3 = vld [vmem:[#allocation2 + $0x108] sm:$0xff]  ;;  %v1525_v40 = vld [vmem:[#allocation2 + $0x198] sm:$0xff] }
 0x5f8   :  { %v1047_v34 = vmul.f32 %v4120_v39, %v4869_v6  ;;  %3748 = vmatprep.subr.mxu1 %v1211_v28 }
 0x5f9   :  { %3749 = vmatpush3.msra.mxu1 %v1211_v28 }
 0x5fa   :  { %v1060_v18 = vsel %vm1057_vm3, %v1055_v49, %v1047_v34  ;;  %v1403_v34 = vld [vmem:[#allocation2 + $0x118] sm:$0xff]  ;;  %v1400_v49 = vld [vmem:[#allocation2 + $0x100] sm:$0xff] }
 0x5fb   :  { %3739 = vmatprep.mubr.f32.mxu1 %v1060_v18  ;;  %3756 = vmatprep.subr.mxu1 %v1403_v34 }
 0x5fc   :  { %3740 = vmatmul.mubr.f32.gmra.mxu1 %v1061_v11 }
 0x6b2   :  { %v3738_v17 = vpop.f32.mrf.mxu1 }
 0x6b4   :  { %v1192_v4 = vpop.f32.mrf.mxu1 }
 0x6b5   :  { %3750 = vmatprep.mubr.msk.f32.mxu1 %vm403_vm4, %v1192_v4 }
 0x6b6   :  { %3751 = vmatmul.mubr.msk.f32.vlgmr.msra.gmra.mxu1 %vm403_vm4, %v3738_v17 }
 0x6b7   :  { %3757 = vmatpush3.msra.mxu1 %v1403_v34 }
 0x6b8   :  { %3758 = vmatprep.subr.mxu1 %v1402_v42 }
 0x6b9   :  { %3759 = vmatpush3.msra.mxu1 %v1402_v42 }
 0x6ba   :  { %3760 = vmatprep.subr.mxu1 %v1401_v3 }
 0x6bb   :  { %3761 = vmatpush3.msra.mxu1 %v1401_v3 }
 0x6bc   :  { %v3741_v6 = vpop.f32.mrf.mxu1  ;;  %3762 = vmatprep.subr.mxu1 %v1400_v49 }
 0x6bd   :  { %3763 = vmatpush3.msra.mxu1 %v1400_v49 }
 0x6be   :  { %v1202_v23 = vpop.f32.mrf.mxu1  ;;  %3770 = vmatprep.subr.mxu1 %v1525_v40 }
 0x6bf   :  { %3753 = vmatprep.mubr.msk.f32.mxu1 %vm403_vm4, %v1202_v23 }
 0x6c0   :  { %3754 = vmatmul.mubr.msk.f32.gmra.mxu1 %vm403_vm4, %v3741_v6 }
 0x776   :  { %v3752_v22 = vpop.f32.mrf.mxu1 }
 0x777   :  { %v1304_v7 = vadd.f32 %v3752_v22, %v3315_v52 }
 0x778   :  { %v1298_v38 = vpop.f32.mrf.mxu1 }
 0x779   :  { %v4967_v21 = vadd.f32 %v1304_v7, %v4511_v55  ;;  %v1299_v46 = vadd.f32 %v3315_v52, %v1298_v38 }
 0x77b   :  { %v4970_v30 = vadd.f32 %v1299_v46, %v4509_v54  ;;  %v1326_v14 = vsel %vm403_vm4, %v4967_v21, 0.0  ;;  %v1341_v0 = vmul.f32 %v4967_v21, %v4967_v21 }
 0x77c   :  { %1327 = vadd.xlane.f32.xlu1 %v1326_v14 }
 0x77d   :  { %v1323_v29 = vsel %vm403_vm4, %v4970_v30, 0.0  ;;  %v1347_v55 = vsel %vm403_vm4, %v1341_v0, 0.0  ;;  %v1340_v63 = vmul.f32 %v4970_v30, %v4970_v30 }
 0x77e   :  { %1324 = vadd.xlane.f32.xlu0 %v1323_v29 }
 0x77f   :  { %v1344_v44 = vsel %vm403_vm4, %v1340_v63, 0.0 }
 0x780   :  { %v3755_v15 = vpop.f32.mrf.mxu1 }
 0x781   :  { %v1314_v47 = vadd.f32 %v3755_v15, %v3315_v52 }
 0x782   :  { %v1308_v54 = vpop.f32.mrf.mxu1  ;;  %1348 = vadd.xlane.f32.xlu0 %v1347_v55 }
 0x783   :  { %v1309_v56 = vadd.f32 %v3315_v52, %v1308_v54  ;;  %v4982_v33 = vadd.f32 %v1314_v47, %v4519_v59 }
 0x785   :  { %v4985_v10 = vadd.f32 %v1309_v56, %v4517_v32  ;;  %v1332_v39 = vsel %vm403_vm4, %v4982_v33, 0.0  ;;  %v1343_v59 = vmul.f32 %v4982_v33, %v4982_v33 }
 0x786   :  { %1345 = vadd.xlane.f32.xlu0 %v1344_v44 }
 0x787   :  { %v1329_v25 = vsel %vm403_vm4, %v4985_v10, 0.0  ;;  %v1342_v16 = vmul.f32 %v4985_v10, %v4985_v10  ;;  %v1353_v51 = vsel %vm403_vm4, %v1343_v59, 0.0 }
 0x788   :  { %1330 = vadd.xlane.f32.xlu1 %v1329_v25 }
 0x789   :  { %v1350_v32 = vsel %vm403_vm4, %v1342_v16, 0.0 }
 0x78a   :  { %1333 = vadd.xlane.f32.xlu0 %v1332_v39 }
 0x78c   :  { %1351 = vadd.xlane.f32.xlu1 %v1350_v32 }
 0x78e   :  { %1354 = vadd.xlane.f32.xlu0 %v1353_v51 }
 0x805   :  { %v1328_v18 = vpop.xlane.xlu1 %1327 }
 0x806   :  { %v1337_v28 = vmul.f32 0.03125, %v1328_v18  ;;  %v3320_v18 = vld [vmem:[#allocation5 + $0x4] ss:$0 sm:$0xff] }
 0x807   :  { %v1325_v11 = vpop.xlane.xlu0 %1324 }
 0x808   :  { %v1361_v4 = vmul.f32 %v1337_v28, %v1337_v28  ;;  %v1336_v6 = vmul.f32 0.03125, %v1325_v11  ;;  %v1369_v42 = vsub.f32 %v4967_v21, %v1337_v28 }
 0x80a   :  { %v1360_v7 = vmul.f32 %v1336_v6, %v1336_v6  ;;  %v1368_v49 = vsub.f32 %v4970_v30, %v1336_v6  ;;  %v1524_v30 = vld [vmem:[#allocation2 + $0x190] sm:$0xff] }
 0x80b   :  { %v1349_v17 = vpop.xlane.xlu0 %1348 }
 0x80c   :  { %v1357_v23 = vmul.f32 0.03125, %v1349_v17 }
 0x80e   :  { %v1365_v52 = vsub.f32 %v1357_v23, %v1361_v4  ;;  %v3321_v23 = vld [vmem:[#allocation5 + $0x5] ss:$0 sm:$0xff] }
 0x80f   :  { %v1346_v22 = vpop.xlane.xlu0 %1345 }
 0x810   :  { %v1373_v38 = vadd.f32 1e-05, %v1365_v52  ;;  %v1356_v46 = vmul.f32 0.03125, %v1346_v22 }
 0x811   :  { %v1331_v14 = vpop.xlane.xlu1 %1330 }
 0x812   :  { %4121 = vrsqrt.f32 %v1373_v38  ;;  %v1364_v29 = vsub.f32 %v1356_v46, %v1360_v7  ;;  %v1338_v0 = vmul.f32 0.03125, %v1331_v14 }
 0x813   :  { %v1334_v15 = vpop.xlane.xlu0 %1333 }
 0x814   :  { %v1372_v47 = vadd.f32 1e-05, %v1364_v29  ;;  %v1339_v55 = vmul.f32 0.03125, %v1334_v15  ;;  %v1362_v54 = vmul.f32 %v1338_v0, %v1338_v0  ;;  %v1370_v22 = vsub.f32 %v4985_v10, %v1338_v0  ;;  %v1523_v10 = vld [vmem:[#allocation2 + $0x188] sm:$0xff] }
 0x815   :  { %v1352_v63 = vpop.xlane.xlu1 %1351 }
 0x816   :  { %4123 = vrsqrt.f32 %v1372_v47  ;;  %v1358_v56 = vmul.f32 0.03125, %v1352_v63  ;;  %v1363_v25 = vmul.f32 %v1339_v55, %v1339_v55  ;;  %v1371_v14 = vsub.f32 %v4982_v33, %v1339_v55  ;;  %v1522_v47 = vld [vmem:[#allocation2 + $0x180] sm:$0xff]  ;;  %v1521_v55 = vld [vmem:[#allocation2 + $0x178] sm:$0xff]  ;;  %v1519_v63 = vld [vmem:[#allocation2 + $0x168] sm:$0xff] }
 0x817   :  { %v1355_v44 = vpop.xlane.xlu0 %1354 }
 0x818   :  { %v1366_v16 = vsub.f32 %v1358_v56, %v1362_v54  ;;  %v1359_v39 = vmul.f32 0.03125, %v1355_v44  ;;  %v1518_v54 = vld [vmem:[#allocation2 + $0x160] sm:$0xff]  ;;  %v1517_v56 = vld [vmem:[#allocation2 + $0x158] sm:$0xff]  ;;  %v1516_v44 = vld [vmem:[#allocation2 + $0x150] sm:$0xff] }
 0x81a   :  { %v1374_v59 = vadd.f32 1e-05, %v1366_v16  ;;  %v1367_v32 = vsub.f32 %v1359_v39, %v1363_v25  ;;  %v1515_v25 = vld [vmem:[#allocation2 + $0x148] sm:$0xff]  ;;  %v1514_v16 = vld [vmem:[#allocation2 + $0x140] sm:$0xff]  ;;  %v1513_v39 = vld [vmem:[#allocation2 + $0x138] sm:$0xff] }
 0x81c   :  { %4125 = vrsqrt.f32 %v1374_v59  ;;  %v1375_v51 = vadd.f32 1e-05, %v1367_v32  ;;  %v1512_v59 = vld [vmem:[#allocation2 + $0x130] sm:$0xff]  ;;  %v1511_v32 = vld [vmem:[#allocation2 + $0x128] sm:$0xff] }
 0x81e   :  { %4127 = vrsqrt.f32 %v1375_v51  ;;  %v1510_v51 = vld [vmem:[#allocation2 + $0x120] sm:$0xff] }
 0x81f   :  { %v4122_v34 = vpop.eup %4121 }
 0x820   :  { %v1381_v3 = vmul.f32 %v4122_v34, %v1369_v42  ;;  %v3322_v34 = vld [vmem:[#allocation5 + $0x6] ss:$0 sm:$0xff] }
 0x822   :  { %v1389_v4 = vmul.f32 %v3320_v18, %v1381_v3 }
 0x823   :  { %v4124_v11 = vpop.eup %4123 }
 0x824   :  { %v1380_v17 = vmul.f32 %v4124_v11, %v1368_v49  ;;  %v5003_v46 = vadd.f32 %v3321_v23, %v1389_v4 }
 0x826   :  { %v1388_v52 = vmul.f32 %v3320_v18, %v1380_v17 }
 0x828   :  { %v5001_v7 = vadd.f32 %v3321_v23, %v1388_v52 }
 0x829   :  { %v4126_v38 = vpop.eup %4125 }
 0x82a   :  { %3764 = vmatprep.mubr.msk.f32.mxu1 %vm403_vm4, %v5001_v7  ;;  %v1382_v21 = vmul.f32 %v4126_v38, %v1370_v22 }
 0x82b   :  { %v4128_v28 = vpop.eup %4127  ;;  %3765 = vmatmul.mubr.msk.f32.vlgmr.msra.gmra.mxu1 %vm403_vm4, %v5003_v46 }
 0x82c   :  { %v1390_v6 = vmul.f32 %v3320_v18, %v1382_v21  ;;  %v1383_v29 = vmul.f32 %v4128_v28, %v1371_v14  ;;  %3771 = vmatpush3.msra.mxu1 %v1525_v40  ;;  %v1520_v40 = vld [vmem:[#allocation2 + $0x170] sm:$0xff] }
 0x82d   :  { %3772 = vmatprep.subr.mxu1 %v1524_v30  ;;  %v3327_v21 = vld [vmem:[#allocation5 + $0x7] ss:$0 sm:$0xff] }
 0x82e   :  { %v5010_v0 = vadd.f32 %v3321_v23, %v1390_v6  ;;  %v1391_v15 = vmul.f32 %v3320_v18, %v1383_v29  ;;  %3773 = vmatpush3.msra.mxu1 %v1524_v30 }
 0x82f   :  { %3774 = vmatprep.subr.mxu1 %v1523_v10 }
 0x830   :  { %3767 = vmatprep.mubr.msk.f32.mxu1 %vm403_vm4, %v5010_v0  ;;  %v5014_v33 = vadd.f32 %v3321_v23, %v1391_v15  ;;  %3775 = vmatpush3.msra.mxu1 %v1523_v10 }
 0x831   :  { %3776 = vmatprep.subr.mxu1 %v1522_v47 }
 0x832   :  { %3768 = vmatmul.mubr.msk.f32.gmra.mxu1 %vm403_vm4, %v5014_v33 }
 0x833   :  { %3777 = vmatpush3.msra.mxu1 %v1522_v47 }
 0x834   :  { %3778 = vmatprep.subr.mxu1 %v1521_v55 }
 0x835   :  { %3779 = vmatpush3.msra.mxu1 %v1521_v55 }
 0x836   :  { %3780 = vmatprep.subr.mxu1 %v1520_v40 }
 0x837   :  { %3781 = vmatpush3.msra.mxu1 %v1520_v40 }
 0x838   :  { %3782 = vmatprep.subr.mxu1 %v1519_v63 }
 0x839   :  { %3783 = vmatpush3.msra.mxu1 %v1519_v63 }
 0x83a   :  { %3784 = vmatprep.subr.mxu1 %v1518_v54 }
 0x83b   :  { %3785 = vmatpush3.msra.mxu1 %v1518_v54 }
 0x83c   :  { %3786 = vmatprep.subr.mxu1 %v1517_v56 }
 0x83d   :  { %3787 = vmatpush3.msra.mxu1 %v1517_v56 }
 0x83e   :  { %3788 = vmatprep.subr.mxu1 %v1516_v44 }
 0x83f   :  { %3789 = vmatpush3.msra.mxu1 %v1516_v44 }
 0x840   :  { %3790 = vmatprep.subr.mxu1 %v1515_v25 }
 0x841   :  { %3791 = vmatpush3.msra.mxu1 %v1515_v25 }
 0x842   :  { %3792 = vmatprep.subr.mxu1 %v1514_v16 }
 0x843   :  { %3793 = vmatpush3.msra.mxu1 %v1514_v16 }
 0x844   :  { %3794 = vmatprep.subr.mxu1 %v1513_v39 }
 0x845   :  { %3795 = vmatpush3.msra.mxu1 %v1513_v39 }
 0x846   :  { %3796 = vmatprep.subr.mxu1 %v1512_v59 }
 0x847   :  { %3797 = vmatpush3.msra.mxu1 %v1512_v59 }
 0x848   :  { %3798 = vmatprep.subr.mxu1 %v1511_v32 }
 0x849   :  { %3799 = vmatpush3.msra.mxu1 %v1511_v32 }
 0x84a   :  { %3800 = vmatprep.subr.mxu1 %v1510_v51 }
 0x84b   :  { %3801 = vmatpush3.msra.mxu1 %v1510_v51 }
 0x8eb   :  { %v3766_v42 = vpop.f32.mrf.mxu1 }
 0x8ec   :  { %v1493_v3 = vadd.f32 %v3766_v42, %v3322_v34  ;;  %v1701_v42 = vld [vmem:[#allocation2 + $0x1b8] sm:$0xff] }
 0x8ed   :  { %v1487_v49 = vpop.f32.mrf.mxu1  ;;  %3808 = vmatprep.subr.mxu0 %v1701_v42 }
 0x8ee   :  { %v1488_v18 = vadd.f32 %v3322_v34, %v1487_v49  ;;  %v1507_v17 = vmax.f32 %v1493_v3, 0.0  ;;  %v1700_v3 = vld [vmem:[#allocation2 + $0x1b0] sm:$0xff]  ;;  %3809 = vmatpush3.msra.mxu0 %v1701_v42  ;;  %v1699_v49 = vld [vmem:[#allocation2 + $0x1a8] sm:$0xff] }
 0x8ef   :  { %3810 = vmatprep.subr.mxu0 %v1700_v3 }
 0x8f0   :  { %v1506_v11 = vmax.f32 %v1488_v18, 0.0  ;;  %3811 = vmatpush3.msra.mxu0 %v1700_v3  ;;  %v1698_v18 = vld [vmem:[#allocation2 + $0x1a0] sm:$0xff] }
 0x8f1   :  { %3812 = vmatprep.subr.mxu0 %v1699_v49 }
 0x8f2   :  { %v3769_v4 = vpop.f32.mrf.mxu1  ;;  %3802 = vmatprep.mubr.f32.mxu1 %v1506_v11  ;;  %3813 = vmatpush3.msra.mxu0 %v1699_v49 }
 0x8f3   :  { %3803 = vmatmul.mubr.f32.vlgmr.msra.gmra.mxu1 %v1507_v17  ;;  %v1503_v23 = vadd.f32 %v3769_v4, %v3322_v34  ;;  %3814 = vmatprep.subr.mxu0 %v1698_v18 }
 0x8f4   :  { %v1497_v52 = vpop.f32.mrf.mxu1  ;;  %3815 = vmatpush3.msra.mxu0 %v1698_v18  ;;  %v3328_v18 = vld [vmem:[#allocation5 + $0x8] ss:$0 sm:$0xff] }
 0x8f5   :  { %v1498_v22 = vadd.f32 %v3322_v34, %v1497_v52  ;;  %v1509_v14 = vmax.f32 %v1503_v23, 0.0 }
 0x8f7   :  { %v1508_v38 = vmax.f32 %v1498_v22, 0.0 }
 0x8f9   :  { %3805 = vmatprep.mubr.f32.mxu1 %v1508_v38 }
 0x8fa   :  { %3806 = vmatmul.mubr.f32.gmra.mxu1 %v1509_v14 }
 0x9b3   :  { %v3804_v30 = vpop.f32.mrf.mxu1 }
 0x9b4   :  { %v1603_v28 = vadd.f32 %v3804_v30, %v3327_v21 }
 0x9b5   :  { %v1597_v6 = vpop.f32.mrf.mxu1 }
 0x9b6   :  { %v5019_v29 = vadd.f32 %v1603_v28, %v5003_v46  ;;  %v1598_v10 = vadd.f32 %v3327_v21, %v1597_v6 }
 0x9b8   :  { %v5022_v15 = vadd.f32 %v1598_v10, %v5001_v7  ;;  %v1625_v47 = vsel %vm403_vm4, %v5019_v29, 0.0  ;;  %v1639_v55 = vmul.f32 %v5019_v29, %v5019_v29 }
 0x9b9   :  { %1626 = vadd.xlane.f32.xlu0 %v1625_v47 }
 0x9ba   :  { %v3807_v40 = vpop.f32.mrf.mxu1  ;;  %v1622_v63 = vsel %vm403_vm4, %v5022_v15, 0.0  ;;  %v1638_v54 = vmul.f32 %v5022_v15, %v5022_v15  ;;  %v1645_v7 = vsel %vm403_vm4, %v1639_v55, 0.0 }
 0x9bb   :  { %v1613_v46 = vadd.f32 %v3807_v40, %v3327_v21  ;;  %1623 = vadd.xlane.f32.xlu1 %v1622_v63 }
 0x9bc   :  { %v1607_v56 = vpop.f32.mrf.mxu1  ;;  %v1642_v16 = vsel %vm403_vm4, %v1638_v54, 0.0 }
 0x9bd   :  { %v5034_v44 = vadd.f32 %v1613_v46, %v5014_v33  ;;  %v1608_v25 = vadd.f32 %v3327_v21, %v1607_v56  ;;  %1646 = vadd.xlane.f32.xlu0 %v1645_v7 }
 0x9bf   :  { %v5038_v39 = vadd.f32 %v1608_v25, %v5010_v0  ;;  %1643 = vadd.xlane.f32.xlu1 %v1642_v16  ;;  %v1631_v59 = vsel %vm403_vm4, %v5034_v44, 0.0  ;;  %v1641_v32 = vmul.f32 %v5034_v44, %v5034_v44 }
 0x9c1   :  { %1632 = vadd.xlane.f32.xlu0 %v1631_v59  ;;  %v1628_v51 = vsel %vm403_vm4, %v5038_v39, 0.0  ;;  %v1640_v33 = vmul.f32 %v5038_v39, %v5038_v39  ;;  %v1651_v34 = vsel %vm403_vm4, %v1641_v32, 0.0 }
 0x9c3   :  { %1629 = vadd.xlane.f32.xlu1 %v1628_v51  ;;  %v1648_v0 = vsel %vm403_vm4, %v1640_v33, 0.0 }
 0x9c5   :  { %1652 = vadd.xlane.f32.xlu0 %v1651_v34 }
 0x9c7   :  { %1649 = vadd.xlane.f32.xlu1 %v1648_v0 }
 0xa42   :  { %v1627_v11 = vpop.xlane.xlu0 %1626 }
 0xa43   :  { %v1635_v17 = vmul.f32 0.03125, %v1627_v11 }
 0xa44   :  { %v1624_v4 = vpop.xlane.xlu1 %1623 }
 0xa45   :  { %v1634_v23 = vmul.f32 0.03125, %v1624_v4  ;;  %v1659_v22 = vmul.f32 %v1635_v17, %v1635_v17  ;;  %v1667_v0 = vsub.f32 %v5019_v29, %v1635_v17 }
 0xa46   :  { %v1647_v52 = vpop.xlane.xlu0 %1646 }
 0xa47   :  { %v1655_v38 = vmul.f32 0.03125, %v1647_v52  ;;  %v1658_v21 = vmul.f32 %v1634_v23, %v1634_v23  ;;  %v1666_v3 = vsub.f32 %v5022_v15, %v1634_v23 }
 0xa48   :  { %v1644_v14 = vpop.xlane.xlu1 %1643 }
 0xa49   :  { %v1663_v30 = vsub.f32 %v1655_v38, %v1659_v22  ;;  %v1654_v28 = vmul.f32 0.03125, %v1644_v14  ;;  %v3329_v22 = vld [vmem:[#allocation5 + $0x9] ss:$0 sm:$0xff] }
 0xa4a   :  { %v1633_v6 = vpop.xlane.xlu0 %1632 }
 0xa4b   :  { %v1671_v10 = vadd.f32 1e-05, %v1663_v30  ;;  %v1662_v47 = vsub.f32 %v1654_v28, %v1658_v21  ;;  %v1637_v55 = vmul.f32 0.03125, %v1633_v6 }
 0xa4c   :  { %v1630_v40 = vpop.xlane.xlu1 %1629 }
 0xa4d   :  { %4129 = vrsqrt.f32 %v1671_v10  ;;  %v1670_v63 = vadd.f32 1e-05, %v1662_v47  ;;  %v1636_v54 = vmul.f32 0.03125, %v1630_v40  ;;  %v1661_v56 = vmul.f32 %v1637_v55, %v1637_v55 }
 0xa4e   :  { %v1653_v46 = vpop.xlane.xlu0 %1652  ;;  %v1669_v14 = vsub.f32 %v5034_v44, %v1637_v55  ;;  %v3330_v55 = vld [vmem:[#allocation5 + $0xa] ss:$0 sm:$0xff] }
 0xa4f   :  { %4131 = vrsqrt.f32 %v1670_v63  ;;  %v1657_v7 = vmul.f32 0.03125, %v1653_v46  ;;  %v1660_v16 = vmul.f32 %v1636_v54, %v1636_v54  ;;  %v1668_v6 = vsub.f32 %v5038_v39, %v1636_v54 }
 0xa50   :  { %v1650_v25 = vpop.xlane.xlu1 %1649 }
 0xa51   :  { %v1665_v59 = vsub.f32 %v1657_v7, %v1661_v56  ;;  %v1656_v32 = vmul.f32 0.03125, %v1650_v25 }
 0xa53   :  { %v1673_v51 = vadd.f32 1e-05, %v1665_v59  ;;  %v1664_v33 = vsub.f32 %v1656_v32, %v1660_v16 }
 0xa55   :  { %4133 = vrsqrt.f32 %v1673_v51  ;;  %v1672_v34 = vadd.f32 1e-05, %v1664_v33 }
 0xa57   :  { %4135 = vrsqrt.f32 %v1672_v34 }
 0xa5a   :  { %v4130_v42 = vpop.eup %4129 }
 0xa5b   :  { %v1679_v49 = vmul.f32 %v4130_v42, %v1667_v0  ;;  %v5509_v42 = vunpack.i.l.bf16 %v4690_v58 }
 0xa5c   :  { %v4132_v11 = vpop.eup %4131 }
 0xa5d   :  { %v1678_v4 = vmul.f32 %v4132_v11, %v1666_v3  ;;  %v1687_v52 = vmul.f32 %v3328_v18, %v1679_v49 }
 0xa5f   :  { %v1686_v38 = vmul.f32 %v3328_v18, %v1678_v4  ;;  %v5055_v28 = vadd.f32 %v3329_v22, %v1687_v52  ;;  %v5513_v52 = vunpack.i.h.bf16 %v4681_v48 }
 0xa61   :  { %v5053_v21 = vadd.f32 %v3329_v22, %v1686_v38 }
 0xa62   :  { %v4134_v30 = vpop.eup %4133 }
 0xa63   :  { %3816 = vmatprep.mubr.msk.f32.mxu0 %vm403_vm4, %v5053_v21  ;;  %v1681_v29 = vmul.f32 %v4134_v30, %v1669_v14 }
 0xa64   :  { %v4136_v15 = vpop.eup %4135  ;;  %3817 = vmatmul.mubr.msk.f32.vlgmr.msra.gmra.mxu0 %vm403_vm4, %v5055_v28 }
 0xa65   :  { %v1680_v17 = vmul.f32 %v4136_v15, %v1668_v6  ;;  %v1689_v23 = vmul.f32 %v3328_v18, %v1681_v29 }
 0xa67   :  { %v1688_v10 = vmul.f32 %v3328_v18, %v1680_v17  ;;  %v5064_v44 = vadd.f32 %v3329_v22, %v1689_v23  ;;  %v5511_v18 = vunpack.i.h.bf16 %v4690_v58 }
 0xa69   :  { %v5062_v47 = vadd.f32 %v3329_v22, %v1688_v10 }
 0xa6b   :  { %3819 = vmatprep.mubr.msk.f32.mxu0 %vm403_vm4, %v5062_v47 }
 0xa6c   :  { %3820 = vmatmul.mubr.msk.f32.gmra.mxu0 %vm403_vm4, %v5064_v44 }
 0xb24   :  { %v3818_v39 = vpop.f32.mrf.mxu0 }
 0xb25   :  { %v5076_v7 = vadd.f32 %v3818_v39, %v3330_v55 }
 0xb26   :  { %v1785_v40 = vpop.f32.mrf.mxu0 }
 0xb27   :  { %v5070_v63 = vadd.f32 %v3330_v55, %v1785_v40  ;;  %v1817_v32 = vmul.f32 %v5076_v7, %v4527_v60  ;;  %v1829_v3 = vmul.f32 %v5509_v42, %v5076_v7 }
 0xb29   :  { %3854 = vmatprep.mubr.msk.f32.mxu0 %vm403_vm4, %v5070_v63  ;;  %v1828_v11 = vmul.f32 %v5511_v18, %v5070_v63 }
 0xb2c   :  { %v3821_v54 = vpop.f32.mrf.mxu0 }
 0xb2d   :  { %v5074_v46 = vadd.f32 %v3821_v54, %v3330_v55 }
 0xb2e   :  { %v1795_v56 = vpop.f32.mrf.mxu0 }
 0xb2f   :  { %v5078_v25 = vadd.f32 %v3330_v55, %v1795_v56  ;;  %v1819_v16 = vmul.f32 %v5074_v46, %v4525_v35  ;;  %v1815_v51 = vmul.f32 %v5074_v46, %v4533_v1  ;;  %v1816_v35 = vmul.f32 %v5070_v63, %v4531_v62 }
 0xb30   :  { %v1811_v1 = vmul.f32 %v5074_v46, %v4562_v37  ;;  %v1812_v62 = vmul.f32 %v5070_v63, %v4554_v27  ;;  %v1807_v37 = vmul.f32 %v5074_v46, %v4588_v2  ;;  %v1808_v27 = vmul.f32 %v5070_v63, %v4580_v57 }
 0xb31   :  { %1882 = vrot.lane.b32.xlu1 %v1819_v16, %s4297_s28  ;;  %v1818_v59 = vmul.f32 %v5078_v25, %v4529_v61  ;;  %v1813_v61 = vmul.f32 %v5076_v7, %v4549_v24  ;;  %v1814_v60 = vmul.f32 %v5078_v25, %v4537_v5  ;;  %v1809_v24 = vmul.f32 %v5076_v7, %v4575_v53 }
 0xb32   :  { %v1810_v5 = vmul.f32 %v5078_v25, %v4567_v50  ;;  %v1805_v53 = vmul.f32 %v5076_v7, %v4601_v26  ;;  %v1806_v50 = vmul.f32 %v5078_v25, %v4593_v12  ;;  %v5506_v2 = vunpack.i.l.bf16 %v4668_v43 }
 0xb33   :  { %1880 = vrot.lane.b32.xlu0 %v1818_v59, %s4297_s28  ;;  %v1804_v57 = vmul.f32 %v5070_v63, %v4606_v36  ;;  %v5507_v26 = vunpack.i.h.bf16 %v4664_v41  ;;  %v5508_v12 = vunpack.i.l.bf16 %v4664_v41  ;;  %v5510_v36 = vunpack.i.l.bf16 %v4681_v48 }
 0xb34   :  { %v1835_v33 = vmul.f32 %v5506_v2, %v5074_v46  ;;  %v5512_v41 = vunpack.i.h.bf16 %v4668_v43  ;;  %v1830_v22 = vmul.f32 %v5513_v52, %v5078_v25 }
 0xb35   :  { %1878 = vrot.lane.b32.xlu1 %v1817_v32, %s4297_s28  ;;  %v1832_v34 = vmul.f32 %v5507_v26, %v5070_v63  ;;  %v1833_v0 = vmul.f32 %v5508_v12, %v5076_v7  ;;  %v1831_v49 = vmul.f32 %v5510_v36, %v5074_v46 }
 0xb36   :  { %v1834_v4 = vmul.f32 %v5512_v41, %v5078_v25 }
 0xb37   :  { %1874 = vrot.lane.b32.xlu0 %v1815_v51, %s4297_s28 }
 0xb39   :  { %1876 = vrot.lane.b32.xlu1 %v1816_v35, %s4297_s28 }
 0xb3b   :  { %1870 = vrot.lane.b32.xlu0 %v1813_v61, %s4297_s28 }
 0xb3d   :  { %1872 = vrot.lane.b32.xlu1 %v1814_v60, %s4297_s28 }
 0xb3f   :  { %1866 = vrot.lane.b32.xlu0 %v1811_v1, %s4297_s28 }
 0xb41   :  { %1868 = vrot.lane.b32.xlu1 %v1812_v62, %s4297_s28 }
 0xb43   :  { %1862 = vrot.lane.b32.xlu0 %v1809_v24, %s4297_s28 }
 0xb45   :  { %1864 = vrot.lane.b32.xlu1 %v1810_v5, %s4297_s28 }
 0xb47   :  { %1858 = vrot.lane.b32.xlu0 %v1807_v37, %s4297_s28 }
 0xb49   :  { %1860 = vrot.lane.b32.xlu1 %v1808_v27, %s4297_s28 }
 0xb4b   :  { %1854 = vrot.lane.b32.xlu0 %v1805_v53, %s4297_s28 }
 0xb4d   :  { %1856 = vrot.lane.b32.xlu1 %v1806_v50, %s4297_s28 }
 0xb4f   :  { %2295 = vrot.lane.b32.xlu0 %v1835_v33, %s4298_s29 }
 0xb51   :  { %1852 = vrot.lane.b32.xlu1 %v1804_v57, %s4297_s28 }
 0xb53   :  { %2289 = vrot.lane.b32.xlu0 %v1832_v34, %s4298_s29 }
 0xb55   :  { %2291 = vrot.lane.b32.xlu1 %v1833_v0, %s4298_s29 }
 0xb57   :  { %2283 = vrot.lane.b32.xlu0 %v1829_v3, %s4298_s29 }
 0xb59   :  { %2287 = vrot.lane.b32.xlu1 %v1831_v49, %s4298_s29 }
 0xb5b   :  { %2281 = vrot.lane.b32.xlu0 %v1828_v11, %s4298_s29 }
 0xb5f   :  { %2293 = vrot.lane.b32.xlu0 %v1834_v4, %s4298_s29 }
 0xb63   :  { %2285 = vrot.lane.b32.xlu0 %v1830_v22, %s4298_s29 }
 0xba3   :  { %v1883_v38 = vpop.permute.xlu1 %1882 }
 0xba4   :  { %3822 = vmatprep.subr.msk.mxu0 %vm403_vm4, %v1883_v38 }
 0xba5   :  { %3823 = vmatpush3.xpose.msk.msra.mxu0 %vm403_vm4, %v1883_v38  ;;  %v1881_v58 = vpop.permute.xlu0 %1880 }
 0xba6   :  { %3824 = vmatprep.subr.msk.mxu0 %vm403_vm4, %v1881_v58 }
 0xba7   :  { %v1879_v14 = vpop.permute.xlu1 %1878 }
 0xba9   :  { %3825 = vmatpush3.xpose.msk.msra.mxu0 %vm403_vm4, %v1881_v58  ;;  %v1875_v43 = vpop.permute.xlu0 %1874 }
 0xbaa   :  { %3826 = vmatprep.subr.msk.mxu0 %vm403_vm4, %v1879_v14 }
 0xbab   :  { %v1877_v30 = vpop.permute.xlu1 %1876 }
 0xbad   :  { %3827 = vmatpush3.xpose.msk.msra.mxu0 %vm403_vm4, %v1879_v14  ;;  %v1871_v48 = vpop.permute.xlu0 %1870 }
 0xbae   :  { %3828 = vmatprep.subr.msk.mxu0 %vm403_vm4, %v1877_v30 }
 0xbaf   :  { %v1873_v6 = vpop.permute.xlu1 %1872 }
 0xbb1   :  { %3829 = vmatpush3.xpose.msk.msra.mxu0 %vm403_vm4, %v1877_v30  ;;  %v1867_v29 = vpop.permute.xlu0 %1866 }
 0xbb2   :  { %3830 = vmatprep.subr.msk.mxu0 %vm403_vm4, %v1875_v43 }
 0xbb3   :  { %v1869_v15 = vpop.permute.xlu1 %1868 }
 0xbb5   :  { %3831 = vmatpush3.xpose.msk.msra.mxu0 %vm403_vm4, %v1875_v43  ;;  %v1863_v17 = vpop.permute.xlu0 %1862 }
 0xbb6   :  { %3832 = vmatprep.subr.msk.mxu0 %vm403_vm4, %v1873_v6 }
 0xbb7   :  { %v1865_v23 = vpop.permute.xlu1 %1864 }
 0xbb9   :  { %v1859_v10 = vpop.permute.xlu0 %1858  ;;  %3833 = vmatpush3.xpose.msk.msra.mxu0 %vm403_vm4, %v1873_v6 }
 0xbba   :  { %3834 = vmatprep.subr.msk.mxu0 %vm403_vm4, %v1871_v48 }
 0xbbb   :  { %v1861_v55 = vpop.permute.xlu1 %1860 }
 0xbbd   :  { %v1855_v39 = vpop.permute.xlu0 %1854  ;;  %3835 = vmatpush3.xpose.msk.msra.mxu0 %vm403_vm4, %v1871_v48 }
 0xbbe   :  { %3836 = vmatprep.subr.msk.mxu0 %vm403_vm4, %v1869_v15 }
 0xbbf   :  { %v1857_v54 = vpop.permute.xlu1 %1856 }
 0xbc1   :  { %v2296_v40 = vpop.permute.xlu0 %2295  ;;  %3837 = vmatpush3.xpose.msk.msra.mxu0 %vm403_vm4, %v1869_v15 }
 0xbc2   :  { %3838 = vmatprep.subr.msk.mxu0 %vm403_vm4, %v1867_v29  ;;  %3860 = vmatprep.subr.mxu1 %v2296_v40 }
 0xbc3   :  { %3861 = vmatpush3.msra.mxu1 %v2296_v40  ;;  %v1853_v59 = vpop.permute.xlu1 %1852 }
 0xbc5   :  { %v2290_v56 = vpop.permute.xlu0 %2289  ;;  %3839 = vmatpush3.xpose.msk.msra.mxu0 %vm403_vm4, %v1867_v29 }
 0xbc6   :  { %3840 = vmatprep.subr.msk.mxu0 %vm403_vm4, %v1865_v23 }
 0xbc7   :  { %v2292_v51 = vpop.permute.xlu1 %2291 }
 0xbc9   :  { %v2284_v16 = vpop.permute.xlu0 %2283  ;;  %3841 = vmatpush3.xpose.msk.msra.mxu0 %vm403_vm4, %v1865_v23 }
 0xbca   :  { %3842 = vmatprep.subr.msk.mxu0 %vm403_vm4, %v1863_v17 }
 0xbcb   :  { %v2288_v61 = vpop.permute.xlu1 %2287 }
 0xbcd   :  { %v2282_v32 = vpop.permute.xlu0 %2281  ;;  %3843 = vmatpush3.xpose.msk.msra.mxu0 %vm403_vm4, %v1863_v17 }
 0xbce   :  { %3844 = vmatprep.subr.msk.mxu0 %vm403_vm4, %v1861_v55 }
 0xbd1   :  { %v2294_v35 = vpop.permute.xlu0 %2293  ;;  %3845 = vmatpush3.xpose.msk.msra.mxu0 %vm403_vm4, %v1861_v55 }
 0xbd2   :  { %3846 = vmatprep.subr.msk.mxu0 %vm403_vm4, %v1859_v10  ;;  %3862 = vmatprep.subr.mxu1 %v2294_v35 }
 0xbd3   :  { %3863 = vmatpush3.msra.mxu1 %v2294_v35 }
 0xbd4   :  { %3864 = vmatprep.subr.mxu1 %v2292_v51 }
 0xbd5   :  { %3847 = vmatpush3.xpose.msk.msra.mxu0 %vm403_vm4, %v1859_v10  ;;  %3865 = vmatpush3.msra.mxu1 %v2292_v51  ;;  %v2286_v60 = vpop.permute.xlu0 %2285 }
 0xbd6   :  { %3848 = vmatprep.subr.msk.mxu0 %vm403_vm4, %v1857_v54  ;;  %3866 = vmatprep.subr.mxu1 %v2290_v56 }
 0xbd7   :  { %3867 = vmatpush3.msra.mxu1 %v2290_v56 }
 0xbd8   :  { %3868 = vmatprep.subr.mxu1 %v2288_v61 }
 0xbd9   :  { %3849 = vmatpush3.xpose.msk.msra.mxu0 %vm403_vm4, %v1857_v54  ;;  %3869 = vmatpush3.msra.mxu1 %v2288_v61 }
 0xbda   :  { %3850 = vmatprep.subr.msk.mxu0 %vm403_vm4, %v1855_v39  ;;  %3870 = vmatprep.subr.mxu1 %v2286_v60 }
 0xbdb   :  { %3871 = vmatpush3.msra.mxu1 %v2286_v60 }
 0xbdc   :  { %3872 = vmatprep.subr.mxu1 %v2284_v16 }
 0xbdd   :  { %3851 = vmatpush3.xpose.msk.msra.mxu0 %vm403_vm4, %v1855_v39  ;;  %3873 = vmatpush3.msra.mxu1 %v2284_v16 }
 0xbde   :  { %3852 = vmatprep.subr.msk.mxu0 %vm403_vm4, %v1853_v59  ;;  %3874 = vmatprep.subr.mxu1 %v2282_v32 }
 0xbdf   :  { %3875 = vmatpush3.msra.mxu1 %v2282_v32 }
 0xbe1   :  { %3853 = vmatpush3.xpose.msk.msra.mxu0 %vm403_vm4, %v1853_v59 }
 0xbe4   :  { %3855 = vmatmul.mubr.msk.f32.vlgmr.msra.gmra.mxu0 %vm403_vm4, %v5076_v7 }
 0xbe5   :  { %3857 = vmatprep.mubr.msk.f32.mxu0 %vm403_vm4, %v5078_v25 }
 0xbe8   :  { %3858 = vmatmul.mubr.msk.f32.gmra.mxu0 %vm403_vm4, %v5074_v46 }
 0xca4   :  { %v3856_v1 = vpop.f32.mrf.mxu0 }
 0xca5   :  { %v5199_v62 = vadd.f32 %v3856_v1, %v4746_v20 }
 0xca6   :  { %v1994_v24 = vpop.f32.mrf.mxu0 }
 0xca7   :  { %v5202_v5 = vadd.f32 %v1994_v24, %v4749_v31  ;;  %v2120_v37 = vsel %vm927_vm11, %v5199_v62, -inf  ;;  %v2060_v27 = vsel %vm866_vm10, %v5199_v62, -inf  ;;  %v2180_v50 = vsel %vm988_vm13, %v5199_v62, -inf }
 0xca8   :  { %2121 = vmax.xlane.f32.xlu0 %v2120_v37  ;;  %2061 = vmax.xlane.f32.xlu1 %v2060_v27  ;;  %v3859_v53 = vpop.f32.mrf.mxu0  ;;  %v2016_v33 = vsel %vm403_vm4, %v5199_v62, -inf }
 0xca9   :  { %v2177_v20 = vsel %vm988_vm13, %v5202_v5, -inf  ;;  %v2013_v57 = vsel %vm403_vm4, %v5202_v5, -inf  ;;  %v2057_v26 = vsel %vm866_vm10, %v5202_v5, -inf  ;;  %v5224_v12 = vadd.f32 %v3859_v53, %v4781_v45 }
 0xcaa   :  { %v2004_v2 = vpop.f32.mrf.mxu0 }
 0xcab   :  { %v5213_v31 = vadd.f32 %v2004_v2, %v4767_v19  ;;  %v2117_v19 = vsel %vm927_vm11, %v5202_v5, -inf  ;;  %v2066_v42 = vsel %vm866_vm10, %v5224_v12, -inf  ;;  %v2126_v45 = vsel %vm927_vm11, %v5224_v12, -inf }
 0xcac   :  { %2181 = vmax.xlane.f32.xlu0 %v2180_v50  ;;  %2178 = vmax.xlane.f32.xlu1 %v2177_v20  ;;  %v2186_v49 = vsel %vm988_vm13, %v5224_v12, -inf  ;;  %v2022_v18 = vsel %vm403_vm4, %v5224_v12, -inf }
 0xcad   :  { %v2063_v34 = vsel %vm866_vm10, %v5213_v31, -inf  ;;  %v2123_v0 = vsel %vm927_vm11, %v5213_v31, -inf  ;;  %v2183_v3 = vsel %vm988_vm13, %v5213_v31, -inf  ;;  %v2019_v36 = vsel %vm403_vm4, %v5213_v31, -inf }
 0xcb0   :  { %2017 = vmax.xlane.f32.xlu0 %v2016_v33  ;;  %2014 = vmax.xlane.f32.xlu1 %v2013_v57 }
 0xcb4   :  { %2058 = vmax.xlane.f32.xlu0 %v2057_v26  ;;  %2064 = vmax.xlane.f32.xlu1 %v2063_v34 }
 0xcb8   :  { %2118 = vmax.xlane.f32.xlu0 %v2117_v19  ;;  %2124 = vmax.xlane.f32.xlu1 %v2123_v0 }
 0xcbc   :  { %2067 = vmax.xlane.f32.xlu0 %v2066_v42  ;;  %2184 = vmax.xlane.f32.xlu1 %v2183_v3 }
 0xcc0   :  { %2127 = vmax.xlane.f32.xlu0 %v2126_v45  ;;  %2020 = vmax.xlane.f32.xlu1 %v2019_v36 }
 0xcc4   :  { %2187 = vmax.xlane.f32.xlu0 %v2186_v49 }
 0xcc8   :  { %2023 = vmax.xlane.f32.xlu0 %v2022_v18 }
 0xd31   :  { %v2122_v11 = vpop.xlane.xlu0 %2121  ;;  %v2062_v41 = vpop.xlane.xlu1 %2061 }
 0xd32   :  { %v2130_v4 = vsub.f32 %v5199_v62, %v2122_v11  ;;  %v2070_v52 = vsub.f32 %v5199_v62, %v2062_v41 }
 0xd34   :  { %v2135_v22 = vmul.f32 1.442695, %v2130_v4  ;;  %v2075_v38 = vmul.f32 1.442695, %v2070_v52 }
 0xd35   :  { %v2182_v58 = vpop.xlane.xlu0 %2181  ;;  %v2179_v14 = vpop.xlane.xlu1 %2178 }
 0xd36   :  { %4137 = vpow2.f32 %v2135_v22  ;;  %v2190_v43 = vsub.f32 %v5199_v62, %v2182_v58  ;;  %v2189_v30 = vsub.f32 %v5202_v5, %v2179_v14  ;;  %v5514_v58 = vunpack.i.l.bf16 %v4733_v8 }
 0xd37   :  { %4139 = vpow2.f32 %v2075_v38 }
 0xd38   :  { %v2195_v48 = vmul.f32 1.442695, %v2190_v43  ;;  %v2193_v6 = vmul.f32 1.442695, %v2189_v30  ;;  %v1827_v14 = vmul.f32 %v5514_v58, %v5074_v46  ;;  %v5515_v30 = vunpack.i.l.bf16 %v4737_v13 }
 0xd39   :  { %v2015_v10 = vpop.xlane.xlu1 %2014  ;;  %v2018_v55 = vpop.xlane.xlu0 %2017 }
 0xd3a   :  { %4141 = vpow2.f32 %v2195_v48  ;;  %v2025_v39 = vsub.f32 %v5202_v5, %v2015_v10  ;;  %v2026_v40 = vsub.f32 %v5199_v62, %v2018_v55  ;;  %v1825_v48 = vmul.f32 %v5515_v30, %v5076_v7 }
 0xd3b   :  { %4143 = vpow2.f32 %v2193_v6  ;;  %v5516_v6 = vunpack.i.l.bf16 %v4735_v9 }
 0xd3c   :  { %v2029_v54 = vmul.f32 1.442695, %v2025_v39  ;;  %v2031_v56 = vmul.f32 1.442695, %v2026_v40 }
 0xd3d   :  { %v2059_v16 = vpop.xlane.xlu0 %2058  ;;  %v2065_v59 = vpop.xlane.xlu1 %2064  ;;  %v1823_v10 = vmul.f32 %v5516_v6, %v5074_v46 }
 0xd3e   :  { %4145 = vpow2.f32 %v2029_v54  ;;  %v2069_v35 = vsub.f32 %v5202_v5, %v2059_v16  ;;  %v2071_v24 = vsub.f32 %v5213_v31, %v2065_v59 }
 0xd3f   :  { %4147 = vpow2.f32 %v2031_v56 }
 0xd40   :  { %v2073_v37 = vmul.f32 1.442695, %v2069_v35  ;;  %v2077_v50 = vmul.f32 1.442695, %v2071_v24  ;;  %v5519_v24 = vunpack.i.h.bf16 %v4735_v9 }
 0xd41   :  { %v2119_v32 = vpop.xlane.xlu0 %2118  ;;  %v2125_v61 = vpop.xlane.xlu1 %2124 }
 0xd42   :  { %v2129_v27 = vsub.f32 %v5202_v5, %v2119_v32  ;;  %v2131_v20 = vsub.f32 %v5213_v31, %v2125_v61  ;;  %4149 = vpow2.f32 %v2073_v37  ;;  %v5518_v61 = vunpack.i.h.bf16 %v4737_v13 }
 0xd43   :  { %v5246_v29 = vpop.eup %4137  ;;  %4151 = vpow2.f32 %v2077_v50 }
 0xd44   :  { %v5248_v15 = vpop.eup %4139  ;;  %2147 = vrot.lane.b32.xlu1 %v5246_v29, %s4298_s29  ;;  %v2133_v57 = vmul.f32 1.442695, %v2129_v27  ;;  %v2137_v34 = vmul.f32 1.442695, %v2131_v20 }
 0xd45   :  { %2087 = vrot.lane.b32.xlu0 %v5248_v15, %s4297_s28  ;;  %v2068_v62 = vpop.xlane.xlu0 %2067  ;;  %v2185_v2 = vpop.xlane.xlu1 %2184 }
 0xd46   :  { %v2072_v26 = vsub.f32 %v5224_v12, %v2068_v62  ;;  %v2191_v19 = vsub.f32 %v5213_v31, %v2185_v2  ;;  %4153 = vpow2.f32 %v2133_v57  ;;  %v1822_v62 = vmul.f32 %v5519_v24, %v5078_v25 }
 0xd47   :  { %v5254_v17 = vpop.eup %4141  ;;  %4155 = vpow2.f32 %v2137_v34 }
 0xd48   :  { %v5256_v23 = vpop.eup %4143  ;;  %2207 = vrot.lane.b32.xlu1 %v5254_v17, %s4296_s27  ;;  %v2079_v0 = vmul.f32 1.442695, %v2072_v26  ;;  %v2197_v42 = vmul.f32 1.442695, %v2191_v19 }
 0xd49   :  { %2205 = vrot.lane.b32.xlu0 %v5256_v23, %s4296_s27  ;;  %v2128_v33 = vpop.xlane.xlu0 %2127  ;;  %v2021_v39 = vpop.xlane.xlu1 %2020 }
 0xd4a   :  { %v2132_v5 = vsub.f32 %v5224_v12, %v2128_v33  ;;  %4157 = vpow2.f32 %v2079_v0  ;;  %v2027_v40 = vsub.f32 %v5213_v31, %v2021_v39  ;;  %v5517_v31 = vunpack.i.h.bf16 %v4733_v8 }
 0xd4b   :  { %v5264_v51 = vpop.eup %4145  ;;  %4159 = vpow2.f32 %v2197_v42 }
 0xd4c   :  { %v2037_v60 = vsel %vm403_vm4, %v5264_v51, 0.0  ;;  %v5269_v1 = vpop.eup %4147  ;;  %v2139_v45 = vmul.f32 1.442695, %v2132_v5  ;;  %v2033_v56 = vmul.f32 1.442695, %v2027_v40 }
 0xd4d   :  { %v2040_v53 = vsel %vm403_vm4, %v5269_v1, 0.0  ;;  %v2188_v3 = vpop.xlane.xlu0 %2187 }
 0xd4e   :  { %v2192_v36 = vsub.f32 %v5224_v12, %v2188_v3  ;;  %4161 = vpow2.f32 %v2139_v45 }
 0xd4f   :  { %v5280_v18 = vpop.eup %4149 }
 0xd50   :  { %v2199_v49 = vmul.f32 1.442695, %v2192_v36  ;;  %v5282_v11 = vpop.eup %4151 }
 0xd51   :  { %v2024_v55 = vpop.xlane.xlu0 %2023 }
 0xd52   :  { %4163 = vpow2.f32 %v2199_v49  ;;  %v2028_v54 = vsub.f32 %v5224_v12, %v2024_v55  ;;  %v1826_v12 = vmul.f32 %v5517_v31, %v5078_v25 }
 0xd53   :  { %v5288_v41 = vpop.eup %4153  ;;  %4165 = vpow2.f32 %v2033_v56 }
 0xd54   :  { %v5290_v4 = vpop.eup %4155  ;;  %v2035_v16 = vmul.f32 1.442695, %v2028_v54 }
 0xd56   :  { %4167 = vpow2.f32 %v2035_v16 }
 0xd57   :  { %v5296_v52 = vpop.eup %4157 }
 0xd58   :  { %v5298_v22 = vpop.eup %4159 }
 0xd5b   :  { %v5304_v38 = vpop.eup %4161 }
 0xd5f   :  { %v5312_v43 = vpop.eup %4163 }
 0xd60   :  { %v5326_v59 = vpop.eup %4165 }
 0xd61   :  { %v2043_v35 = vsel %vm403_vm4, %v5326_v59, 0.0 }
 0xd63   :  { %v5328_v32 = vpop.eup %4167 }
 0xd64   :  { %v2046_v46 = vsel %vm403_vm4, %v5328_v32, 0.0 }
 0xd68   :  { %2038 = vadd.xlane.f32.xlu0 %v2037_v60  ;;  %v1824_v60 = vmul.f32 %v5518_v61, %v5070_v63 }
 0xd6c   :  { %2041 = vadd.xlane.f32.xlu1 %v2040_v53 }
 0xd7d   :  { %2085 = vrot.lane.b32.xlu1 %v5280_v18, %s4297_s28 }
 0xd7e   :  { %2089 = vrot.lane.b32.xlu0 %v5282_v11, %s4297_s28 }
 0xd81   :  { %2145 = vrot.lane.b32.xlu1 %v5288_v41, %s4298_s29 }
 0xd82   :  { %2149 = vrot.lane.b32.xlu0 %v5290_v4, %s4298_s29 }
 0xd85   :  { %2091 = vrot.lane.b32.xlu1 %v5296_v52, %s4297_s28 }
 0xd86   :  { %2209 = vrot.lane.b32.xlu0 %v5298_v22, %s4296_s27 }
 0xd89   :  { %2151 = vrot.lane.b32.xlu1 %v5304_v38, %s4298_s29 }
 0xd8a   :  { %2279 = vrot.lane.b32.xlu0 %v1827_v14, %s4298_s29 }
 0xd8d   :  { %2211 = vrot.lane.b32.xlu1 %v5312_v43, %s4296_s27 }
 0xd8e   :  { %2275 = vrot.lane.b32.xlu0 %v1825_v48, %s4298_s29 }
 0xd92   :  { %2271 = vrot.lane.b32.xlu0 %v1823_v10, %s4298_s29  ;;  %v5520_v10 = vld [vmem:[#allocation11_spill] sm:$0xff] }
 0xd93   :  { %v5521_v39 = vunpack.i.h.bf16 %v5520_v10  ;;  %v5522_v40 = vunpack.i.l.bf16 %v5520_v10 }
 0xd95   :  { %v1820_v55 = vmul.f32 %v5521_v39, %v5070_v63  ;;  %v1821_v54 = vmul.f32 %v5522_v40, %v5076_v7 }
 0xdb1   :  { %2044 = vadd.xlane.f32.xlu0 %v2043_v35  ;;  %2047 = vadd.xlane.f32.xlu1 %v2046_v46 }
 0xdb6   :  { %v2148_v27 = vpop.permute.xlu1 %2147 }
 0xdb7   :  { %v2088_v37 = vpop.permute.xlu0 %2087  ;;  %v2160_v50 = vsel %vm403_vm4, %v2148_v27, 0.0 }
 0xdb8   :  { %v2100_v53 = vsel %vm403_vm4, %v2088_v37, 0.0 }
 0xdba   :  { %v2208_v20 = vpop.permute.xlu1 %2207 }
 0xdbb   :  { %v2206_v8 = vpop.permute.xlu0 %2205  ;;  %v2220_v13 = vsel %vm403_vm4, %v2208_v20, 0.0 }
 0xdbc   :  { %v2217_v3 = vsel %vm403_vm4, %v2206_v8, 0.0 }
 0xdc2   :  { %2277 = vrot.lane.b32.xlu1 %v1826_v12, %s4298_s29 }
 0xdc6   :  { %2273 = vrot.lane.b32.xlu1 %v1824_v60, %s4298_s29 }
 0xdca   :  { %2269 = vrot.lane.b32.xlu1 %v1822_v62, %s4298_s29 }
 0xdee   :  { %2101 = vadd.xlane.f32.xlu1 %v2100_v53 }
 0xdf1   :  { %v2039_v2 = vpop.xlane.xlu0 %2038 }
 0xdf2   :  { %2161 = vadd.xlane.f32.xlu1 %v2160_v50  ;;  %4169 = vrcp.f32 %v2039_v2 }
 0xdf5   :  { %v2090_v33 = vpop.permute.xlu0 %2089  ;;  %v2042_v57 = vpop.xlane.xlu1 %2041 }
 0xdf6   :  { %2221 = vadd.xlane.f32.xlu1 %v2220_v13  ;;  %v2103_v48 = vsel %vm403_vm4, %v2090_v33, 0.0 }
 0xdf9   :  { %v2150_v9 = vpop.permute.xlu0 %2149  ;;  %v2086_v25 = vpop.permute.xlu1 %2085 }
 0xdfa   :  { %v2097_v26 = vsel %vm403_vm4, %v2086_v25, 0.0  ;;  %v2163_v30 = vsel %vm403_vm4, %v2150_v9, 0.0 }
 0xdfb   :  { %2098 = vadd.xlane.f32.xlu1 %v2097_v26 }
 0xdfd   :  { %v2210_v34 = vpop.permute.xlu0 %2209  ;;  %v2146_v19 = vpop.permute.xlu1 %2145 }
 0xdfe   :  { %v2157_v0 = vsel %vm403_vm4, %v2146_v19, 0.0  ;;  %v2223_v6 = vsel %vm403_vm4, %v2210_v34, 0.0 }
 0xdff   :  { %2158 = vadd.xlane.f32.xlu1 %v2157_v0  ;;  %v4170_v8 = vpop.eup %4169 }
 0xe01   :  { %v2280_v5 = vpop.permute.xlu0 %2279  ;;  %v2092_v42 = vpop.permute.xlu1 %2091 }
 0xe02   :  { %3876 = vmatprep.subr.mxu1 %v2280_v5  ;;  %v2106_v45 = vsel %vm403_vm4, %v2092_v42, 0.0 }
 0xe03   :  { %3877 = vmatpush3.msra.mxu1 %v2280_v5  ;;  %2218 = vadd.xlane.f32.xlu1 %v2217_v3  ;;  %v2053_v5 = vmul.f32 %v4170_v8, %v5264_v51 }
 0xe04   :  { %2107 = vadd.xlane.f32.xlu0 %v2106_v45 }
 0xe05   :  { %v2152_v36 = vpop.permute.xlu1 %2151  ;;  %v2276_v16 = vpop.permute.xlu0 %2275 }
 0xe06   :  { %v2166_v49 = vsel %vm403_vm4, %v2152_v36, 0.0 }
 0xe08   :  { %2167 = vadd.xlane.f32.xlu0 %v2166_v49 }
 0xe09   :  { %v2212_v58 = vpop.permute.xlu1 %2211  ;;  %v2272_v31 = vpop.permute.xlu0 %2271 }
 0xe0a   :  { %v2226_v14 = vsel %vm403_vm4, %v2212_v58, 0.0 }
 0xe0b   :  { %2227 = vadd.xlane.f32.xlu1 %v2226_v14 }
 0xe0c   :  { %2164 = vadd.xlane.f32.xlu0 %v2163_v30 }
 0xe0f   :  { %2104 = vadd.xlane.f32.xlu1 %v2103_v48 }
 0xe10   :  { %2224 = vadd.xlane.f32.xlu0 %v2223_v6 }
 0xe20   :  { %2265 = vrot.lane.b32.xlu1 %v1820_v55, %s4298_s29 }
 0xe26   :  { %2267 = vrot.lane.b32.xlu0 %v1821_v54, %s4298_s29 }
 0xe3a   :  { %v2048_v56 = vpop.xlane.xlu1 %2047  ;;  %v2045_v62 = vpop.xlane.xlu0 %2044 }
 0xe3e   :  { %v2278_v35 = vpop.permute.xlu1 %2277 }
 0xe3f   :  { %3878 = vmatprep.subr.mxu1 %v2278_v35 }
 0xe40   :  { %3879 = vmatpush3.msra.mxu1 %v2278_v35 }
 0xe41   :  { %3880 = vmatprep.subr.mxu1 %v2276_v16 }
 0xe42   :  { %3881 = vmatpush3.msra.mxu1 %v2276_v16  ;;  %v2274_v46 = vpop.permute.xlu1 %2273 }
 0xe43   :  { %3882 = vmatprep.subr.mxu1 %v2274_v46 }
 0xe44   :  { %3883 = vmatpush3.msra.mxu1 %v2274_v46 }
 0xe45   :  { %3884 = vmatprep.subr.mxu1 %v2272_v31 }
 0xe46   :  { %3885 = vmatpush3.msra.mxu1 %v2272_v31  ;;  %v2270_v63 = vpop.permute.xlu1 %2269 }
 0xe47   :  { %3886 = vmatprep.subr.mxu1 %v2270_v63 }
 0xe48   :  { %3887 = vmatpush3.msra.mxu1 %v2270_v63 }
 0xe77   :  { %v2102_v12 = vpop.xlane.xlu1 %2101 }
 0xe7b   :  { %v2162_v7 = vpop.xlane.xlu1 %2161 }
 0xe7f   :  { %v2222_v61 = vpop.xlane.xlu1 %2221 }
 0xe84   :  { %v2099_v60 = vpop.xlane.xlu1 %2098 }
 0xe85   :  { %4171 = vrcp.f32 %v2099_v60 }
 0xe86   :  { %4173 = vrcp.f32 %v2042_v57 }
 0xe88   :  { %v2159_v24 = vpop.xlane.xlu1 %2158 }
 0xe89   :  { %4175 = vrcp.f32 %v2159_v24 }
 0xe8a   :  { %4177 = vrcp.f32 %v2102_v12 }
 0xe8b   :  { %4179 = vrcp.f32 %v2162_v7 }
 0xe8c   :  { %4181 = vrcp.f32 %v2222_v61  ;;  %v2219_v37 = vpop.xlane.xlu1 %2218 }
 0xe8d   :  { %v2108_v27 = vpop.xlane.xlu0 %2107  ;;  %4183 = vrcp.f32 %v2219_v37 }
 0xe8e   :  { %4185 = vrcp.f32 %v2045_v62 }
 0xe8f   :  { %4187 = vrcp.f32 %v2048_v56 }
 0xe90   :  { %4189 = vrcp.f32 %v2108_v27  ;;  %v3355_v27 = vld [vmem:[#allocation5 + $0xb] ss:$0 sm:$0xff] }
 0xe91   :  { %v2168_v53 = vpop.xlane.xlu0 %2167 }
 0xe92   :  { %v4172_v50 = vpop.eup %4171  ;;  %4191 = vrcp.f32 %v2168_v53 }
 0xe93   :  { %v4174_v13 = vpop.eup %4173  ;;  %v2113_v9 = vmul.f32 %v4172_v50, %v5280_v18 }
 0xe94   :  { %v2228_v20 = vpop.xlane.xlu1 %2227  ;;  %v2054_v58 = vmul.f32 %v4174_v13, %v5269_v1  ;;  %v2400_v1 = vld [vmem:[#allocation2 + $0x1d0] sm:$0xff] }
 0xe95   :  { %v2165_v2 = vpop.xlane.xlu0 %2164  ;;  %4193 = vrcp.f32 %v2228_v20  ;;  %v2237_v36 = vsel %vm403_vm4, %v2053_v5, %v2113_v9 }
 0xe96   :  { %v4176_v33 = vpop.eup %4175  ;;  %4195 = vrcp.f32 %v2165_v2 }
 0xe97   :  { %v4178_v57 = vpop.eup %4177  ;;  %v2173_v34 = vmul.f32 %v4176_v33, %v5288_v41 }
 0xe98   :  { %v4180_v25 = vpop.eup %4179  ;;  %v2105_v26 = vpop.xlane.xlu1 %2104  ;;  %v2114_v3 = vmul.f32 %v4178_v57, %v5248_v15 }
 0xe99   :  { %v4182_v19 = vpop.eup %4181  ;;  %v2225_v0 = vpop.xlane.xlu0 %2224  ;;  %4197 = vrcp.f32 %v2105_v26  ;;  %v2241_v18 = vsel %vm55_vm1, %v2237_v36, %v2173_v34  ;;  %v2174_v49 = vmul.f32 %v4180_v25, %v5246_v29 }
 0xe9a   :  { %v4184_v42 = vpop.eup %4183  ;;  %4199 = vrcp.f32 %v2225_v0  ;;  %v2234_v30 = vmul.f32 %v4182_v19, %v5254_v17  ;;  %v2238_v15 = vsel %vm403_vm4, %v2054_v58, %v2114_v3  ;;  %v2588_v58 = vld [vmem:[#allocation2 + $0x1f0] sm:$0xff] }
 0xe9b   :  { %v2233_v45 = vmul.f32 %v4184_v42, %v5256_v23  ;;  %v2401_v23 = vld [vmem:[#allocation2 + $0x1d8] sm:$0xff]  ;;  %v4186_v48 = vpop.eup %4185  ;;  %v2242_v6 = vsel %vm55_vm1, %v2238_v15, %v2174_v49  ;;  %v2710_v15 = vld [vmem:[#allocation2 + $0x270] sm:$0xff] }
 0xe9c   :  { %v2266_v51 = vpop.permute.xlu1 %2265  ;;  %v4188_v10 = vpop.eup %4187  ;;  %v2246_v29 = vsel %vm1057_vm3, %v2242_v6, %v2234_v30  ;;  %v2055_v35 = vmul.f32 %v4186_v48, %v5326_v59  ;;  %v2589_v49 = vld [vmem:[#allocation2 + $0x1f8] sm:$0xff]  ;;  %v5523_v30 = vmov 0.0   ;;  %v2708_v48 = vld [vmem:[#allocation2 + $0x260] sm:$0xff] }
 0xe9d   :  { %v2268_v41 = vpop.permute.xlu0 %2267  ;;  %v2245_v14 = vsel %vm1057_vm3, %v2241_v18, %v2233_v45  ;;  %v4190_v39 = vpop.eup %4189  ;;  %v2056_v12 = vmul.f32 %v4188_v10, %v5328_v32  ;;  %v2707_v6 = vld [vmem:[#allocation2 + $0x258] sm:$0xff]  ;;  %v2706_v10 = vld [vmem:[#allocation2 + $0x250] sm:$0xff] }
 0xe9e   :  { %3888 = vmatprep.subr.mxu1 %v2268_v41  ;;  %3892 = vmatprep.mubr.f32.mxu1 %v2245_v14  ;;  %v2116_v56 = vmul.f32 %v4190_v39, %v5296_v52  ;;  %v2586_v14 = vld [vmem:[#allocation2 + $0x1e0] sm:$0xff]  ;;  %v2703_v39 = vld [vmem:[#allocation2 + $0x238] sm:$0xff] }
 0xe9f   :  { %3889 = vmatpush3.msra.mxu1 %v2268_v41  ;;  %v4192_v17 = vpop.eup %4191  ;;  %v2587_v41 = vld [vmem:[#allocation2 + $0x1e8] sm:$0xff] }
 0xea0   :  { %3890 = vmatprep.subr.mxu1 %v2266_v51  ;;  %v2176_v31 = vmul.f32 %v4192_v17, %v5304_v38  ;;  %v2240_v52 = vsel %vm403_vm4, %v2056_v12, %v2116_v56  ;;  %v2702_v17 = vld [vmem:[#allocation2 + $0x230] sm:$0xff] }
 0xea1   :  { %3891 = vmatpush3.msra.mxu1 %v2266_v51  ;;  %v2711_v51 = vld [vmem:[#allocation2 + $0x278] sm:$0xff] }
 0xea2   :  { %3893 = vmatmul.mubr.f32.vlgmr.msra.gmra.mxu1 %v2246_v29  ;;  %3898 = vmatprep.subr.mxu1 %v2401_v23  ;;  %v4194_v55 = vpop.eup %4193  ;;  %v2705_v29 = vld [vmem:[#allocation2 + $0x248] sm:$0xff] }
 0xea3   :  { %3899 = vmatpush3.msra.mxu1 %v2401_v23  ;;  %v4196_v40 = vpop.eup %4195  ;;  %v2236_v7 = vmul.f32 %v4194_v55, %v5312_v43  ;;  %v2398_v43 = vld [vmem:[#allocation2 + $0x1c0] sm:$0xff]  ;;  %3926 = vmatprep.subr.mxu0 %v2711_v51  ;;  %v2709_v23 = vld [vmem:[#allocation2 + $0x268] sm:$0xff] }
 0xea4   :  { %3900 = vmatprep.subr.mxu1 %v2400_v1  ;;  %v2175_v63 = vmul.f32 %v4196_v40, %v5290_v4  ;;  %v2399_v4 = vld [vmem:[#allocation2 + $0x1c8] sm:$0xff]  ;;  %3927 = vmatpush3.msra.mxu0 %v2711_v51  ;;  %v2700_v40 = vld [vmem:[#allocation2 + $0x220] sm:$0xff] }
 0xea5   :  { %3901 = vmatpush3.msra.mxu1 %v2400_v1  ;;  %3928 = vmatprep.subr.mxu0 %v2710_v15  ;;  %v2704_v1 = vld [vmem:[#allocation2 + $0x240] sm:$0xff]  ;;  %v2701_v55 = vld [vmem:[#allocation2 + $0x228] sm:$0xff] }
 0xea6   :  { %v4198_v54 = vpop.eup %4197  ;;  %3902 = vmatprep.subr.mxu1 %v2399_v4  ;;  %3929 = vmatpush3.msra.mxu0 %v2710_v15  ;;  %v2697_v15 = vld [vmem:[#allocation2 + $0x208] sm:$0xff] }
 0xea7   :  { %v4200_v16 = vpop.eup %4199  ;;  %v2115_v46 = vmul.f32 %v4198_v54, %v5282_v11  ;;  %v2244_v11 = vsel %vm55_vm1, %v2240_v52, %v2176_v31  ;;  %3903 = vmatpush3.msra.mxu1 %v2399_v4  ;;  %3930 = vmatprep.subr.mxu0 %v2709_v23 }
 0xea8   :  { %v2235_v61 = vmul.f32 %v4200_v16, %v5298_v22  ;;  %v2248_v38 = vsel %vm1057_vm3, %v2244_v11, %v2236_v7  ;;  %3904 = vmatprep.subr.mxu1 %v2398_v43  ;;  %3931 = vmatpush3.msra.mxu0 %v2709_v23  ;;  %v2696_v23 = vld [vmem:[#allocation2 + $0x200] sm:$0xff] }
 0xea9   :  { %v2239_v60 = vsel %vm403_vm4, %v2055_v35, %v2115_v46  ;;  %3905 = vmatpush3.msra.mxu1 %v2398_v43  ;;  %3932 = vmatprep.subr.mxu0 %v2708_v48 }
 0xeaa   :  { %v2243_v24 = vsel %vm55_vm1, %v2239_v60, %v2175_v63  ;;  %3912 = vmatprep.subr.mxu1 %v2589_v49  ;;  %3933 = vmatpush3.msra.mxu0 %v2708_v48  ;;  %v3362_v48 = vld [vmem:[#allocation5 + $0xe] ss:$0 sm:$0xff]  ;;  %vm2849_vm1 = vcmask 1040384  }
 0xeab   :  { %v2247_v59 = vsel %vm1057_vm3, %v2243_v24, %v2235_v61  ;;  %3934 = vmatprep.subr.mxu0 %v2707_v6 }
 0xeac   :  { %3895 = vmatprep.mubr.f32.mxu1 %v2247_v59  ;;  %3935 = vmatpush3.msra.mxu0 %v2707_v6 }
 0xead   :  { %3896 = vmatmul.mubr.f32.gmra.mxu1 %v2248_v38  ;;  %3936 = vmatprep.subr.mxu0 %v2706_v10 }
 0xeae   :  { %3937 = vmatpush3.msra.mxu0 %v2706_v10 }
 0xeaf   :  { %3938 = vmatprep.subr.mxu0 %v2705_v29 }
 0xeb0   :  { %3939 = vmatpush3.msra.mxu0 %v2705_v29 }
 0xeb1   :  { %3940 = vmatprep.subr.mxu0 %v2704_v1 }
 0xeb2   :  { %3941 = vmatpush3.msra.mxu0 %v2704_v1 }
 0xeb3   :  { %3942 = vmatprep.subr.mxu0 %v2703_v39 }
 0xeb4   :  { %3943 = vmatpush3.msra.mxu0 %v2703_v39 }
 0xeb5   :  { %3944 = vmatprep.subr.mxu0 %v2702_v17 }
 0xeb6   :  { %3945 = vmatpush3.msra.mxu0 %v2702_v17 }
 0xeb7   :  { %3946 = vmatprep.subr.mxu0 %v2701_v55 }
 0xeb8   :  { %3947 = vmatpush3.msra.mxu0 %v2701_v55 }
 0xeb9   :  { %3948 = vmatprep.subr.mxu0 %v2700_v40 }
 0xeba   :  { %3949 = vmatpush3.msra.mxu0 %v2700_v40 }
 0xf62   :  { %v3894_v22 = vpop.f32.mrf.mxu1 }
 0xf64   :  { %v2379_v32 = vpop.f32.mrf.mxu1 }
 0xf65   :  { %3906 = vmatprep.mubr.msk.f32.mxu1 %vm403_vm4, %v2379_v32 }
 0xf66   :  { %3907 = vmatmul.mubr.msk.f32.vlgmr.msra.gmra.mxu1 %vm403_vm4, %v3894_v22 }
 0xf67   :  { %3913 = vmatpush3.msra.mxu1 %v2589_v49 }
 0xf68   :  { %3914 = vmatprep.subr.mxu1 %v2588_v58 }
 0xf69   :  { %3915 = vmatpush3.msra.mxu1 %v2588_v58 }
 0xf6a   :  { %3916 = vmatprep.subr.mxu1 %v2587_v41 }
 0xf6b   :  { %3917 = vmatpush3.msra.mxu1 %v2587_v41 }
 0xf6c   :  { %3918 = vmatprep.subr.mxu1 %v2586_v14 }
 0xf6d   :  { %v3897_v62 = vpop.f32.mrf.mxu1  ;;  %3919 = vmatpush3.msra.mxu1 %v2586_v14 }
 0xf6e   :  { %3964 = vmatprep.subr.mxu1 %v5523_v30 }
 0xf6f   :  { %v2389_v37 = vpop.f32.mrf.mxu1 }
 0xf70   :  { %3909 = vmatprep.mubr.msk.f32.mxu1 %vm403_vm4, %v2389_v37 }
 0xf71   :  { %3910 = vmatmul.mubr.msk.f32.gmra.mxu1 %vm403_vm4, %v3897_v62 }
0x1026   :  { %v3908_v53 = vpop.f32.mrf.mxu1 }
0x1027   :  { %v2491_v8 = vadd.f32 %v3908_v53, %v3355_v27 }
0x1028   :  { %v2485_v50 = vpop.f32.mrf.mxu1 }
0x1029   :  { %v5399_v20 = vadd.f32 %v2491_v8, %v5055_v28  ;;  %v2486_v13 = vadd.f32 %v3355_v27, %v2485_v50 }
0x102b   :  { %v5402_v2 = vadd.f32 %v2486_v13, %v5053_v21  ;;  %v2513_v33 = vsel %vm403_vm4, %v5399_v20, 0.0  ;;  %v2527_v9 = vmul.f32 %v5399_v20, %v5399_v20 }
0x102c   :  { %2514 = vadd.xlane.f32.xlu1 %v2513_v33 }
0x102d   :  { %v2510_v57 = vsel %vm403_vm4, %v5402_v2, 0.0  ;;  %v2533_v26 = vsel %vm403_vm4, %v2527_v9, 0.0  ;;  %v2526_v28 = vmul.f32 %v5402_v2, %v5402_v2 }
0x102e   :  { %2511 = vadd.xlane.f32.xlu0 %v2510_v57 }
0x102f   :  { %v2530_v5 = vsel %vm403_vm4, %v2526_v28, 0.0  ;;  %v3360_v28 = vld [vmem:[#allocation5 + $0xc] ss:$0 sm:$0xff] }
0x1031   :  { %v3911_v25 = vpop.f32.mrf.mxu1 }
0x1032   :  { %v2501_v34 = vadd.f32 %v3911_v25, %v3355_v27  ;;  %2534 = vadd.xlane.f32.xlu0 %v2533_v26 }
0x1033   :  { %v2495_v21 = vpop.f32.mrf.mxu1 }
0x1034   :  { %v2496_v19 = vadd.f32 %v3355_v27, %v2495_v21  ;;  %v5414_v0 = vadd.f32 %v2501_v34, %v5064_v44 }
0x1036   :  { %v5418_v42 = vadd.f32 %v2496_v19, %v5062_v47  ;;  %2531 = vadd.xlane.f32.xlu0 %v2530_v5  ;;  %v2519_v36 = vsel %vm403_vm4, %v5414_v0, 0.0  ;;  %v2529_v44 = vmul.f32 %v5414_v0, %v5414_v0  ;;  %v3361_v5 = vld [vmem:[#allocation5 + $0xd] ss:$0 sm:$0xff] }
0x1038   :  { %v2516_v3 = vsel %vm403_vm4, %v5418_v42, 0.0  ;;  %v2528_v45 = vmul.f32 %v5418_v42, %v5418_v42  ;;  %v2539_v47 = vsel %vm403_vm4, %v2529_v44, 0.0 }
0x1039   :  { %2517 = vadd.xlane.f32.xlu1 %v2516_v3 }
0x103a   :  { %2520 = vadd.xlane.f32.xlu0 %v2519_v36  ;;  %v2536_v18 = vsel %vm403_vm4, %v2528_v45, 0.0 }
0x103d   :  { %2537 = vadd.xlane.f32.xlu1 %v2536_v18 }
0x103e   :  { %2540 = vadd.xlane.f32.xlu0 %v2539_v47 }
0x10b5   :  { %v2515_v54 = vpop.xlane.xlu1 %2514 }
0x10b6   :  { %v2523_v16 = vmul.f32 0.03125, %v2515_v54 }
0x10b7   :  { %v2512_v56 = vpop.xlane.xlu0 %2511 }
0x10b8   :  { %v2547_v46 = vmul.f32 %v2523_v16, %v2523_v16  ;;  %v2522_v31 = vmul.f32 0.03125, %v2512_v56  ;;  %v2555_v9 = vsub.f32 %v5399_v20, %v2523_v16 }
0x10ba   :  { %v2546_v61 = vmul.f32 %v2522_v31, %v2522_v31  ;;  %v2554_v26 = vsub.f32 %v5402_v2, %v2522_v31  ;;  %v3367_v31 = vld [vmem:[#allocation5 + $0xf] ss:$0 sm:$0xff] }
0x10bb   :  { %v2535_v35 = vpop.xlane.xlu0 %2534 }
0x10bc   :  { %v2543_v63 = vmul.f32 0.03125, %v2535_v35 }
0x10be   :  { %v2551_v12 = vsub.f32 %v2543_v63, %v2547_v46 }
0x10bf   :  { %v2532_v7 = vpop.xlane.xlu0 %2531 }
0x10c0   :  { %v2559_v60 = vadd.f32 1e-05, %v2551_v12  ;;  %v2542_v24 = vmul.f32 0.03125, %v2532_v7 }
0x10c2   :  { %4201 = vrsqrt.f32 %v2559_v60  ;;  %v2550_v52 = vsub.f32 %v2542_v24, %v2546_v61  ;;  %v2518_v59 = vpop.xlane.xlu1 %2517 }
0x10c3   :  { %v2524_v11 = vmul.f32 0.03125, %v2518_v59  ;;  %v2521_v38 = vpop.xlane.xlu0 %2520 }
0x10c4   :  { %v2558_v4 = vadd.f32 1e-05, %v2550_v52  ;;  %v2525_v43 = vmul.f32 0.03125, %v2521_v38 }
0x10c5   :  { %v2548_v32 = vmul.f32 %v2524_v11, %v2524_v11  ;;  %v2556_v36 = vsub.f32 %v5418_v42, %v2524_v11  ;;  %v2699_v42 = vld [vmem:[#allocation2 + $0x218] sm:$0xff] }
0x10c6   :  { %4203 = vrsqrt.f32 %v2558_v4  ;;  %v2538_v22 = vpop.xlane.xlu1 %2537  ;;  %v2549_v27 = vmul.f32 %v2525_v43, %v2525_v43  ;;  %v2557_v47 = vsub.f32 %v5414_v0, %v2525_v43  ;;  %3950 = vmatprep.subr.mxu0 %v2699_v42  ;;  %v2698_v0 = vld [vmem:[#allocation2 + $0x210] sm:$0xff] }
0x10c7   :  { %v2544_v62 = vmul.f32 0.03125, %v2538_v22  ;;  %v2541_v37 = vpop.xlane.xlu0 %2540  ;;  %3951 = vmatpush3.msra.mxu0 %v2699_v42 }
0x10c8   :  { %v2545_v53 = vmul.f32 0.03125, %v2541_v37  ;;  %3952 = vmatprep.subr.mxu0 %v2698_v0  ;;  %v2852_v37 = vld [vmem:[#allocation2 + $0x288] sm:$0xff] }
0x10c9   :  { %v2552_v8 = vsub.f32 %v2544_v62, %v2548_v32  ;;  %3953 = vmatpush3.msra.mxu0 %v2698_v0  ;;  %v2854_v32 = vld [vmem:[#allocation2 + $0x298] sm:$0xff]  ;;  %v2853_v62 = vld [vmem:[#allocation2 + $0x290] sm:$0xff]  ;;  %v3370_v0 = vld [vmem:[#allocation5 + $0x12] ss:$0 sm:$0xff] }
0x10ca   :  { %v2553_v50 = vsub.f32 %v2545_v53, %v2549_v27  ;;  %3954 = vmatprep.subr.mxu0 %v2697_v15  ;;  %v2851_v27 = vld [vmem:[#allocation2 + $0x280] sm:$0xff] }
0x10cb   :  { %v2560_v13 = vadd.f32 1e-05, %v2552_v8  ;;  %3955 = vmatpush3.msra.mxu0 %v2697_v15 }
0x10cc   :  { %v2561_v33 = vadd.f32 1e-05, %v2553_v50  ;;  %3956 = vmatprep.subr.mxu0 %v2696_v23 }
0x10cd   :  { %4205 = vrsqrt.f32 %v2560_v13  ;;  %3957 = vmatpush3.msra.mxu0 %v2696_v23 }
0x10ce   :  { %4207 = vrsqrt.f32 %v2561_v33 }
0x10cf   :  { %v4202_v57 = vpop.eup %4201 }
0x10d0   :  { %v2567_v25 = vmul.f32 %v4202_v57, %v2555_v9 }
0x10d2   :  { %v2575_v19 = vmul.f32 %v3360_v28, %v2567_v25 }
0x10d3   :  { %v4204_v34 = vpop.eup %4203 }
0x10d4   :  { %v2566_v21 = vmul.f32 %v4204_v34, %v2554_v26  ;;  %v2583_v44 = vadd.f32 %v3361_v5, %v2575_v19 }
0x10d6   :  { %v2574_v3 = vmul.f32 %v3360_v28, %v2566_v21 }
0x10d8   :  { %v2582_v45 = vadd.f32 %v3361_v5, %v2574_v3 }
0x10da   :  { %v4206_v18 = vpop.eup %4205  ;;  %3920 = vmatprep.mubr.msk.f32.mxu1 %vm403_vm4, %v2582_v45 }
0x10db   :  { %v4208_v49 = vpop.eup %4207  ;;  %3921 = vmatmul.mubr.msk.f32.vlgmr.msra.gmra.mxu1 %vm403_vm4, %v2583_v44  ;;  %v2568_v20 = vmul.f32 %v4206_v18, %v2556_v36 }
0x10dc   :  { %v2569_v2 = vmul.f32 %v4208_v49, %v2557_v47  ;;  %3965 = vmatpush3.msra.mxu1 %v2854_v32  ;;  %v3368_v47 = vld [vmem:[#allocation5 + $0x10] ss:$0 sm:$0xff] }
0x10dd   :  { %v2576_v58 = vmul.f32 %v3360_v28, %v2568_v20  ;;  %3966 = vmatprep.subr.mxu1 %v5523_v30 }
0x10de   :  { %v2577_v41 = vmul.f32 %v3360_v28, %v2569_v2  ;;  %3967 = vmatpush3.msra.mxu1 %v2853_v62  ;;  %v3373_v62 = vld [vmem:[#allocation5 + $0x14] ss:$0 sm:$0xff] }
0x10df   :  { %v2584_v14 = vadd.f32 %v3361_v5, %v2576_v58  ;;  %3968 = vmatprep.subr.mxu1 %v5523_v30  ;;  %v3369_v58 = vld [vmem:[#allocation5 + $0x11] ss:$0 sm:$0xff] }
0x10e0   :  { %v2585_v51 = vadd.f32 %v3361_v5, %v2577_v41  ;;  %3969 = vmatpush3.msra.mxu1 %v2852_v37 }
0x10e1   :  { %3923 = vmatprep.mubr.msk.f32.mxu1 %vm403_vm4, %v2584_v14  ;;  %3970 = vmatprep.subr.mxu1 %v5523_v30 }
0x10e2   :  { %3924 = vmatmul.mubr.msk.f32.gmra.mxu1 %vm403_vm4, %v2585_v51 }
0x10e3   :  { %3972 = vmatprep.mubr.msk.f32.mxu1 %vm4295_vm0, %v5523_v30  ;;  %3971 = vmatpush3.msra.mxu1 %v2851_v27 }
0x10e4   :  { %3975 = vmatprep.subr.mxu1 %v5523_v30 }
0x119b   :  { %v3922_v6 = vpop.f32.mrf.mxu1 }
0x119c   :  { %v2679_v10 = vadd.f32 %v3922_v6, %v3362_v48 }
0x119d   :  { %v2673_v29 = vpop.f32.mrf.mxu1 }
0x119e   :  { %v2674_v1 = vadd.f32 %v3362_v48, %v2673_v29  ;;  %v2693_v17 = vmax.f32 %v2679_v10, 0.0 }
0x11a0   :  { %v2692_v39 = vmax.f32 %v2674_v1, 0.0 }
0x11a2   :  { %3958 = vmatprep.mubr.f32.mxu0 %v2692_v39  ;;  %v3925_v55 = vpop.f32.mrf.mxu1 }
0x11a3   :  { %3959 = vmatmul.mubr.f32.vlgmr.msra.gmra.mxu0 %v2693_v17  ;;  %v2689_v40 = vadd.f32 %v3925_v55, %v3362_v48 }
0x11a4   :  { %v2683_v54 = vpop.f32.mrf.mxu1 }
0x11a5   :  { %v2684_v56 = vadd.f32 %v3362_v48, %v2683_v54  ;;  %v2695_v35 = vmax.f32 %v2689_v40, 0.0 }
0x11a7   :  { %v2694_v16 = vmax.f32 %v2684_v56, 0.0 }
0x11a9   :  { %3961 = vmatprep.mubr.f32.mxu0 %v2694_v16 }
0x11aa   :  { %3962 = vmatmul.mubr.f32.gmra.mxu0 %v2695_v35 }
0x1263   :  { %v3960_v46 = vpop.f32.mrf.mxu0 }
0x1264   :  { %v2973_v46 = vld [vmem:[#allocation2 + $0x2b8] sm:$0xff] }
0x1265   :  { %v2783_v63 = vpop.f32.mrf.mxu0 }
0x1266   :  { %v2784_v12 = vadd.f32 %v3367_v31, %v2783_v63  ;;  %v2971_v63 = vld [vmem:[#allocation2 + $0x2a8] sm:$0xff] }
0x1268   :  { %v2800_v7 = vadd.f32 %v2784_v12, %v2582_v45  ;;  %v2970_v12 = vld [vmem:[#allocation2 + $0x2a0] sm:$0xff] }
0x126a   :  { %v2804_v61 = vsel %vm403_vm4, %v2800_v7, 0.0  ;;  %v3963_v60 = vpop.f32.mrf.mxu0  ;;  %v2812_v24 = vmul.f32 %v2800_v7, %v2800_v7 }
0x126b   :  { %2805 = vadd.xlane.f32.xlu0 %v2804_v61 }
0x126c   :  { %v2792_v52 = vpop.f32.mrf.mxu0  ;;  %v2814_v11 = vsel %vm403_vm4, %v2812_v24, 0.0 }
0x126d   :  { %v2793_v59 = vadd.f32 %v3367_v31, %v2792_v52  ;;  %v2972_v31 = vld [vmem:[#allocation2 + $0x2b0] sm:$0xff] }
0x126f   :  { %v2801_v38 = vadd.f32 %v2793_v59, %v2584_v14  ;;  %2815 = vadd.xlane.f32.xlu0 %v2814_v11 }
0x1271   :  { %v2807_v4 = vsel %vm403_vm4, %v2801_v38, 0.0  ;;  %v2813_v43 = vmul.f32 %v2801_v38, %v2801_v38 }
0x1272   :  { %2808 = vadd.xlane.f32.xlu1 %v2807_v4 }
0x1273   :  { %v2817_v22 = vsel %vm403_vm4, %v2813_v43, 0.0 }
0x1276   :  { %2818 = vadd.xlane.f32.xlu1 %v2817_v22  ;;  %v3372_v22 = vld [vmem:[#allocation5 + $0x13] ss:$0 sm:$0xff] }
0x12f4   :  { %v2806_v53 = vpop.xlane.xlu0 %2805 }
0x12f5   :  { %v2810_v8 = vmul.f32 0.03125, %v2806_v53  ;;  %v3071_v53 = vld [vmem:[#allocation2 + $0x2c8] sm:$0xff] }
0x12f7   :  { %v2822_v13 = vmul.f32 %v2810_v8, %v2810_v8  ;;  %v2826_v45 = vsub.f32 %v2800_v7, %v2810_v8  ;;  %v3055_v7 = vld [vmem:[%s5481_s1] sm:$0x3]  ;;  %v3374_v8 = vld [vmem:[#allocation5 + $0x15] ss:$0 sm:$0xff]  ;;  %s4301_s1 = smov 112  }
0x12f8   :  { %v2816_v50 = vpop.xlane.xlu0 %2815 }
0x12f9   :  { %v2820_v33 = vmul.f32 0.03125, %v2816_v50 }
0x12fb   :  { %v2824_v57 = vsub.f32 %v2820_v33, %v2822_v13  ;;  %v2809_v9 = vpop.xlane.xlu1 %2808 }
0x12fc   :  { %v2811_v25 = vmul.f32 0.03125, %v2809_v9 }
0x12fd   :  { %v2828_v26 = vadd.f32 1e-05, %v2824_v57 }
0x12fe   :  { %v2823_v34 = vmul.f32 %v2811_v25, %v2811_v25  ;;  %v2827_v36 = vsub.f32 %v2801_v38, %v2811_v25  ;;  %v3070_v25 = vld [vmem:[#allocation2 + $0x2c0] sm:$0xff] }
0x12ff   :  { %v2819_v28 = vpop.xlane.xlu1 %2818  ;;  %4209 = vrsqrt.f32 %v2828_v26 }
0x1300   :  { %v2821_v21 = vmul.f32 0.03125, %v2819_v28 }
0x1302   :  { %v2825_v19 = vsub.f32 %v2821_v21, %v2823_v34 }
0x1304   :  { %v2829_v5 = vadd.f32 1e-05, %v2825_v19 }
0x1306   :  { %4211 = vrsqrt.f32 %v2829_v5  ;;  %v3155_v5 = vld [vmem:[#allocation2 + $0x2e8] sm:$0xff] }
0x130c   :  { %v4210_v3 = vpop.eup %4209 }
0x130d   :  { %v2832_v44 = vmul.f32 %v4210_v3, %v2826_v45  ;;  %v3154_v3 = vld [vmem:[#allocation2 + $0x2e0] sm:$0xff]  ;;  %v3153_v45 = vld [vmem:[#allocation2 + $0x2d8] sm:$0xff] }
0x130f   :  { %v2838_v20 = vmul.f32 %v3368_v47, %v2832_v44  ;;  %v3376_v44 = vld [vmem:[#allocation5 + $0x16] ss:$0 sm:$0xff] }
0x1311   :  { %v2844_v14 = vadd.f32 %v3369_v58, %v2838_v20 }
0x1313   :  { %v4212_v18 = vpop.eup %4211 }
0x1314   :  { %v2833_v49 = vmul.f32 %v4212_v18, %v2827_v36  ;;  %v3152_v36 = vld [vmem:[#allocation2 + $0x2d0] sm:$0xff] }
0x1316   :  { %v2839_v2 = vmul.f32 %v3368_v47, %v2833_v49 }
0x1318   :  { %v2845_v41 = vadd.f32 %v3369_v58, %v2839_v2  ;;  %v3378_v2 = vld [vmem:[#allocation5 + $0x17] ss:$0 sm:$0xff] }
0x131a   :  { %v2847_v51 = vrot.slane %v2845_v41, 7 }
0x131c   :  { %v2850_v42 = vsel %vm2849_vm1, %v2844_v14, %v2847_v51 }
0x131d   :  { %3973 = vmatmul.mubr.msk.f32.vlgmr.msra.gmra.mxu1 %vm403_vm4, %v2850_v42 }
0x131e   :  { %3983 = vmatprep.mubr.msk.f32.mxu1 %vm4295_vm0, %v5523_v30  ;;  %3976 = vmatpush3.msra.mxu1 %v2973_v46 }
0x131f   :  { %3977 = vmatprep.subr.mxu1 %v5523_v30 }
0x1320   :  { %3978 = vmatpush3.msra.mxu1 %v2972_v31 }
0x1321   :  { %3979 = vmatprep.subr.mxu1 %v5523_v30 }
0x1322   :  { %3980 = vmatpush3.msra.mxu1 %v2971_v63 }
0x1323   :  { %3981 = vmatprep.subr.mxu1 %v5523_v30 }
0x1324   :  { %3982 = vmatpush3.msra.mxu1 %v2970_v12 }
0x1325   :  { %3986 = vmatprep.subr.mxu1 %v5523_v30 }
0x13dd   :  { %v2929_v15 = vpop.f32.mrf.mxu1 }
0x13de   :  { %v2930_v23 = vadd.f32 %v3370_v0, %v2929_v15 }
0x13df   :  { %v3974_v48 = vpop.f32.mrf.mxu1 }
0x13e0   :  { %v2934_v6 = vmul.f32 0.044715, %v2930_v23  ;;  %v2933_v55 = vmul.f32 0.5, %v2930_v23 }
0x13e2   :  { %v2935_v10 = vmul.f32 %v2934_v6, %v2930_v23 }
0x13e4   :  { %v2936_v29 = vmul.f32 %v2935_v10, %v2930_v23 }
0x13e6   :  { %v2937_v1 = vadd.f32 %v2936_v29, %v2930_v23 }
0x13e8   :  { %v2938_v39 = vmul.f32 0.7978846, %v2937_v1 }
0x13ea   :  { %4213 = vtanh.f32 %v2938_v39 }
0x13f7   :  { %v4214_v17 = vpop.eup %4213 }
0x13f8   :  { %v2940_v40 = vadd.f32 1.0, %v4214_v17 }
0x13fa   :  { %v2941_v54 = vmul.f32 %v2940_v40, %v2933_v55 }
0x13fc   :  { %v2945_v56 = vsel %vm2944_vm5, %v2941_v54, 0.0  ;;  %v2949_v16 = vmul.f32 %v2941_v54, %v2941_v54 }
0x13fd   :  { %2946 = vadd.xlane.f32.xlu1 %v2945_v56 }
0x13fe   :  { %v2950_v35 = vsel %vm2944_vm5, %v2949_v16, 0.0 }
0x13ff   :  { %2951 = vadd.xlane.f32.xlu0 %v2950_v35 }
0x140e   :  { %3057 = vrot.lane.b32.xlu1 %v3055_v7, %s4300_s6 }
0x1486   :  { %v2947_v61 = vpop.xlane.xlu1 %2946 }
0x1487   :  { %v2948_v60 = vmul.f32 0.03125, %v2947_v61 }
0x1488   :  { %v2952_v24 = vpop.xlane.xlu0 %2951 }
0x1489   :  { %v2954_v52 = vmul.f32 %v2948_v60, %v2948_v60  ;;  %v2953_v59 = vmul.f32 0.03125, %v2952_v24  ;;  %v2956_v4 = vsub.f32 %v2941_v54, %v2948_v60 }
0x148a   :  { %v3058_v26 = vpop.permute.xlu1 %3057 }
0x148b   :  { %v2955_v11 = vsub.f32 %v2953_v59, %v2954_v52 }
0x148d   :  { %v2957_v38 = vadd.f32 1e-05, %v2955_v11 }
0x148f   :  { %4215 = vrsqrt.f32 %v2957_v38 }
0x149c   :  { %v4216_v43 = vpop.eup %4215 }
0x149d   :  { %v2959_v32 = vmul.f32 %v4216_v43, %v2956_v4 }
0x149f   :  { %v2964_v37 = vmul.f32 %v3372_v22, %v2959_v32 }
0x14a1   :  { %v2969_v27 = vadd.f32 %v3373_v62, %v2964_v37 }
0x14a3   :  { %3984 = vmatmul.mubr.msk.f32.vlgmr.msra.gmra.mxu1 %vm403_vm4, %v2969_v27 }
0x14a4   :  { %3990 = vmatprep.mubr.msk.f32.mxu1 %vm4295_vm0, %v5523_v30  ;;  %3987 = vmatpush3.msra.mxu1 %v3071_v53 }
0x14a5   :  { %3988 = vmatprep.subr.mxu1 %v5523_v30 }
0x14a6   :  { %3989 = vmatpush3.msra.mxu1 %v3070_v25 }
0x14a7   :  { %3993 = vmatprep.subr.mxu1 %v5523_v30 }
0x1563   :  { %v3048_v50 = vpop.f32.mrf.mxu1 }
0x1564   :  { %v3049_v13 = vadd.f32 %v3374_v8, %v3048_v50 }
0x1565   :  { %v3985_v33 = vpop.f32.mrf.mxu1 }
0x1566   :  { %v3052_v57 = vmul.f32 0.5, %v3049_v13 }
0x1568   :  { %v3053_v9 = vmul.f32 1.442695, %v3052_v57 }
0x156a   :  { %4217 = vpow2.f32 %v3053_v9 }
0x1577   :  { %v4218_v28 = vpop.eup %4217 }
0x1578   :  { %v3060_v34 = vmul.f32 %v4218_v28, %v3058_v26 }
0x157a   :  { %3062 = vrot.lane.b32.xlu0 %v3060_v34, %s4301_s1 }
0x15ec   :  { %v3063_v21 = vpop.permute.xlu0 %3062 }
0x15ed   :  { %v3065_v19 = vadd.f32 %v3063_v21, %v3049_v13 }
0x15ef   :  { %3991 = vmatmul.mubr.msk.f32.vlgmr.msra.gmra.mxu1 %vm3077_vm6, %v3065_v19 }
0x15f0   :  { %3994 = vmatpush3.msra.mxu1 %v3155_v5  ;;  %4001 = vmatprep.mubr.msk.f32.mxu1 %vm4295_vm0, %v5523_v30  ;;  %vm3066_vm0 = vcmask 517120  }
0x15f1   :  { %3995 = vmatprep.subr.mxu1 %v5523_v30 }
0x15f2   :  { %3996 = vmatpush3.msra.mxu1 %v3154_v3 }
0x15f3   :  { %3997 = vmatprep.subr.mxu1 %v5523_v30 }
0x15f4   :  { %3998 = vmatpush3.msra.mxu1 %v3153_v45 }
0x15f5   :  { %3999 = vmatprep.subr.mxu1 %v5523_v30  ;;  %v4223_v30 = vld [vmem:[%s5480_s0] sm:$0x3]  ;;  %s4264_s0 = scalar_lea.vmem %s3254_s10, 32 }
0x15f6   :  { %4000 = vmatpush3.msra.mxu1 %v3152_v36  ;;  %v3067_v42 = vsel %vm3066_vm0, %v4223_v30, 0.0  ;;  %p4265_p10 = scmp.ne.s32.totalorder %s3254_s10, %s4264_s0  ;;  %p4270_p12 = scmp.lt.s32.totalorder %s4264_s0, %s4264_s0 }
0x15f8   :  { %p4271_p13 = por %p4270_p12, %p4269_p11 }
0x15fa   :  { %p4272_p0 = pnand %p4271_p13, %p4265_p10 }
0x16af   :  { %v3147_v18 = vpop.f32.mrf.mxu1 }
0x16b0   :  { %v3148_v47 = vadd.f32 %v3376_v44, %v3147_v18 }
0x16b1   :  { %v3992_v49 = vpop.f32.mrf.mxu1 }
0x16b2   :  { %v3151_v20 = vmax.f32 %v3148_v47, 0.0 }
0x16b4   :  { %4002 = vmatmul.mubr.msk.f32.vlgmr.msra.gmra.mxu1 %vm403_vm4, %v3151_v20 }
0x1774   :  { %v3230_v58 = vpop.f32.mrf.mxu1 }
0x1775   :  { %v3231_v41 = vadd.f32 %v3378_v2, %v3230_v58 }
0x1776   :  { %v4003_v14 = vpop.f32.mrf.mxu1 }
0x1777   :  { %v3234_v51 = vsel %vm3066_vm0, %v3231_v41, -inf }
0x1778   :  { %3235 = vmax.xlane.f32.xlu1 %v3234_v51 }
0x177c   :  { %3068 = vadd.xlane.f32.xlu1 %v3067_v42 }
0x1801   :  { %v3236_v0 = vpop.xlane.xlu1 %3235 }
0x1802   :  { %v3237_v15 = vsub.f32 %v3231_v41, %v3236_v0 }
0x1804   :  { %v3238_v23 = vmul.f32 1.442695, %v3237_v15 }
0x1805   :  { %v3069_v1 = vpop.xlane.xlu1 %3068 }
0x1806   :  { %4219 = vpow2.f32 %v3238_v23 }
0x1813   :  { %v4220_v48 = vpop.eup %4219 }
0x1814   :  { %v3240_v6 = vsel %vm3066_vm0, %v4220_v48, 0.0 }
0x1815   :  { %3241 = vadd.xlane.f32.xlu0 %v3240_v6 }
0x189e   :  { %v3242_v10 = vpop.xlane.xlu0 %3241 }
0x189f   :  { %4221 = vrcp.f32 %v3242_v10 }
0x18ac   :  { %v4222_v29 = vpop.eup %4221 }
0x18ad   :  { %v3244_v39 = vmul.f32 %v4222_v29, %v4220_v48 }
0x18af   :  { %v3245_v17 = vmul.f32 %v3244_v39, %v3069_v1 }
0x18b1   :  { %3246 = vst.msk [vmem:[#allocation7] sm:$0x3] %vm3066_vm0, %v3245_v17 }
0x18b2   :  { %4275 = shalt.err (!%p4272_p0)
}
0x18b3   :  { %3256 = dma.vmem_to_hbm [thread:$0]  %s3254_s10, 32, %s5484_s4, [#allocation4]  }
0x18b4   :  { %4288 = dma.done.wait [#allocation4], 32  }
0x18b5   :  { %4289 = vsyncadd [#allocation4], 4294967264 }
0x18b6   :  { %3260 = vsyncpa [#allocation3], 1 }
0x18b7   :  { %3261 = vsyncpa [#allocation6], 1 }
0x18b8   :  { %3262 = vsyncpa [#allocation4], 1 }

</bundles_post_ra>
